<compile_context>
chip_gen: v5e
topology: v5e:2x2
jax: 0.10.0
libtpu: 0.0.40
codegen_flags: <defaults>
</compile_context>

<pallas_src>
import functools

import jax
import jax.numpy as jnp
from jax.experimental import pallas as pl
from jax.experimental.pallas import tpu as pltpu


# ----------------------------------------------------------------------------
# Fused Pallas kernel: one grid step == one image (HW rows x 384 channels)
# ----------------------------------------------------------------------------
def _fused_inception_kernel(
    x_ref, shifts_ref,
    w11_ref, s11_ref, b11_ref,        # layer1 conv1 1x1: 384->32
    w21_ref, s21_ref, b21_ref,        # layer2 conv1 1x1: 384->32
    w31_ref, s31_ref, b31_ref,        # layer3 conv1 1x1: 384->32
    wc2_ref, sc2_ref, bc2_ref,        # layer1 conv2 3x3: 32->48   (9, 32, 48)
    wc3_ref, sc3_ref, bc3_ref,        # layer1 conv3 3x3: 48->64   (9, 48, 64)
    wc4_ref, sc4_ref, bc4_ref,        # layer1 conv4 1x1: 64->384
    w22_ref, s22_ref, b22_ref,        # layer2 conv2 1x1: 32->32
    w4a_ref, w4b_ref, w4c_ref, s4_ref, b4_ref,   # layer4 1x1: 448->384 (split-K)
    o_ref, *, rate):
    f32 = jnp.float32
    bf16 = jnp.bfloat16

    def mm_bn_relu(x_bf, w_ref, s_ref, b_ref):
        acc = jnp.dot(x_bf, w_ref[...], preferred_element_type=f32)
        return jnp.maximum(acc * s_ref[...] + b_ref[...], 0.0)

    def conv3x3_bn_relu(act_f32, w_ref, s_ref, b_ref):
        # 9-tap accumulation: shifts_ref[t] is a (HW,HW) 0/1 matrix that gathers the
        # (dy,dx)-shifted rows of the image (zero outside the image).  The shift
        # matmul only moves bf16 values, so casting it back to bf16 is lossless and
        # the result matches an im2col matmul up to f32 accumulation order.
        act_bf = act_f32.astype(bf16)
        cout = w_ref.shape[-1]
        acc = jnp.zeros((act_f32.shape[0], cout), f32)
        for t in range(9):
            shifted = jnp.dot(shifts_ref[t], act_bf, preferred_element_type=f32)
            acc = acc + jnp.dot(shifted.astype(bf16), w_ref[t],
                                preferred_element_type=f32)
        return jnp.maximum(acc * s_ref[...] + b_ref[...], 0.0)

    # X = relu(X)  (kept in f32 for the residual)
    xr = jnp.maximum(x_ref[...], 0.0)                         # (HW, 384) f32
    xr_bf = xr.astype(bf16)

    # three parallel 1x1 branches off the relu'd input (input read from HBM once)
    a = mm_bn_relu(xr_bf, w11_ref, s11_ref, b11_ref)          # (HW, 32)
    b = mm_bn_relu(xr_bf, w21_ref, s21_ref, b21_ref)          # (HW, 32)
    x3 = mm_bn_relu(xr_bf, w31_ref, s31_ref, b31_ref)         # (HW, 32)

    # layer1 tail: 3x3 -> 3x3 -> 1x1
    a = conv3x3_bn_relu(a, wc2_ref, sc2_ref, bc2_ref)         # (HW, 48)
    a = conv3x3_bn_relu(a, wc3_ref, sc3_ref, bc3_ref)         # (HW, 64)
    x1 = mm_bn_relu(a.astype(bf16), wc4_ref, sc4_ref, bc4_ref)   # (HW, 384)

    # layer2 tail: 1x1
    x2 = mm_bn_relu(b.astype(bf16), w22_ref, s22_ref, b22_ref)   # (HW, 32)

    # layer4 over concat([x1, x2, x3], channels) as a split-K matmul
    acc4 = jnp.dot(x1.astype(bf16), w4a_ref[...], preferred_element_type=f32)
    acc4 = acc4 + jnp.dot(x2.astype(bf16), w4b_ref[...], preferred_element_type=f32)
    acc4 = acc4 + jnp.dot(x3.astype(bf16), w4c_ref[...], preferred_element_type=f32)
    x4 = jnp.maximum(acc4 * s4_ref[...] + b4_ref[...], 0.0)   # (HW, 384)

    # residual + final relu; lane-dense (384 = 3*128) store
    o_ref[...] = jnp.maximum(xr + rate * x4, 0.0)


# ----------------------------------------------------------------------------
# Shift/mask matrices for the 3x3 pad=1 convs (built once on the host)
# ----------------------------------------------------------------------------
def make_shift_mats(H, W, dtype=jnp.bfloat16):
    HW = H * W
    m = jnp.arange(HW)
    y, x = m // W, m % W
    cols = jnp.arange(HW)
    mats = []
    for dy in (-1, 0, 1):
        for dx in (-1, 0, 1):
            yy, xx = y + dy, x + dx
            valid = (yy >= 0) & (yy < H) & (xx >= 0) & (xx < W)
            src = yy * W + xx
            mat = (src[:, None] == cols[None, :]) & valid[:, None]
            mats.append(mat.astype(dtype))
    return jnp.stack(mats, axis=0)   # (9, HW, HW), tap order = (dy, dx) row-major


# ----------------------------------------------------------------------------
# Parameter construction (deterministic, synthetic; BN folded in eval mode)
# ----------------------------------------------------------------------------
def make_conv_bn(key, cin, cout, ksize):
    """Returns (w2d (ksize*ksize*cin, cout), scale (cout,), bias (cout,)) in f32."""
    k1, k2, k3, k4, k5, k6 = jax.random.split(key, 6)
    fan_out = cout * ksize * ksize
    w = jax.random.normal(k1, (ksize, ksize, cin, cout), jnp.float32) * (2.0 / fan_out) ** 0.5
    conv_b = 0.01 * jax.random.normal(k2, (cout,), jnp.float32)
    gamma = 1.0 + 0.1 * jax.random.normal(k3, (cout,), jnp.float32)
    beta = 0.1 * jax.random.normal(k4, (cout,), jnp.float32)
    run_mean = 0.1 * jax.random.normal(k5, (cout,), jnp.float32)
    run_var = 1.0 + 0.1 * jnp.abs(jax.random.normal(k6, (cout,), jnp.float32))
    eps = 1e-5
    bn_scale = gamma / jnp.sqrt(run_var + eps)
    scale = bn_scale
    bias = (conv_b - run_mean) * bn_scale + beta
    return w.reshape(ksize * ksize * cin, cout), scale, bias


def make_params(key):
    keys = jax.random.split(key, 8)
    return {
        "l1_c1": make_conv_bn(keys[0], 384, 32, 1),
        "l1_c2": make_conv_bn(keys[1], 32, 48, 3),
        "l1_c3": make_conv_bn(keys[2], 48, 64, 3),
        "l1_c4": make_conv_bn(keys[3], 64, 384, 1),
        "l2_c1": make_conv_bn(keys[4], 384, 32, 1),
        "l2_c2": make_conv_bn(keys[5], 32, 32, 1),
        "l3_c1": make_conv_bn(keys[6], 384, 32, 1),
        "l4_c1": make_conv_bn(keys[7], 448, 384, 1),
    }


# ----------------------------------------------------------------------------
# Forward: single fused pallas_call
# ----------------------------------------------------------------------------
def _full_spec(arr):
    nd = arr.ndim
    return pl.BlockSpec(arr.shape, lambda i, _nd=nd: (0,) * _nd)


def inception_a_forward(x_nchw, params, rate=1.0):
    # NOTE: BatchNorm is implemented in eval mode (folded running stats).
    x = jnp.transpose(x_nchw, (0, 2, 3, 1)).astype(jnp.float32)   # NHWC
    N, H, W, C = x.shape
    HW = H * W
    assert C == 384 and HW % 8 == 0
    x2d = x.reshape(N * HW, C)

    shifts = make_shift_mats(H, W)

    def p1(name):
        w, s, b = params[name]
        return w.astype(jnp.bfloat16), s.reshape(1, -1), b.reshape(1, -1)

    def p3(name, cin):
        w, s, b = params[name]
        return (w.reshape(9, cin, -1).astype(jnp.bfloat16),
                s.reshape(1, -1), b.reshape(1, -1))

    w11, s11, b11 = p1("l1_c1")
    w21, s21, b21 = p1("l2_c1")
    w31, s31, b31 = p1("l3_c1")
    wc2, sc2, bc2 = p3("l1_c2", 32)
    wc3, sc3, bc3 = p3("l1_c3", 48)
    wc4, sc4, bc4 = p1("l1_c4")
    w22, s22, b22 = p1("l2_c2")
    w4, s4, b4 = p1("l4_c1")
    w4a, w4b, w4c = w4[:384, :], w4[384:416, :], w4[416:, :]   # split-K: X1|X2|X3

    inputs = (x2d, shifts,
              w11, s11, b11, w21, s21, b21, w31, s31, b31,
              wc2, sc2, bc2, wc3, sc3, bc3, wc4, sc4, bc4,
              w22, s22, b22, w4a, w4b, w4c, s4, b4)

    in_specs = [pl.BlockSpec((HW, C), lambda i: (i, 0))]        # per-image input block
    in_specs += [_full_spec(a) for a in inputs[1:]]             # weights/shifts resident

    out2d = pl.pallas_call(
        functools.partial(_fused_inception_kernel, rate=float(rate)),
        out_shape=jax.ShapeDtypeStruct((N * HW, C), jnp.float32),
        grid_spec=pltpu.PrefetchScalarGridSpec(
            num_scalar_prefetch=0,
            grid=(N,),
            in_specs=in_specs,
            out_specs=pl.BlockSpec((HW, C), lambda i: (i, 0)),
        ),
        compiler_params=pltpu.CompilerParams(
            dimension_semantics=("parallel",)),
    )(*inputs)

    out = out2d.reshape(N, H, W, C)
    return jnp.transpose(out, (0, 3, 1, 2))   # back to NCHW


# ----------------------------------------------------------------------------
# Pure-JAX reference (same bf16/f32 precision choices) for correctness check
# ----------------------------------------------------------------------------
def im2col3x3(x_nhwc):
    N, H, W, C = x_nhwc.shape
    xp = jnp.pad(x_nhwc, ((0, 0), (1, 1), (1, 1), (0, 0)))
    cols = [xp[:, dy:dy + H, dx:dx + W, :] for dy in range(3) for dx in range(3)]
    return jnp.concatenate(cols, axis=-1)   # (N, H, W, 9*C)


def _ref_mm(x2d, w2d, s, b):
    acc = jnp.dot(x2d.astype(jnp.bfloat16), w2d.astype(jnp.bfloat16),
                  preferred_element_type=jnp.float32)
    return jnp.maximum(acc * s[None, :] + b[None, :], 0.0)


def inception_a_reference(x_nchw, params, rate=1.0):
    x = jnp.transpose(x_nchw, (0, 2, 3, 1)).astype(jnp.float32)
    N, H, W, C = x.shape
    M = N * H * W
    xr2d = jnp.maximum(x.reshape(M, C), 0.0)
    a = _ref_mm(xr2d, *params["l1_c1"])
    a = _ref_mm(im2col3x3(a.reshape(N, H, W, 32)).reshape(M, 9 * 32), *params["l1_c2"])
    a = _ref_mm(im2col3x3(a.reshape(N, H, W, 48)).reshape(M, 9 * 48), *params["l1_c3"])
    x1 = _ref_mm(a, *params["l1_c4"])
    x2 = _ref_mm(_ref_mm(xr2d, *params["l2_c1"]), *params["l2_c2"])
    x3 = _ref_mm(xr2d, *params["l3_c1"])
    x4 = _ref_mm(jnp.concatenate([x1, x2, x3], axis=-1), *params["l4_c1"])
    out2d = jnp.maximum(xr2d + rate * x4, 0.0)
    return jnp.transpose(out2d.reshape(N, H, W, C), (0, 3, 1, 2))


if __name__ == "__main__":
    key = jax.random.PRNGKey(0)
    kx, kp = jax.random.split(key)

    # InceptionA requires 384 input channels; keep batch/spatial small.
    x = jax.random.normal(kx, (2, 384, 8, 8), jnp.float32)   # NCHW like PyTorch
    params = make_params(kp)

    fwd = jax.jit(functools.partial(inception_a_forward, rate=1.0))
    out = jax.block_until_ready(fwd(x, params))

    ref = inception_a_reference(x, params, rate=1.0)
    assert out.shape == (2, 384, 8, 8)
    assert bool(jnp.isfinite(out).all())
    max_err = float(jnp.max(jnp.abs(out - ref)))
    assert max_err < 3e-2, f"max abs err {max_err}"

    print("KERNEL_OK")
</pallas_src>

<mosaic_0001>
module attributes {stable_mosaic.version = 11 : i64} {
  func.func @_fused_inception_kernel(%arg0: i32, %arg1: memref<64x384xf32, #tpu.memory_space<vmem>>, %arg2: memref<9x64x64xbf16, #tpu.memory_space<vmem>>, %arg3: memref<384x32xbf16, #tpu.memory_space<vmem>>, %arg4: memref<1x32xf32, #tpu.memory_space<vmem>>, %arg5: memref<1x32xf32, #tpu.memory_space<vmem>>, %arg6: memref<384x32xbf16, #tpu.memory_space<vmem>>, %arg7: memref<1x32xf32, #tpu.memory_space<vmem>>, %arg8: memref<1x32xf32, #tpu.memory_space<vmem>>, %arg9: memref<384x32xbf16, #tpu.memory_space<vmem>>, %arg10: memref<1x32xf32, #tpu.memory_space<vmem>>, %arg11: memref<1x32xf32, #tpu.memory_space<vmem>>, %arg12: memref<9x32x48xbf16, #tpu.memory_space<vmem>>, %arg13: memref<1x48xf32, #tpu.memory_space<vmem>>, %arg14: memref<1x48xf32, #tpu.memory_space<vmem>>, %arg15: memref<9x48x64xbf16, #tpu.memory_space<vmem>>, %arg16: memref<1x64xf32, #tpu.memory_space<vmem>>, %arg17: memref<1x64xf32, #tpu.memory_space<vmem>>, %arg18: memref<64x384xbf16, #tpu.memory_space<vmem>>, %arg19: memref<1x384xf32, #tpu.memory_space<vmem>>, %arg20: memref<1x384xf32, #tpu.memory_space<vmem>>, %arg21: memref<32x32xbf16, #tpu.memory_space<vmem>>, %arg22: memref<1x32xf32, #tpu.memory_space<vmem>>, %arg23: memref<1x32xf32, #tpu.memory_space<vmem>>, %arg24: memref<384x384xbf16, #tpu.memory_space<vmem>>, %arg25: memref<32x384xbf16, #tpu.memory_space<vmem>>, %arg26: memref<32x384xbf16, #tpu.memory_space<vmem>>, %arg27: memref<1x384xf32, #tpu.memory_space<vmem>>, %arg28: memref<1x384xf32, #tpu.memory_space<vmem>>, %arg29: memref<64x384xf32, #tpu.memory_space<vmem>>) attributes {dimension_semantics = [#tpu.dimension_semantics<parallel>], iteration_bounds = array<i64: 2>, scalar_prefetch = 0 : i64, scratch_operands = 0 : i64, tpu.core_type = #tpu.core_type<tc>, window_params = [{transform_indices = @transform_0, window_bounds = array<i64: 64, 384>}, {pipeline_mode = #tpu.pipeline_mode<synchronous>, transform_indices = @transform_1, window_bounds = array<i64: 9, 64, 64>}, {pipeline_mode = #tpu.pipeline_mode<synchronous>, transform_indices = @transform_2, window_bounds = array<i64: 384, 32>}, {pipeline_mode = #tpu.pipeline_mode<synchronous>, transform_indices = @transform_3, window_bounds = array<i64: 1, 32>}, {pipeline_mode = #tpu.pipeline_mode<synchronous>, transform_indices = @transform_4, window_bounds = array<i64: 1, 32>}, {pipeline_mode = #tpu.pipeline_mode<synchronous>, transform_indices = @transform_5, window_bounds = array<i64: 384, 32>}, {pipeline_mode = #tpu.pipeline_mode<synchronous>, transform_indices = @transform_6, window_bounds = array<i64: 1, 32>}, {pipeline_mode = #tpu.pipeline_mode<synchronous>, transform_indices = @transform_7, window_bounds = array<i64: 1, 32>}, {pipeline_mode = #tpu.pipeline_mode<synchronous>, transform_indices = @transform_8, window_bounds = array<i64: 384, 32>}, {pipeline_mode = #tpu.pipeline_mode<synchronous>, transform_indices = @transform_9, window_bounds = array<i64: 1, 32>}, {pipeline_mode = #tpu.pipeline_mode<synchronous>, transform_indices = @transform_10, window_bounds = array<i64: 1, 32>}, {pipeline_mode = #tpu.pipeline_mode<synchronous>, transform_indices = @transform_11, window_bounds = array<i64: 9, 32, 48>}, {pipeline_mode = #tpu.pipeline_mode<synchronous>, transform_indices = @transform_12, window_bounds = array<i64: 1, 48>}, {pipeline_mode = #tpu.pipeline_mode<synchronous>, transform_indices = @transform_13, window_bounds = array<i64: 1, 48>}, {pipeline_mode = #tpu.pipeline_mode<synchronous>, transform_indices = @transform_14, window_bounds = array<i64: 9, 48, 64>}, {pipeline_mode = #tpu.pipeline_mode<synchronous>, transform_indices = @transform_15, window_bounds = array<i64: 1, 64>}, {pipeline_mode = #tpu.pipeline_mode<synchronous>, transform_indices = @transform_16, window_bounds = array<i64: 1, 64>}, {pipeline_mode = #tpu.pipeline_mode<synchronous>, transform_indices = @transform_17, window_bounds = array<i64: 64, 384>}, {pipeline_mode = #tpu.pipeline_mode<synchronous>, transform_indices = @transform_18, window_bounds = array<i64: 1, 384>}, {pipeline_mode = #tpu.pipeline_mode<synchronous>, transform_indices = @transform_19, window_bounds = array<i64: 1, 384>}, {pipeline_mode = #tpu.pipeline_mode<synchronous>, transform_indices = @transform_20, window_bounds = array<i64: 32, 32>}, {pipeline_mode = #tpu.pipeline_mode<synchronous>, transform_indices = @transform_21, window_bounds = array<i64: 1, 32>}, {pipeline_mode = #tpu.pipeline_mode<synchronous>, transform_indices = @transform_22, window_bounds = array<i64: 1, 32>}, {pipeline_mode = #tpu.pipeline_mode<synchronous>, transform_indices = @transform_23, window_bounds = array<i64: 384, 384>}, {pipeline_mode = #tpu.pipeline_mode<synchronous>, transform_indices = @transform_24, window_bounds = array<i64: 32, 384>}, {pipeline_mode = #tpu.pipeline_mode<synchronous>, transform_indices = @transform_25, window_bounds = array<i64: 32, 384>}, {pipeline_mode = #tpu.pipeline_mode<synchronous>, transform_indices = @transform_26, window_bounds = array<i64: 1, 384>}, {pipeline_mode = #tpu.pipeline_mode<synchronous>, transform_indices = @transform_27, window_bounds = array<i64: 1, 384>}, {transform_indices = @transform_28, window_bounds = array<i64: 64, 384>}]} {
    %c0 = arith.constant 0 : index
    %c0_0 = arith.constant 0 : index
    %0 = vector.load %arg1[%c0, %c0_0] : memref<64x384xf32, #tpu.memory_space<vmem>>, vector<64x384xf32>
    %cst = arith.constant 0.000000e+00 : f32
    %1 = vector.broadcast %cst : f32 to vector<64x384xf32>
    %2 = arith.maximumf %0, %1 : vector<64x384xf32>
    %3 = arith.truncf %2 : vector<64x384xf32> to vector<64x384xbf16>
    %c0_1 = arith.constant 0 : index
    %c0_2 = arith.constant 0 : index
    %4 = vector.load %arg3[%c0_1, %c0_2] : memref<384x32xbf16, #tpu.memory_space<vmem>>, vector<384x32xbf16>
    %cst_3 = arith.constant dense<0.000000e+00> : vector<64x32xf32>
    %5 = tpu.matmul %3, %4, %cst_3 {dimension_numbers = #tpu.dot_dimension_numbers<[1], [0], [0], [1], [0, 0, 1, 1], [], []>} : vector<64x384xbf16>, vector<384x32xbf16>, vector<64x32xf32> -> vector<64x32xf32>
    %c0_4 = arith.constant 0 : index
    %c0_5 = arith.constant 0 : index
    %6 = vector.load %arg4[%c0_4, %c0_5] : memref<1x32xf32, #tpu.memory_space<vmem>>, vector<1x32xf32>
    %7 = vector.broadcast %6 : vector<1x32xf32> to vector<64x32xf32>
    %8 = arith.mulf %5, %7 : vector<64x32xf32>
    %c0_6 = arith.constant 0 : index
    %c0_7 = arith.constant 0 : index
    %9 = vector.load %arg5[%c0_6, %c0_7] : memref<1x32xf32, #tpu.memory_space<vmem>>, vector<1x32xf32>
    %10 = vector.broadcast %9 : vector<1x32xf32> to vector<64x32xf32>
    %11 = arith.addf %8, %10 : vector<64x32xf32>
    %cst_8 = arith.constant 0.000000e+00 : f32
    %12 = vector.broadcast %cst_8 : f32 to vector<64x32xf32>
    %13 = arith.maximumf %11, %12 : vector<64x32xf32>
    %c0_9 = arith.constant 0 : index
    %c0_10 = arith.constant 0 : index
    %14 = vector.load %arg6[%c0_9, %c0_10] : memref<384x32xbf16, #tpu.memory_space<vmem>>, vector<384x32xbf16>
    %cst_11 = arith.constant dense<0.000000e+00> : vector<64x32xf32>
    %15 = tpu.matmul %3, %14, %cst_11 {dimension_numbers = #tpu.dot_dimension_numbers<[1], [0], [0], [1], [0, 0, 1, 1], [], []>} : vector<64x384xbf16>, vector<384x32xbf16>, vector<64x32xf32> -> vector<64x32xf32>
    %c0_12 = arith.constant 0 : index
    %c0_13 = arith.constant 0 : index
    %16 = vector.load %arg7[%c0_12, %c0_13] : memref<1x32xf32, #tpu.memory_space<vmem>>, vector<1x32xf32>
    %17 = vector.broadcast %16 : vector<1x32xf32> to vector<64x32xf32>
    %18 = arith.mulf %15, %17 : vector<64x32xf32>
    %c0_14 = arith.constant 0 : index
    %c0_15 = arith.constant 0 : index
    %19 = vector.load %arg8[%c0_14, %c0_15] : memref<1x32xf32, #tpu.memory_space<vmem>>, vector<1x32xf32>
    %20 = vector.broadcast %19 : vector<1x32xf32> to vector<64x32xf32>
    %21 = arith.addf %18, %20 : vector<64x32xf32>
    %cst_16 = arith.constant 0.000000e+00 : f32
    %22 = vector.broadcast %cst_16 : f32 to vector<64x32xf32>
    %23 = arith.maximumf %21, %22 : vector<64x32xf32>
    %c0_17 = arith.constant 0 : index
    %c0_18 = arith.constant 0 : index
    %24 = vector.load %arg9[%c0_17, %c0_18] : memref<384x32xbf16, #tpu.memory_space<vmem>>, vector<384x32xbf16>
    %cst_19 = arith.constant dense<0.000000e+00> : vector<64x32xf32>
    %25 = tpu.matmul %3, %24, %cst_19 {dimension_numbers = #tpu.dot_dimension_numbers<[1], [0], [0], [1], [0, 0, 1, 1], [], []>} : vector<64x384xbf16>, vector<384x32xbf16>, vector<64x32xf32> -> vector<64x32xf32>
    %c0_20 = arith.constant 0 : index
    %c0_21 = arith.constant 0 : index
    %26 = vector.load %arg10[%c0_20, %c0_21] : memref<1x32xf32, #tpu.memory_space<vmem>>, vector<1x32xf32>
    %27 = vector.broadcast %26 : vector<1x32xf32> to vector<64x32xf32>
    %28 = arith.mulf %25, %27 : vector<64x32xf32>
    %c0_22 = arith.constant 0 : index
    %c0_23 = arith.constant 0 : index
    %29 = vector.load %arg11[%c0_22, %c0_23] : memref<1x32xf32, #tpu.memory_space<vmem>>, vector<1x32xf32>
    %30 = vector.broadcast %29 : vector<1x32xf32> to vector<64x32xf32>
    %31 = arith.addf %28, %30 : vector<64x32xf32>
    %cst_24 = arith.constant 0.000000e+00 : f32
    %32 = vector.broadcast %cst_24 : f32 to vector<64x32xf32>
    %33 = arith.maximumf %31, %32 : vector<64x32xf32>
    %34 = arith.truncf %13 : vector<64x32xf32> to vector<64x32xbf16>
    %cst_25 = arith.constant 0.000000e+00 : f32
    %35 = vector.broadcast %cst_25 : f32 to vector<64x48xf32>
    %c0_26 = arith.constant 0 : index
    %c0_27 = arith.constant 0 : index
    %c0_28 = arith.constant 0 : index
    %36 = vector.load %arg2[%c0_26, %c0_27, %c0_28] : memref<9x64x64xbf16, #tpu.memory_space<vmem>>, vector<1x64x64xbf16>
    %37 = vector.shape_cast %36 : vector<1x64x64xbf16> to vector<64x64xbf16>
    %cst_29 = arith.constant dense<0.000000e+00> : vector<64x32xf32>
    %38 = tpu.matmul %37, %34, %cst_29 {dimension_numbers = #tpu.dot_dimension_numbers<[1], [0], [0], [1], [0, 0, 1, 1], [], []>} : vector<64x64xbf16>, vector<64x32xbf16>, vector<64x32xf32> -> vector<64x32xf32>
    %39 = arith.truncf %38 : vector<64x32xf32> to vector<64x32xbf16>
    %c0_30 = arith.constant 0 : index
    %c0_31 = arith.constant 0 : index
    %c0_32 = arith.constant 0 : index
    %40 = vector.load %arg12[%c0_30, %c0_31, %c0_32] : memref<9x32x48xbf16, #tpu.memory_space<vmem>>, vector<1x32x48xbf16>
    %41 = vector.shape_cast %40 : vector<1x32x48xbf16> to vector<32x48xbf16>
    %cst_33 = arith.constant dense<0.000000e+00> : vector<64x48xf32>
    %42 = tpu.matmul %39, %41, %cst_33 {dimension_numbers = #tpu.dot_dimension_numbers<[1], [0], [0], [1], [0, 0, 1, 1], [], []>} : vector<64x32xbf16>, vector<32x48xbf16>, vector<64x48xf32> -> vector<64x48xf32>
    %43 = arith.addf %35, %42 : vector<64x48xf32>
    %c1 = arith.constant 1 : index
    %c0_34 = arith.constant 0 : index
    %c0_35 = arith.constant 0 : index
    %44 = vector.load %arg2[%c1, %c0_34, %c0_35] : memref<9x64x64xbf16, #tpu.memory_space<vmem>>, vector<1x64x64xbf16>
    %45 = vector.shape_cast %44 : vector<1x64x64xbf16> to vector<64x64xbf16>
    %cst_36 = arith.constant dense<0.000000e+00> : vector<64x32xf32>
    %46 = tpu.matmul %45, %34, %cst_36 {dimension_numbers = #tpu.dot_dimension_numbers<[1], [0], [0], [1], [0, 0, 1, 1], [], []>} : vector<64x64xbf16>, vector<64x32xbf16>, vector<64x32xf32> -> vector<64x32xf32>
    %47 = arith.truncf %46 : vector<64x32xf32> to vector<64x32xbf16>
    %c1_37 = arith.constant 1 : index
    %c0_38 = arith.constant 0 : index
    %c0_39 = arith.constant 0 : index
    %48 = vector.load %arg12[%c1_37, %c0_38, %c0_39] : memref<9x32x48xbf16, #tpu.memory_space<vmem>>, vector<1x32x48xbf16>
    %49 = vector.shape_cast %48 : vector<1x32x48xbf16> to vector<32x48xbf16>
    %cst_40 = arith.constant dense<0.000000e+00> : vector<64x48xf32>
    %50 = tpu.matmul %47, %49, %cst_40 {dimension_numbers = #tpu.dot_dimension_numbers<[1], [0], [0], [1], [0, 0, 1, 1], [], []>} : vector<64x32xbf16>, vector<32x48xbf16>, vector<64x48xf32> -> vector<64x48xf32>
    %51 = arith.addf %43, %50 : vector<64x48xf32>
    %c2 = arith.constant 2 : index
    %c0_41 = arith.constant 0 : index
    %c0_42 = arith.constant 0 : index
    %52 = vector.load %arg2[%c2, %c0_41, %c0_42] : memref<9x64x64xbf16, #tpu.memory_space<vmem>>, vector<1x64x64xbf16>
    %53 = vector.shape_cast %52 : vector<1x64x64xbf16> to vector<64x64xbf16>
    %cst_43 = arith.constant dense<0.000000e+00> : vector<64x32xf32>
    %54 = tpu.matmul %53, %34, %cst_43 {dimension_numbers = #tpu.dot_dimension_numbers<[1], [0], [0], [1], [0, 0, 1, 1], [], []>} : vector<64x64xbf16>, vector<64x32xbf16>, vector<64x32xf32> -> vector<64x32xf32>
    %55 = arith.truncf %54 : vector<64x32xf32> to vector<64x32xbf16>
    %c2_44 = arith.constant 2 : index
    %c0_45 = arith.constant 0 : index
    %c0_46 = arith.constant 0 : index
    %56 = vector.load %arg12[%c2_44, %c0_45, %c0_46] : memref<9x32x48xbf16, #tpu.memory_space<vmem>>, vector<1x32x48xbf16>
    %57 = vector.shape_cast %56 : vector<1x32x48xbf16> to vector<32x48xbf16>
    %cst_47 = arith.constant dense<0.000000e+00> : vector<64x48xf32>
    %58 = tpu.matmul %55, %57, %cst_47 {dimension_numbers = #tpu.dot_dimension_numbers<[1], [0], [0], [1], [0, 0, 1, 1], [], []>} : vector<64x32xbf16>, vector<32x48xbf16>, vector<64x48xf32> -> vector<64x48xf32>
    %59 = arith.addf %51, %58 : vector<64x48xf32>
    %c3 = arith.constant 3 : index
    %c0_48 = arith.constant 0 : index
    %c0_49 = arith.constant 0 : index
    %60 = vector.load %arg2[%c3, %c0_48, %c0_49] : memref<9x64x64xbf16, #tpu.memory_space<vmem>>, vector<1x64x64xbf16>
    %61 = vector.shape_cast %60 : vector<1x64x64xbf16> to vector<64x64xbf16>
    %cst_50 = arith.constant dense<0.000000e+00> : vector<64x32xf32>
    %62 = tpu.matmul %61, %34, %cst_50 {dimension_numbers = #tpu.dot_dimension_numbers<[1], [0], [0], [1], [0, 0, 1, 1], [], []>} : vector<64x64xbf16>, vector<64x32xbf16>, vector<64x32xf32> -> vector<64x32xf32>
    %63 = arith.truncf %62 : vector<64x32xf32> to vector<64x32xbf16>
    %c3_51 = arith.constant 3 : index
    %c0_52 = arith.constant 0 : index
    %c0_53 = arith.constant 0 : index
    %64 = vector.load %arg12[%c3_51, %c0_52, %c0_53] : memref<9x32x48xbf16, #tpu.memory_space<vmem>>, vector<1x32x48xbf16>
    %65 = vector.shape_cast %64 : vector<1x32x48xbf16> to vector<32x48xbf16>
    %cst_54 = arith.constant dense<0.000000e+00> : vector<64x48xf32>
    %66 = tpu.matmul %63, %65, %cst_54 {dimension_numbers = #tpu.dot_dimension_numbers<[1], [0], [0], [1], [0, 0, 1, 1], [], []>} : vector<64x32xbf16>, vector<32x48xbf16>, vector<64x48xf32> -> vector<64x48xf32>
    %67 = arith.addf %59, %66 : vector<64x48xf32>
    %c4 = arith.constant 4 : index
    %c0_55 = arith.constant 0 : index
    %c0_56 = arith.constant 0 : index
    %68 = vector.load %arg2[%c4, %c0_55, %c0_56] : memref<9x64x64xbf16, #tpu.memory_space<vmem>>, vector<1x64x64xbf16>
    %69 = vector.shape_cast %68 : vector<1x64x64xbf16> to vector<64x64xbf16>
    %cst_57 = arith.constant dense<0.000000e+00> : vector<64x32xf32>
    %70 = tpu.matmul %69, %34, %cst_57 {dimension_numbers = #tpu.dot_dimension_numbers<[1], [0], [0], [1], [0, 0, 1, 1], [], []>} : vector<64x64xbf16>, vector<64x32xbf16>, vector<64x32xf32> -> vector<64x32xf32>
    %71 = arith.truncf %70 : vector<64x32xf32> to vector<64x32xbf16>
    %c4_58 = arith.constant 4 : index
    %c0_59 = arith.constant 0 : index
    %c0_60 = arith.constant 0 : index
    %72 = vector.load %arg12[%c4_58, %c0_59, %c0_60] : memref<9x32x48xbf16, #tpu.memory_space<vmem>>, vector<1x32x48xbf16>
    %73 = vector.shape_cast %72 : vector<1x32x48xbf16> to vector<32x48xbf16>
    %cst_61 = arith.constant dense<0.000000e+00> : vector<64x48xf32>
    %74 = tpu.matmul %71, %73, %cst_61 {dimension_numbers = #tpu.dot_dimension_numbers<[1], [0], [0], [1], [0, 0, 1, 1], [], []>} : vector<64x32xbf16>, vector<32x48xbf16>, vector<64x48xf32> -> vector<64x48xf32>
    %75 = arith.addf %67, %74 : vector<64x48xf32>
    %c5 = arith.constant 5 : index
    %c0_62 = arith.constant 0 : index
    %c0_63 = arith.constant 0 : index
    %76 = vector.load %arg2[%c5, %c0_62, %c0_63] : memref<9x64x64xbf16, #tpu.memory_space<vmem>>, vector<1x64x64xbf16>
    %77 = vector.shape_cast %76 : vector<1x64x64xbf16> to vector<64x64xbf16>
    %cst_64 = arith.constant dense<0.000000e+00> : vector<64x32xf32>
    %78 = tpu.matmul %77, %34, %cst_64 {dimension_numbers = #tpu.dot_dimension_numbers<[1], [0], [0], [1], [0, 0, 1, 1], [], []>} : vector<64x64xbf16>, vector<64x32xbf16>, vector<64x32xf32> -> vector<64x32xf32>
    %79 = arith.truncf %78 : vector<64x32xf32> to vector<64x32xbf16>
    %c5_65 = arith.constant 5 : index
    %c0_66 = arith.constant 0 : index
    %c0_67 = arith.constant 0 : index
    %80 = vector.load %arg12[%c5_65, %c0_66, %c0_67] : memref<9x32x48xbf16, #tpu.memory_space<vmem>>, vector<1x32x48xbf16>
    %81 = vector.shape_cast %80 : vector<1x32x48xbf16> to vector<32x48xbf16>
    %cst_68 = arith.constant dense<0.000000e+00> : vector<64x48xf32>
    %82 = tpu.matmul %79, %81, %cst_68 {dimension_numbers = #tpu.dot_dimension_numbers<[1], [0], [0], [1], [0, 0, 1, 1], [], []>} : vector<64x32xbf16>, vector<32x48xbf16>, vector<64x48xf32> -> vector<64x48xf32>
    %83 = arith.addf %75, %82 : vector<64x48xf32>
    %c6 = arith.constant 6 : index
    %c0_69 = arith.constant 0 : index
    %c0_70 = arith.constant 0 : index
    %84 = vector.load %arg2[%c6, %c0_69, %c0_70] : memref<9x64x64xbf16, #tpu.memory_space<vmem>>, vector<1x64x64xbf16>
    %85 = vector.shape_cast %84 : vector<1x64x64xbf16> to vector<64x64xbf16>
    %cst_71 = arith.constant dense<0.000000e+00> : vector<64x32xf32>
    %86 = tpu.matmul %85, %34, %cst_71 {dimension_numbers = #tpu.dot_dimension_numbers<[1], [0], [0], [1], [0, 0, 1, 1], [], []>} : vector<64x64xbf16>, vector<64x32xbf16>, vector<64x32xf32> -> vector<64x32xf32>
    %87 = arith.truncf %86 : vector<64x32xf32> to vector<64x32xbf16>
    %c6_72 = arith.constant 6 : index
    %c0_73 = arith.constant 0 : index
    %c0_74 = arith.constant 0 : index
    %88 = vector.load %arg12[%c6_72, %c0_73, %c0_74] : memref<9x32x48xbf16, #tpu.memory_space<vmem>>, vector<1x32x48xbf16>
    %89 = vector.shape_cast %88 : vector<1x32x48xbf16> to vector<32x48xbf16>
    %cst_75 = arith.constant dense<0.000000e+00> : vector<64x48xf32>
    %90 = tpu.matmul %87, %89, %cst_75 {dimension_numbers = #tpu.dot_dimension_numbers<[1], [0], [0], [1], [0, 0, 1, 1], [], []>} : vector<64x32xbf16>, vector<32x48xbf16>, vector<64x48xf32> -> vector<64x48xf32>
    %91 = arith.addf %83, %90 : vector<64x48xf32>
    %c7 = arith.constant 7 : index
    %c0_76 = arith.constant 0 : index
    %c0_77 = arith.constant 0 : index
    %92 = vector.load %arg2[%c7, %c0_76, %c0_77] : memref<9x64x64xbf16, #tpu.memory_space<vmem>>, vector<1x64x64xbf16>
    %93 = vector.shape_cast %92 : vector<1x64x64xbf16> to vector<64x64xbf16>
    %cst_78 = arith.constant dense<0.000000e+00> : vector<64x32xf32>
    %94 = tpu.matmul %93, %34, %cst_78 {dimension_numbers = #tpu.dot_dimension_numbers<[1], [0], [0], [1], [0, 0, 1, 1], [], []>} : vector<64x64xbf16>, vector<64x32xbf16>, vector<64x32xf32> -> vector<64x32xf32>
    %95 = arith.truncf %94 : vector<64x32xf32> to vector<64x32xbf16>
    %c7_79 = arith.constant 7 : index
    %c0_80 = arith.constant 0 : index
    %c0_81 = arith.constant 0 : index
    %96 = vector.load %arg12[%c7_79, %c0_80, %c0_81] : memref<9x32x48xbf16, #tpu.memory_space<vmem>>, vector<1x32x48xbf16>
    %97 = vector.shape_cast %96 : vector<1x32x48xbf16> to vector<32x48xbf16>
    %cst_82 = arith.constant dense<0.000000e+00> : vector<64x48xf32>
    %98 = tpu.matmul %95, %97, %cst_82 {dimension_numbers = #tpu.dot_dimension_numbers<[1], [0], [0], [1], [0, 0, 1, 1], [], []>} : vector<64x32xbf16>, vector<32x48xbf16>, vector<64x48xf32> -> vector<64x48xf32>
    %99 = arith.addf %91, %98 : vector<64x48xf32>
    %c8 = arith.constant 8 : index
    %c0_83 = arith.constant 0 : index
    %c0_84 = arith.constant 0 : index
    %100 = vector.load %arg2[%c8, %c0_83, %c0_84] : memref<9x64x64xbf16, #tpu.memory_space<vmem>>, vector<1x64x64xbf16>
    %101 = vector.shape_cast %100 : vector<1x64x64xbf16> to vector<64x64xbf16>
    %cst_85 = arith.constant dense<0.000000e+00> : vector<64x32xf32>
    %102 = tpu.matmul %101, %34, %cst_85 {dimension_numbers = #tpu.dot_dimension_numbers<[1], [0], [0], [1], [0, 0, 1, 1], [], []>} : vector<64x64xbf16>, vector<64x32xbf16>, vector<64x32xf32> -> vector<64x32xf32>
    %103 = arith.truncf %102 : vector<64x32xf32> to vector<64x32xbf16>
    %c8_86 = arith.constant 8 : index
    %c0_87 = arith.constant 0 : index
    %c0_88 = arith.constant 0 : index
    %104 = vector.load %arg12[%c8_86, %c0_87, %c0_88] : memref<9x32x48xbf16, #tpu.memory_space<vmem>>, vector<1x32x48xbf16>
    %105 = vector.shape_cast %104 : vector<1x32x48xbf16> to vector<32x48xbf16>
    %cst_89 = arith.constant dense<0.000000e+00> : vector<64x48xf32>
    %106 = tpu.matmul %103, %105, %cst_89 {dimension_numbers = #tpu.dot_dimension_numbers<[1], [0], [0], [1], [0, 0, 1, 1], [], []>} : vector<64x32xbf16>, vector<32x48xbf16>, vector<64x48xf32> -> vector<64x48xf32>
    %107 = arith.addf %99, %106 : vector<64x48xf32>
    %c0_90 = arith.constant 0 : index
    %c0_91 = arith.constant 0 : index
    %108 = vector.load %arg13[%c0_90, %c0_91] : memref<1x48xf32, #tpu.memory_space<vmem>>, vector<1x48xf32>
    %109 = vector.broadcast %108 : vector<1x48xf32> to vector<64x48xf32>
    %110 = arith.mulf %107, %109 : vector<64x48xf32>
    %c0_92 = arith.constant 0 : index
    %c0_93 = arith.constant 0 : index
    %111 = vector.load %arg14[%c0_92, %c0_93] : memref<1x48xf32, #tpu.memory_space<vmem>>, vector<1x48xf32>
    %112 = vector.broadcast %111 : vector<1x48xf32> to vector<64x48xf32>
    %113 = arith.addf %110, %112 : vector<64x48xf32>
    %cst_94 = arith.constant 0.000000e+00 : f32
    %114 = vector.broadcast %cst_94 : f32 to vector<64x48xf32>
    %115 = arith.maximumf %113, %114 : vector<64x48xf32>
    %116 = arith.truncf %115 : vector<64x48xf32> to vector<64x48xbf16>
    %cst_95 = arith.constant 0.000000e+00 : f32
    %117 = vector.broadcast %cst_95 : f32 to vector<64x64xf32>
    %c0_96 = arith.constant 0 : index
    %c0_97 = arith.constant 0 : index
    %c0_98 = arith.constant 0 : index
    %118 = vector.load %arg2[%c0_96, %c0_97, %c0_98] : memref<9x64x64xbf16, #tpu.memory_space<vmem>>, vector<1x64x64xbf16>
    %119 = vector.shape_cast %118 : vector<1x64x64xbf16> to vector<64x64xbf16>
    %cst_99 = arith.constant dense<0.000000e+00> : vector<64x48xf32>
    %120 = tpu.matmul %119, %116, %cst_99 {dimension_numbers = #tpu.dot_dimension_numbers<[1], [0], [0], [1], [0, 0, 1, 1], [], []>} : vector<64x64xbf16>, vector<64x48xbf16>, vector<64x48xf32> -> vector<64x48xf32>
    %121 = arith.truncf %120 : vector<64x48xf32> to vector<64x48xbf16>
    %c0_100 = arith.constant 0 : index
    %c0_101 = arith.constant 0 : index
    %c0_102 = arith.constant 0 : index
    %122 = vector.load %arg15[%c0_100, %c0_101, %c0_102] : memref<9x48x64xbf16, #tpu.memory_space<vmem>>, vector<1x48x64xbf16>
    %123 = vector.shape_cast %122 : vector<1x48x64xbf16> to vector<48x64xbf16>
    %cst_103 = arith.constant dense<0.000000e+00> : vector<64x64xf32>
    %124 = tpu.matmul %121, %123, %cst_103 {dimension_numbers = #tpu.dot_dimension_numbers<[1], [0], [0], [1], [0, 0, 1, 1], [], []>} : vector<64x48xbf16>, vector<48x64xbf16>, vector<64x64xf32> -> vector<64x64xf32>
    %125 = arith.addf %117, %124 : vector<64x64xf32>
    %c1_104 = arith.constant 1 : index
    %c0_105 = arith.constant 0 : index
    %c0_106 = arith.constant 0 : index
    %126 = vector.load %arg2[%c1_104, %c0_105, %c0_106] : memref<9x64x64xbf16, #tpu.memory_space<vmem>>, vector<1x64x64xbf16>
    %127 = vector.shape_cast %126 : vector<1x64x64xbf16> to vector<64x64xbf16>
    %cst_107 = arith.constant dense<0.000000e+00> : vector<64x48xf32>
    %128 = tpu.matmul %127, %116, %cst_107 {dimension_numbers = #tpu.dot_dimension_numbers<[1], [0], [0], [1], [0, 0, 1, 1], [], []>} : vector<64x64xbf16>, vector<64x48xbf16>, vector<64x48xf32> -> vector<64x48xf32>
    %129 = arith.truncf %128 : vector<64x48xf32> to vector<64x48xbf16>
    %c1_108 = arith.constant 1 : index
    %c0_109 = arith.constant 0 : index
    %c0_110 = arith.constant 0 : index
    %130 = vector.load %arg15[%c1_108, %c0_109, %c0_110] : memref<9x48x64xbf16, #tpu.memory_space<vmem>>, vector<1x48x64xbf16>
    %131 = vector.shape_cast %130 : vector<1x48x64xbf16> to vector<48x64xbf16>
    %cst_111 = arith.constant dense<0.000000e+00> : vector<64x64xf32>
    %132 = tpu.matmul %129, %131, %cst_111 {dimension_numbers = #tpu.dot_dimension_numbers<[1], [0], [0], [1], [0, 0, 1, 1], [], []>} : vector<64x48xbf16>, vector<48x64xbf16>, vector<64x64xf32> -> vector<64x64xf32>
    %133 = arith.addf %125, %132 : vector<64x64xf32>
    %c2_112 = arith.constant 2 : index
    %c0_113 = arith.constant 0 : index
    %c0_114 = arith.constant 0 : index
    %134 = vector.load %arg2[%c2_112, %c0_113, %c0_114] : memref<9x64x64xbf16, #tpu.memory_space<vmem>>, vector<1x64x64xbf16>
    %135 = vector.shape_cast %134 : vector<1x64x64xbf16> to vector<64x64xbf16>
    %cst_115 = arith.constant dense<0.000000e+00> : vector<64x48xf32>
    %136 = tpu.matmul %135, %116, %cst_115 {dimension_numbers = #tpu.dot_dimension_numbers<[1], [0], [0], [1], [0, 0, 1, 1], [], []>} : vector<64x64xbf16>, vector<64x48xbf16>, vector<64x48xf32> -> vector<64x48xf32>
    %137 = arith.truncf %136 : vector<64x48xf32> to vector<64x48xbf16>
    %c2_116 = arith.constant 2 : index
    %c0_117 = arith.constant 0 : index
    %c0_118 = arith.constant 0 : index
    %138 = vector.load %arg15[%c2_116, %c0_117, %c0_118] : memref<9x48x64xbf16, #tpu.memory_space<vmem>>, vector<1x48x64xbf16>
    %139 = vector.shape_cast %138 : vector<1x48x64xbf16> to vector<48x64xbf16>
    %cst_119 = arith.constant dense<0.000000e+00> : vector<64x64xf32>
    %140 = tpu.matmul %137, %139, %cst_119 {dimension_numbers = #tpu.dot_dimension_numbers<[1], [0], [0], [1], [0, 0, 1, 1], [], []>} : vector<64x48xbf16>, vector<48x64xbf16>, vector<64x64xf32> -> vector<64x64xf32>
    %141 = arith.addf %133, %140 : vector<64x64xf32>
    %c3_120 = arith.constant 3 : index
    %c0_121 = arith.constant 0 : index
    %c0_122 = arith.constant 0 : index
    %142 = vector.load %arg2[%c3_120, %c0_121, %c0_122] : memref<9x64x64xbf16, #tpu.memory_space<vmem>>, vector<1x64x64xbf16>
    %143 = vector.shape_cast %142 : vector<1x64x64xbf16> to vector<64x64xbf16>
    %cst_123 = arith.constant dense<0.000000e+00> : vector<64x48xf32>
    %144 = tpu.matmul %143, %116, %cst_123 {dimension_numbers = #tpu.dot_dimension_numbers<[1], [0], [0], [1], [0, 0, 1, 1], [], []>} : vector<64x64xbf16>, vector<64x48xbf16>, vector<64x48xf32> -> vector<64x48xf32>
    %145 = arith.truncf %144 : vector<64x48xf32> to vector<64x48xbf16>
    %c3_124 = arith.constant 3 : index
    %c0_125 = arith.constant 0 : index
    %c0_126 = arith.constant 0 : index
    %146 = vector.load %arg15[%c3_124, %c0_125, %c0_126] : memref<9x48x64xbf16, #tpu.memory_space<vmem>>, vector<1x48x64xbf16>
    %147 = vector.shape_cast %146 : vector<1x48x64xbf16> to vector<48x64xbf16>
    %cst_127 = arith.constant dense<0.000000e+00> : vector<64x64xf32>
    %148 = tpu.matmul %145, %147, %cst_127 {dimension_numbers = #tpu.dot_dimension_numbers<[1], [0], [0], [1], [0, 0, 1, 1], [], []>} : vector<64x48xbf16>, vector<48x64xbf16>, vector<64x64xf32> -> vector<64x64xf32>
    %149 = arith.addf %141, %148 : vector<64x64xf32>
    %c4_128 = arith.constant 4 : index
    %c0_129 = arith.constant 0 : index
    %c0_130 = arith.constant 0 : index
    %150 = vector.load %arg2[%c4_128, %c0_129, %c0_130] : memref<9x64x64xbf16, #tpu.memory_space<vmem>>, vector<1x64x64xbf16>
    %151 = vector.shape_cast %150 : vector<1x64x64xbf16> to vector<64x64xbf16>
    %cst_131 = arith.constant dense<0.000000e+00> : vector<64x48xf32>
    %152 = tpu.matmul %151, %116, %cst_131 {dimension_numbers = #tpu.dot_dimension_numbers<[1], [0], [0], [1], [0, 0, 1, 1], [], []>} : vector<64x64xbf16>, vector<64x48xbf16>, vector<64x48xf32> -> vector<64x48xf32>
    %153 = arith.truncf %152 : vector<64x48xf32> to vector<64x48xbf16>
    %c4_132 = arith.constant 4 : index
    %c0_133 = arith.constant 0 : index
    %c0_134 = arith.constant 0 : index
    %154 = vector.load %arg15[%c4_132, %c0_133, %c0_134] : memref<9x48x64xbf16, #tpu.memory_space<vmem>>, vector<1x48x64xbf16>
    %155 = vector.shape_cast %154 : vector<1x48x64xbf16> to vector<48x64xbf16>
    %cst_135 = arith.constant dense<0.000000e+00> : vector<64x64xf32>
    %156 = tpu.matmul %153, %155, %cst_135 {dimension_numbers = #tpu.dot_dimension_numbers<[1], [0], [0], [1], [0, 0, 1, 1], [], []>} : vector<64x48xbf16>, vector<48x64xbf16>, vector<64x64xf32> -> vector<64x64xf32>
    %157 = arith.addf %149, %156 : vector<64x64xf32>
    %c5_136 = arith.constant 5 : index
    %c0_137 = arith.constant 0 : index
    %c0_138 = arith.constant 0 : index
    %158 = vector.load %arg2[%c5_136, %c0_137, %c0_138] : memref<9x64x64xbf16, #tpu.memory_space<vmem>>, vector<1x64x64xbf16>
    %159 = vector.shape_cast %158 : vector<1x64x64xbf16> to vector<64x64xbf16>
    %cst_139 = arith.constant dense<0.000000e+00> : vector<64x48xf32>
    %160 = tpu.matmul %159, %116, %cst_139 {dimension_numbers = #tpu.dot_dimension_numbers<[1], [0], [0], [1], [0, 0, 1, 1], [], []>} : vector<64x64xbf16>, vector<64x48xbf16>, vector<64x48xf32> -> vector<64x48xf32>
    %161 = arith.truncf %160 : vector<64x48xf32> to vector<64x48xbf16>
    %c5_140 = arith.constant 5 : index
    %c0_141 = arith.constant 0 : index
    %c0_142 = arith.constant 0 : index
    %162 = vector.load %arg15[%c5_140, %c0_141, %c0_142] : memref<9x48x64xbf16, #tpu.memory_space<vmem>>, vector<1x48x64xbf16>
    %163 = vector.shape_cast %162 : vector<1x48x64xbf16> to vector<48x64xbf16>
    %cst_143 = arith.constant dense<0.000000e+00> : vector<64x64xf32>
    %164 = tpu.matmul %161, %163, %cst_143 {dimension_numbers = #tpu.dot_dimension_numbers<[1], [0], [0], [1], [0, 0, 1, 1], [], []>} : vector<64x48xbf16>, vector<48x64xbf16>, vector<64x64xf32> -> vector<64x64xf32>
    %165 = arith.addf %157, %164 : vector<64x64xf32>
    %c6_144 = arith.constant 6 : index
    %c0_145 = arith.constant 0 : index
    %c0_146 = arith.constant 0 : index
    %166 = vector.load %arg2[%c6_144, %c0_145, %c0_146] : memref<9x64x64xbf16, #tpu.memory_space<vmem>>, vector<1x64x64xbf16>
    %167 = vector.shape_cast %166 : vector<1x64x64xbf16> to vector<64x64xbf16>
    %cst_147 = arith.constant dense<0.000000e+00> : vector<64x48xf32>
    %168 = tpu.matmul %167, %116, %cst_147 {dimension_numbers = #tpu.dot_dimension_numbers<[1], [0], [0], [1], [0, 0, 1, 1], [], []>} : vector<64x64xbf16>, vector<64x48xbf16>, vector<64x48xf32> -> vector<64x48xf32>
    %169 = arith.truncf %168 : vector<64x48xf32> to vector<64x48xbf16>
    %c6_148 = arith.constant 6 : index
    %c0_149 = arith.constant 0 : index
    %c0_150 = arith.constant 0 : index
    %170 = vector.load %arg15[%c6_148, %c0_149, %c0_150] : memref<9x48x64xbf16, #tpu.memory_space<vmem>>, vector<1x48x64xbf16>
    %171 = vector.shape_cast %170 : vector<1x48x64xbf16> to vector<48x64xbf16>
    %cst_151 = arith.constant dense<0.000000e+00> : vector<64x64xf32>
    %172 = tpu.matmul %169, %171, %cst_151 {dimension_numbers = #tpu.dot_dimension_numbers<[1], [0], [0], [1], [0, 0, 1, 1], [], []>} : vector<64x48xbf16>, vector<48x64xbf16>, vector<64x64xf32> -> vector<64x64xf32>
    %173 = arith.addf %165, %172 : vector<64x64xf32>
    %c7_152 = arith.constant 7 : index
    %c0_153 = arith.constant 0 : index
    %c0_154 = arith.constant 0 : index
    %174 = vector.load %arg2[%c7_152, %c0_153, %c0_154] : memref<9x64x64xbf16, #tpu.memory_space<vmem>>, vector<1x64x64xbf16>
    %175 = vector.shape_cast %174 : vector<1x64x64xbf16> to vector<64x64xbf16>
    %cst_155 = arith.constant dense<0.000000e+00> : vector<64x48xf32>
    %176 = tpu.matmul %175, %116, %cst_155 {dimension_numbers = #tpu.dot_dimension_numbers<[1], [0], [0], [1], [0, 0, 1, 1], [], []>} : vector<64x64xbf16>, vector<64x48xbf16>, vector<64x48xf32> -> vector<64x48xf32>
    %177 = arith.truncf %176 : vector<64x48xf32> to vector<64x48xbf16>
    %c7_156 = arith.constant 7 : index
    %c0_157 = arith.constant 0 : index
    %c0_158 = arith.constant 0 : index
    %178 = vector.load %arg15[%c7_156, %c0_157, %c0_158] : memref<9x48x64xbf16, #tpu.memory_space<vmem>>, vector<1x48x64xbf16>
    %179 = vector.shape_cast %178 : vector<1x48x64xbf16> to vector<48x64xbf16>
    %cst_159 = arith.constant dense<0.000000e+00> : vector<64x64xf32>
    %180 = tpu.matmul %177, %179, %cst_159 {dimension_numbers = #tpu.dot_dimension_numbers<[1], [0], [0], [1], [0, 0, 1, 1], [], []>} : vector<64x48xbf16>, vector<48x64xbf16>, vector<64x64xf32> -> vector<64x64xf32>
    %181 = arith.addf %173, %180 : vector<64x64xf32>
    %c8_160 = arith.constant 8 : index
    %c0_161 = arith.constant 0 : index
    %c0_162 = arith.constant 0 : index
    %182 = vector.load %arg2[%c8_160, %c0_161, %c0_162] : memref<9x64x64xbf16, #tpu.memory_space<vmem>>, vector<1x64x64xbf16>
    %183 = vector.shape_cast %182 : vector<1x64x64xbf16> to vector<64x64xbf16>
    %cst_163 = arith.constant dense<0.000000e+00> : vector<64x48xf32>
    %184 = tpu.matmul %183, %116, %cst_163 {dimension_numbers = #tpu.dot_dimension_numbers<[1], [0], [0], [1], [0, 0, 1, 1], [], []>} : vector<64x64xbf16>, vector<64x48xbf16>, vector<64x48xf32> -> vector<64x48xf32>
    %185 = arith.truncf %184 : vector<64x48xf32> to vector<64x48xbf16>
    %c8_164 = arith.constant 8 : index
    %c0_165 = arith.constant 0 : index
    %c0_166 = arith.constant 0 : index
    %186 = vector.load %arg15[%c8_164, %c0_165, %c0_166] : memref<9x48x64xbf16, #tpu.memory_space<vmem>>, vector<1x48x64xbf16>
    %187 = vector.shape_cast %186 : vector<1x48x64xbf16> to vector<48x64xbf16>
    %cst_167 = arith.constant dense<0.000000e+00> : vector<64x64xf32>
    %188 = tpu.matmul %185, %187, %cst_167 {dimension_numbers = #tpu.dot_dimension_numbers<[1], [0], [0], [1], [0, 0, 1, 1], [], []>} : vector<64x48xbf16>, vector<48x64xbf16>, vector<64x64xf32> -> vector<64x64xf32>
    %189 = arith.addf %181, %188 : vector<64x64xf32>
    %c0_168 = arith.constant 0 : index
    %c0_169 = arith.constant 0 : index
    %190 = vector.load %arg16[%c0_168, %c0_169] : memref<1x64xf32, #tpu.memory_space<vmem>>, vector<1x64xf32>
    %191 = vector.broadcast %190 : vector<1x64xf32> to vector<64x64xf32>
    %192 = arith.mulf %189, %191 : vector<64x64xf32>
    %c0_170 = arith.constant 0 : index
    %c0_171 = arith.constant 0 : index
    %193 = vector.load %arg17[%c0_170, %c0_171] : memref<1x64xf32, #tpu.memory_space<vmem>>, vector<1x64xf32>
    %194 = vector.broadcast %193 : vector<1x64xf32> to vector<64x64xf32>
    %195 = arith.addf %192, %194 : vector<64x64xf32>
    %cst_172 = arith.constant 0.000000e+00 : f32
    %196 = vector.broadcast %cst_172 : f32 to vector<64x64xf32>
    %197 = arith.maximumf %195, %196 : vector<64x64xf32>
    %198 = arith.truncf %197 : vector<64x64xf32> to vector<64x64xbf16>
    %c0_173 = arith.constant 0 : index
    %c0_174 = arith.constant 0 : index
    %199 = vector.load %arg18[%c0_173, %c0_174] : memref<64x384xbf16, #tpu.memory_space<vmem>>, vector<64x384xbf16>
    %cst_175 = arith.constant dense<0.000000e+00> : vector<64x384xf32>
    %200 = tpu.matmul %198, %199, %cst_175 {dimension_numbers = #tpu.dot_dimension_numbers<[1], [0], [0], [1], [0, 0, 1, 1], [], []>} : vector<64x64xbf16>, vector<64x384xbf16>, vector<64x384xf32> -> vector<64x384xf32>
    %c0_176 = arith.constant 0 : index
    %c0_177 = arith.constant 0 : index
    %201 = vector.load %arg19[%c0_176, %c0_177] : memref<1x384xf32, #tpu.memory_space<vmem>>, vector<1x384xf32>
    %202 = vector.broadcast %201 : vector<1x384xf32> to vector<64x384xf32>
    %203 = arith.mulf %200, %202 : vector<64x384xf32>
    %c0_178 = arith.constant 0 : index
    %c0_179 = arith.constant 0 : index
    %204 = vector.load %arg20[%c0_178, %c0_179] : memref<1x384xf32, #tpu.memory_space<vmem>>, vector<1x384xf32>
    %205 = vector.broadcast %204 : vector<1x384xf32> to vector<64x384xf32>
    %206 = arith.addf %203, %205 : vector<64x384xf32>
    %cst_180 = arith.constant 0.000000e+00 : f32
    %207 = vector.broadcast %cst_180 : f32 to vector<64x384xf32>
    %208 = arith.maximumf %206, %207 : vector<64x384xf32>
    %209 = arith.truncf %23 : vector<64x32xf32> to vector<64x32xbf16>
    %c0_181 = arith.constant 0 : index
    %c0_182 = arith.constant 0 : index
    %210 = vector.load %arg21[%c0_181, %c0_182] : memref<32x32xbf16, #tpu.memory_space<vmem>>, vector<32x32xbf16>
    %cst_183 = arith.constant dense<0.000000e+00> : vector<64x32xf32>
    %211 = tpu.matmul %209, %210, %cst_183 {dimension_numbers = #tpu.dot_dimension_numbers<[1], [0], [0], [1], [0, 0, 1, 1], [], []>} : vector<64x32xbf16>, vector<32x32xbf16>, vector<64x32xf32> -> vector<64x32xf32>
    %c0_184 = arith.constant 0 : index
    %c0_185 = arith.constant 0 : index
    %212 = vector.load %arg22[%c0_184, %c0_185] : memref<1x32xf32, #tpu.memory_space<vmem>>, vector<1x32xf32>
    %213 = vector.broadcast %212 : vector<1x32xf32> to vector<64x32xf32>
    %214 = arith.mulf %211, %213 : vector<64x32xf32>
    %c0_186 = arith.constant 0 : index
    %c0_187 = arith.constant 0 : index
    %215 = vector.load %arg23[%c0_186, %c0_187] : memref<1x32xf32, #tpu.memory_space<vmem>>, vector<1x32xf32>
    %216 = vector.broadcast %215 : vector<1x32xf32> to vector<64x32xf32>
    %217 = arith.addf %214, %216 : vector<64x32xf32>
    %cst_188 = arith.constant 0.000000e+00 : f32
    %218 = vector.broadcast %cst_188 : f32 to vector<64x32xf32>
    %219 = arith.maximumf %217, %218 : vector<64x32xf32>
    %220 = arith.truncf %208 : vector<64x384xf32> to vector<64x384xbf16>
    %c0_189 = arith.constant 0 : index
    %c0_190 = arith.constant 0 : index
    %221 = vector.load %arg24[%c0_189, %c0_190] : memref<384x384xbf16, #tpu.memory_space<vmem>>, vector<384x384xbf16>
    %cst_191 = arith.constant dense<0.000000e+00> : vector<64x384xf32>
    %222 = tpu.matmul %220, %221, %cst_191 {dimension_numbers = #tpu.dot_dimension_numbers<[1], [0], [0], [1], [0, 0, 1, 1], [], []>} : vector<64x384xbf16>, vector<384x384xbf16>, vector<64x384xf32> -> vector<64x384xf32>
    %223 = arith.truncf %219 : vector<64x32xf32> to vector<64x32xbf16>
    %c0_192 = arith.constant 0 : index
    %c0_193 = arith.constant 0 : index
    %224 = vector.load %arg25[%c0_192, %c0_193] : memref<32x384xbf16, #tpu.memory_space<vmem>>, vector<32x384xbf16>
    %cst_194 = arith.constant dense<0.000000e+00> : vector<64x384xf32>
    %225 = tpu.matmul %223, %224, %cst_194 {dimension_numbers = #tpu.dot_dimension_numbers<[1], [0], [0], [1], [0, 0, 1, 1], [], []>} : vector<64x32xbf16>, vector<32x384xbf16>, vector<64x384xf32> -> vector<64x384xf32>
    %226 = arith.addf %222, %225 : vector<64x384xf32>
    %227 = arith.truncf %33 : vector<64x32xf32> to vector<64x32xbf16>
    %c0_195 = arith.constant 0 : index
    %c0_196 = arith.constant 0 : index
    %228 = vector.load %arg26[%c0_195, %c0_196] : memref<32x384xbf16, #tpu.memory_space<vmem>>, vector<32x384xbf16>
    %cst_197 = arith.constant dense<0.000000e+00> : vector<64x384xf32>
    %229 = tpu.matmul %227, %228, %cst_197 {dimension_numbers = #tpu.dot_dimension_numbers<[1], [0], [0], [1], [0, 0, 1, 1], [], []>} : vector<64x32xbf16>, vector<32x384xbf16>, vector<64x384xf32> -> vector<64x384xf32>
    %230 = arith.addf %226, %229 : vector<64x384xf32>
    %c0_198 = arith.constant 0 : index
    %c0_199 = arith.constant 0 : index
    %231 = vector.load %arg27[%c0_198, %c0_199] : memref<1x384xf32, #tpu.memory_space<vmem>>, vector<1x384xf32>
    %232 = vector.broadcast %231 : vector<1x384xf32> to vector<64x384xf32>
    %233 = arith.mulf %230, %232 : vector<64x384xf32>
    %c0_200 = arith.constant 0 : index
    %c0_201 = arith.constant 0 : index
    %234 = vector.load %arg28[%c0_200, %c0_201] : memref<1x384xf32, #tpu.memory_space<vmem>>, vector<1x384xf32>
    %235 = vector.broadcast %234 : vector<1x384xf32> to vector<64x384xf32>
    %236 = arith.addf %233, %235 : vector<64x384xf32>
    %cst_202 = arith.constant 0.000000e+00 : f32
    %237 = vector.broadcast %cst_202 : f32 to vector<64x384xf32>
    %238 = arith.maximumf %236, %237 : vector<64x384xf32>
    %cst_203 = arith.constant 1.000000e+00 : f32
    %239 = vector.broadcast %cst_203 : f32 to vector<64x384xf32>
    %240 = arith.mulf %239, %238 : vector<64x384xf32>
    %241 = arith.addf %2, %240 : vector<64x384xf32>
    %cst_204 = arith.constant 0.000000e+00 : f32
    %242 = vector.broadcast %cst_204 : f32 to vector<64x384xf32>
    %243 = arith.maximumf %241, %242 : vector<64x384xf32>
    %c0_205 = arith.constant 0 : index
    %c0_206 = arith.constant 0 : index
    %244 = vector.load %arg29[%c0_205, %c0_206] : memref<64x384xf32, #tpu.memory_space<vmem>>, vector<64x384xf32>
    tpu.vector_store %arg29[%c0_205, %c0_206], %243 {strides = array<i32>} : memref<64x384xf32, #tpu.memory_space<vmem>>, vector<64x384xf32>,
    return
  }
  func.func @transform_0(%arg0: i32) -> (i32, i32) {
    %c0_i32 = arith.constant 0 : i32
    %c0_i32_0 = arith.constant 0 : i32
    return %arg0, %c0_i32 : i32, i32
  }
  func.func @transform_1(%arg0: i32) -> (i32, i32, i32) {
    %c0_i32 = arith.constant 0 : i32
    %c0_i32_0 = arith.constant 0 : i32
    %c0_i32_1 = arith.constant 0 : i32
    %c0_i32_2 = arith.constant 0 : i32
    return %c0_i32, %c0_i32_0, %c0_i32_1 : i32, i32, i32
  }
  func.func @transform_2(%arg0: i32) -> (i32, i32) {
    %c0_i32 = arith.constant 0 : i32
    %c0_i32_0 = arith.constant 0 : i32
    %c0_i32_1 = arith.constant 0 : i32
    return %c0_i32, %c0_i32_0 : i32, i32
  }
  func.func @transform_3(%arg0: i32) -> (i32, i32) {
    %c0_i32 = arith.constant 0 : i32
    %c0_i32_0 = arith.constant 0 : i32
    %c0_i32_1 = arith.constant 0 : i32
    return %c0_i32, %c0_i32_0 : i32, i32
  }
  func.func @transform_4(%arg0: i32) -> (i32, i32) {
    %c0_i32 = arith.constant 0 : i32
    %c0_i32_0 = arith.constant 0 : i32
    %c0_i32_1 = arith.constant 0 : i32
    return %c0_i32, %c0_i32_0 : i32, i32
  }
  func.func @transform_5(%arg0: i32) -> (i32, i32) {
    %c0_i32 = arith.constant 0 : i32
    %c0_i32_0 = arith.constant 0 : i32
    %c0_i32_1 = arith.constant 0 : i32
    return %c0_i32, %c0_i32_0 : i32, i32
  }
  func.func @transform_6(%arg0: i32) -> (i32, i32) {
    %c0_i32 = arith.constant 0 : i32
    %c0_i32_0 = arith.constant 0 : i32
    %c0_i32_1 = arith.constant 0 : i32
    return %c0_i32, %c0_i32_0 : i32, i32
  }
  func.func @transform_7(%arg0: i32) -> (i32, i32) {
    %c0_i32 = arith.constant 0 : i32
    %c0_i32_0 = arith.constant 0 : i32
    %c0_i32_1 = arith.constant 0 : i32
    return %c0_i32, %c0_i32_0 : i32, i32
  }
  func.func @transform_8(%arg0: i32) -> (i32, i32) {
    %c0_i32 = arith.constant 0 : i32
    %c0_i32_0 = arith.constant 0 : i32
    %c0_i32_1 = arith.constant 0 : i32
    return %c0_i32, %c0_i32_0 : i32, i32
  }
  func.func @transform_9(%arg0: i32) -> (i32, i32) {
    %c0_i32 = arith.constant 0 : i32
    %c0_i32_0 = arith.constant 0 : i32
    %c0_i32_1 = arith.constant 0 : i32
    return %c0_i32, %c0_i32_0 : i32, i32
  }
  func.func @transform_10(%arg0: i32) -> (i32, i32) {
    %c0_i32 = arith.constant 0 : i32
    %c0_i32_0 = arith.constant 0 : i32
    %c0_i32_1 = arith.constant 0 : i32
    return %c0_i32, %c0_i32_0 : i32, i32
  }
  func.func @transform_11(%arg0: i32) -> (i32, i32, i32) {
    %c0_i32 = arith.constant 0 : i32
    %c0_i32_0 = arith.constant 0 : i32
    %c0_i32_1 = arith.constant 0 : i32
    %c0_i32_2 = arith.constant 0 : i32
    return %c0_i32, %c0_i32_0, %c0_i32_1 : i32, i32, i32
  }
  func.func @transform_12(%arg0: i32) -> (i32, i32) {
    %c0_i32 = arith.constant 0 : i32
    %c0_i32_0 = arith.constant 0 : i32
    %c0_i32_1 = arith.constant 0 : i32
    return %c0_i32, %c0_i32_0 : i32, i32
  }
  func.func @transform_13(%arg0: i32) -> (i32, i32) {
    %c0_i32 = arith.constant 0 : i32
    %c0_i32_0 = arith.constant 0 : i32
    %c0_i32_1 = arith.constant 0 : i32
    return %c0_i32, %c0_i32_0 : i32, i32
  }
  func.func @transform_14(%arg0: i32) -> (i32, i32, i32) {
    %c0_i32 = arith.constant 0 : i32
    %c0_i32_0 = arith.constant 0 : i32
    %c0_i32_1 = arith.constant 0 : i32
    %c0_i32_2 = arith.constant 0 : i32
    return %c0_i32, %c0_i32_0, %c0_i32_1 : i32, i32, i32
  }
  func.func @transform_15(%arg0: i32) -> (i32, i32) {
    %c0_i32 = arith.constant 0 : i32
    %c0_i32_0 = arith.constant 0 : i32
    %c0_i32_1 = arith.constant 0 : i32
    return %c0_i32, %c0_i32_0 : i32, i32
  }
  func.func @transform_16(%arg0: i32) -> (i32, i32) {
    %c0_i32 = arith.constant 0 : i32
    %c0_i32_0 = arith.constant 0 : i32
    %c0_i32_1 = arith.constant 0 : i32
    return %c0_i32, %c0_i32_0 : i32, i32
  }
  func.func @transform_17(%arg0: i32) -> (i32, i32) {
    %c0_i32 = arith.constant 0 : i32
    %c0_i32_0 = arith.constant 0 : i32
    %c0_i32_1 = arith.constant 0 : i32
    return %c0_i32, %c0_i32_0 : i32, i32
  }
  func.func @transform_18(%arg0: i32) -> (i32, i32) {
    %c0_i32 = arith.constant 0 : i32
    %c0_i32_0 = arith.constant 0 : i32
    %c0_i32_1 = arith.constant 0 : i32
    return %c0_i32, %c0_i32_0 : i32, i32
  }
  func.func @transform_19(%arg0: i32) -> (i32, i32) {
    %c0_i32 = arith.constant 0 : i32
    %c0_i32_0 = arith.constant 0 : i32
    %c0_i32_1 = arith.constant 0 : i32
    return %c0_i32, %c0_i32_0 : i32, i32
  }
  func.func @transform_20(%arg0: i32) -> (i32, i32) {
    %c0_i32 = arith.constant 0 : i32
    %c0_i32_0 = arith.constant 0 : i32
    %c0_i32_1 = arith.constant 0 : i32
    return %c0_i32, %c0_i32_0 : i32, i32
  }
  func.func @transform_21(%arg0: i32) -> (i32, i32) {
    %c0_i32 = arith.constant 0 : i32
    %c0_i32_0 = arith.constant 0 : i32
    %c0_i32_1 = arith.constant 0 : i32
    return %c0_i32, %c0_i32_0 : i32, i32
  }
  func.func @transform_22(%arg0: i32) -> (i32, i32) {
    %c0_i32 = arith.constant 0 : i32
    %c0_i32_0 = arith.constant 0 : i32
    %c0_i32_1 = arith.constant 0 : i32
    return %c0_i32, %c0_i32_0 : i32, i32
  }
  func.func @transform_23(%arg0: i32) -> (i32, i32) {
    %c0_i32 = arith.constant 0 : i32
    %c0_i32_0 = arith.constant 0 : i32
    %c0_i32_1 = arith.constant 0 : i32
    return %c0_i32, %c0_i32_0 : i32, i32
  }
  func.func @transform_24(%arg0: i32) -> (i32, i32) {
    %c0_i32 = arith.constant 0 : i32
    %c0_i32_0 = arith.constant 0 : i32
    %c0_i32_1 = arith.constant 0 : i32
    return %c0_i32, %c0_i32_0 : i32, i32
  }
  func.func @transform_25(%arg0: i32) -> (i32, i32) {
    %c0_i32 = arith.constant 0 : i32
    %c0_i32_0 = arith.constant 0 : i32
    %c0_i32_1 = arith.constant 0 : i32
    return %c0_i32, %c0_i32_0 : i32, i32
  }
  func.func @transform_26(%arg0: i32) -> (i32, i32) {
    %c0_i32 = arith.constant 0 : i32
    %c0_i32_0 = arith.constant 0 : i32
    %c0_i32_1 = arith.constant 0 : i32
    return %c0_i32, %c0_i32_0 : i32, i32
  }
  func.func @transform_27(%arg0: i32) -> (i32, i32) {
    %c0_i32 = arith.constant 0 : i32
    %c0_i32_0 = arith.constant 0 : i32
    %c0_i32_1 = arith.constant 0 : i32
    return %c0_i32, %c0_i32_0 : i32, i32
  }
  func.func @transform_28(%arg0: i32) -> (i32, i32) {
    %c0_i32 = arith.constant 0 : i32
    %c0_i32_0 = arith.constant 0 : i32
    return %arg0, %c0_i32 : i32, i32
  }
}

</mosaic_0001>

<bundles_post_ra>
// kernel: inception_a_forward.1
= control target key start
LH: loop header
LB: loop body
LE: loop exit
PB: predicated region body
PF: predicated region fallthrough
CT: control target
= control target key end

     0   :  { %s10233_s0 = inlined_call_operand.vmem [shape: f32[128,384], index: 0, kind: input, shape index: {}]   ;;  %s10234_s1 = inlined_call_operand.vmem [shape: bf16[9,64,64], index: 1, kind: input, shape index: {}]   ;;  %s10235_s2 = inlined_call_operand.vmem [shape: bf16[384,32], index: 2, kind: input, shape index: {}]   ;;  %s10236_s3 = inlined_call_operand.vmem [shape: f32[1,32], index: 3, kind: input, shape index: {}]   ;;  %s10237_s4 = inlined_call_operand.vmem [shape: f32[1,32], index: 4, kind: input, shape index: {}]   ;;  %s10238_s5 = inlined_call_operand.vmem [shape: bf16[384,32], index: 5, kind: input, shape index: {}]   ;;  %s10239_s6 = inlined_call_operand.vmem [shape: f32[1,32], index: 6, kind: input, shape index: {}]   ;;  %s10240_s7 = inlined_call_operand.vmem [shape: f32[1,32], index: 7, kind: input, shape index: {}]   ;;  %s10241_s8 = inlined_call_operand.vmem [shape: bf16[384,32], index: 8, kind: input, shape index: {}]   ;;  %s10242_s9 = inlined_call_operand.vmem [shape: f32[1,32], index: 9, kind: input, shape index: {}]   ;;  %s10243_s10 = inlined_call_operand.vmem [shape: f32[1,32], index: 10, kind: input, shape index: {}]   ;;  %s10244_s11 = inlined_call_operand.vmem [shape: bf16[9,32,48], index: 11, kind: input, shape index: {}]   ;;  %s10245_s12 = inlined_call_operand.vmem [shape: f32[1,48], index: 12, kind: input, shape index: {}]   ;;  %s10246_s13 = inlined_call_operand.vmem [shape: f32[1,48], index: 13, kind: input, shape index: {}]   ;;  %s10247_s14 = inlined_call_operand.vmem [shape: bf16[9,48,64], index: 14, kind: input, shape index: {}]   ;;  %s10248_s15 = inlined_call_operand.vmem [shape: f32[1,64], index: 15, kind: input, shape index: {}]   ;;  %s10249_s16 = inlined_call_operand.vmem [shape: f32[1,64], index: 16, kind: input, shape index: {}]   ;;  %s10250_s17 = inlined_call_operand.vmem [shape: bf16[64,384], index: 17, kind: input, shape index: {}]   ;;  %s10251_s18 = inlined_call_operand.vmem [shape: f32[1,384], index: 18, kind: input, shape index: {}]   ;;  %s10252_s19 = inlined_call_operand.vmem [shape: f32[1,384], index: 19, kind: input, shape index: {}]   ;;  %s10253_s20 = inlined_call_operand.vmem [shape: bf16[32,32], index: 20, kind: input, shape index: {}]   ;;  %s10254_s21 = inlined_call_operand.vmem [shape: f32[1,32], index: 21, kind: input, shape index: {}]   ;;  %s10255_s22 = inlined_call_operand.vmem [shape: f32[1,32], index: 22, kind: input, shape index: {}]   ;;  %s10256_s23 = inlined_call_operand.vmem [shape: bf16[384,384], index: 23, kind: input, shape index: {}]   ;;  %s10257_s24 = inlined_call_operand.vmem [shape: bf16[32,384], index: 24, kind: input, shape index: {}]   ;;  %s10258_s25 = inlined_call_operand.vmem [shape: bf16[32,384], index: 25, kind: input, shape index: {}]   ;;  %s10259_s26 = inlined_call_operand.vmem [shape: f32[1,384], index: 26, kind: input, shape index: {}]   ;;  %s10260_s27 = inlined_call_operand.vmem [shape: f32[1,384], index: 27, kind: input, shape index: {}]   ;;  %s10261_s28 = inlined_call_operand.hbm [shape: f32[128,384], index: 28, kind: output, shape index: {}]  }
   0x1   :  { %10344 = sst [smem:[#allocation84_spill]] %s10233_s0 }
   0x2   :  { %10345 = sst [smem:[#allocation85_spill]] %s10234_s1 }
   0x3   :  { %10346 = sst [smem:[#allocation86_spill]] %s10235_s2 }
   0x4   :  { %10347 = sst [smem:[#allocation87_spill]] %s10236_s3 }
   0x5   :  { %10348 = sst [smem:[#allocation88_spill]] %s10237_s4 }
   0x6   :  { %10349 = sst [smem:[#allocation89_spill]] %s10238_s5 }
   0x7   :  { %10350 = sst [smem:[#allocation90_spill]] %s10239_s6 }
   0x8   :  { %10351 = sst [smem:[#allocation91_spill]] %s10240_s7 }
   0x9   :  { %10352 = sst [smem:[#allocation92_spill]] %s10241_s8 }
   0xa   :  { %10353 = sst [smem:[#allocation93_spill]] %s10242_s9 }
   0xb   :  { %10354 = sst [smem:[#allocation94_spill]] %s10243_s10 }
   0xc   :  { %10355 = sst [smem:[#allocation95_spill]] %s10244_s11 }
   0xd   :  { %10356 = sst [smem:[#allocation96_spill]] %s10245_s12 }
   0xe   :  { %10357 = sst [smem:[#allocation97_spill]] %s10246_s13 }
   0xf   :  { %10358 = sst [smem:[#allocation98_spill]] %s10247_s14 }
  0x10   :  { %33 = vsyncpa [#allocation3], 0 }
  0x11   :  { %35 = vsyncpa [#allocation3 + $0x1], 0  ;;  %s7636_s8 = smov 0   ;;  %s7638_s5 = smov 0  }
  0x12   :  { %s7640_s9 = smov 0   ;;  %s7642_s30 = smov 0  }
  0x13 LB: > { %10359 = sst [smem:[#allocation5_spill]] %s7475_s8  ;;  %s7657_s3 = sadd.s32 4294967295, %s7487_s30   ;;  %s7487_s30 = sphi %s7642_s30, %s10557_s30   ;;  %s7483_s9 = sphi %s7640_s9, %s10559_s9   ;;  %s7479_s5 = sphi %s7638_s5, %s10561_s5   ;;  %s7475_s8 = sphi %s7636_s8, %s10560_s8  }
  0x14   : > { %10360 = sst [smem:[#allocation6_spill]] %s7483_s9  ;;  %s5773_s6 = sadd.s32 4294967294, %s7487_s30  }
  0x15   : > { %10361 = sst [smem:[#allocation7_spill]] %s7487_s30  ;;  %s7661_s10 = sadd.s32 1, %s7487_s30  }
  0x16   : > { %10362 = sst [smem:[#allocation8_spill]] %s7661_s10  ;;  %s641_s0 = sadd.s32 1, %s7483_s9 }
  0x17   : > { %s638_s11 = ssub.s32 %s7487_s30, %s7661_s10  ;;  %p651_p0 = scmp.ne.s32.totalorder %s7483_s9, %s7479_s5 }
  0x18   : > { %p639_p1 = scmp.eq.s32.totalorder %s638_s11, 0  ;;  %p652_p2 = scmp.eq.s32.totalorder %s7657_s3, 1 }
  0x19   : > { %p657_p3 = scmp.ne.s32.totalorder %s7479_s5, %s7475_s8  ;;  %p658_p4 = scmp.eq.s32.totalorder %s5773_s6, 1 }
  0x1a   : > { %s7672_s29 = scalar_select %p639_p1, %s7483_s9, %s641_s0  }
  0x1b   : > { %p7674_p5 = por %p652_p2, %p651_p0  ;;  %p7678_p6 = por %p658_p4, %p657_p3 }
  0x1c   : > { %10363 = sst [smem:[#allocation9_spill]] %s7672_s29  ;;  %p5776_p7 = scmp.ge.s32.totalorder %s7487_s30, 1 }
  0x1d   : > { %s10364_s2 = scalar_select %p7674_p5, 1, 0 }
  0x1e   : > { %s10366_s7 = scalar_select %p7678_p6, 1, 0 }
  0x1f   : > { %10365 = sst [smem:[#allocation10_spill]] %s10364_s2  ;;  %p767_p8 = scmp.lt.s32.totalorder %s7487_s30, 3 }
  0x20   : > { %10367 = sst [smem:[#allocation11_spill]] %s10366_s7 }
  0x21   : > { %p768_p9 = pnand %p5776_p7, %p767_p8 }
  0x23   : > { %771 = sbr.rel (%p768_p9) target bundleno = 2075 (0x81b), region = 132 }
  0x28   : > { %s10368_s4 = sld [smem:[#allocation86_spill]]  ;;  %s5777_s6 = sshll.u32 %s7657_s3, 3  ;;  %vm1876_vm0 = vcmask 523264   ;;  %vm2017_vm1 = vcmask 261120   ;;  %vm3225_vm2 = vcmask 392192  }
  0x29   : > { %p843_p10 = scmp.lt.s32.totalorder %s5777_s6, 15  ;;  %s10369_s8 = sld [smem:[#allocation84_spill]] }
  0x2a   : > { %s10376_s30 = sld [smem:[#allocation89_spill]] }
  0x2b   : > { %s10563_s6 = smov (!%p843_p10, %s5777_s6), 15  ;;  %s10396_s0 = sld [smem:[#allocation92_spill]] }
  0x2c   : > { %s7368_s10 = smul.u32 24, %s10563_s6  ;;  %s10397_s12 = sld [smem:[#allocation95_spill]] }
  0x2d   : > { %s10398_s29 = sld [smem:[#allocation87_spill]] }
  0x2e   : > { %v7123_v0 = vld [vmem:[%s10368_s4 + $0x38] sm:$0xff]  ;;  %v7122_v3 = vld [vmem:[%s10368_s4 + $0x30] sm:$0xff]  ;;  %v7121_v6 = vld [vmem:[%s10368_s4 + $0x28] sm:$0xff]  ;;  %s10400_s6 = sld [smem:[#allocation88_spill]] }
  0x2f   : > { %v7131_v1 = vld [vmem:[%s10368_s4 + $0x78] sm:$0xff]  ;;  %1103 = vmatpush.bf16.msra.mxu0 %v7123_v0  ;;  %v7130_v4 = vld [vmem:[%s10368_s4 + $0x70] sm:$0xff]  ;;  %v7129_v7 = vld [vmem:[%s10368_s4 + $0x68] sm:$0xff]  ;;  %s7739_s9 = scalar_lea.vmem %s10369_s8, %s7368_s10  ;;  %s10451_s13 = sld [smem:[#allocation97_spill]] }
  0x30   : > { %v7139_v2 = vld [vmem:[%s10368_s4 + $0xb8] sm:$0xff]  ;;  %1132 = vmatpush.bf16.msra.mxu1 %v7131_v1  ;;  %v7138_v5 = vld [vmem:[%s10368_s4 + $0xb0] sm:$0xff]  ;;  %v7137_v8 = vld [vmem:[%s10368_s4 + $0xa8] sm:$0xff]  ;;  %s10377_s10 = smov %s10376_s30  ;;  %s10452_s14 = sld [smem:[#allocation98_spill]] }
  0x31   : > { %1161 = vmatpush.bf16.msra.mxu2 %v7139_v2  ;;  %v7120_v9 = vld [vmem:[%s10368_s4 + $0x20] sm:$0xff]  ;;  %v7119_v12 = vld [vmem:[%s10368_s4 + $0x18] sm:$0xff]  ;;  %v7118_v15 = vld [vmem:[%s10368_s4 + $0x10] sm:$0xff]  ;;  %s10471_s8 = sld [smem:[#allocation90_spill]] }
  0x32   : > { %v7128_v10 = vld [vmem:[%s10368_s4 + $0x60] sm:$0xff]  ;;  %v7127_v13 = vld [vmem:[%s10368_s4 + $0x58] sm:$0xff]  ;;  %v7126_v16 = vld [vmem:[%s10368_s4 + $0x50] sm:$0xff]  ;;  %s10474_s1 = sld [smem:[#allocation91_spill]] }
  0x33   : > { %1104 = vmatpush.bf16.msra.mxu0 %v7122_v3  ;;  %v7136_v11 = vld [vmem:[%s10368_s4 + $0xa0] sm:$0xff]  ;;  %v7135_v14 = vld [vmem:[%s10368_s4 + $0x98] sm:$0xff]  ;;  %v7134_v17 = vld [vmem:[%s10368_s4 + $0x90] sm:$0xff]  ;;  %s10492_s7 = sld [smem:[#allocation94_spill]] }
  0x34   : > { %1133 = vmatpush.bf16.msra.mxu1 %v7130_v4  ;;  %v7117_v18 = vld [vmem:[%s10368_s4 + $0x8] sm:$0xff]  ;;  %v7751_v20 = vld [vmem:[%s7739_s9] sm:$0xff]  ;;  %v7754_v21 = vld [vmem:[%s7739_s9 + $0x18] sm:$0xff] }
  0x35   : > { %1162 = vmatpush.bf16.msra.mxu2 %v7138_v5  ;;  %v7125_v19 = vld [vmem:[%s10368_s4 + $0x48] sm:$0xff]  ;;  %10370 = vst [vmem:[#allocation12_spill] sm:$0xff] %v7751_v20  ;;  %v7760_v23 = vld [vmem:[%s7739_s9 + $0x20] sm:$0xff]  ;;  %v7766_v25 = vld [vmem:[%s7739_s9 + $0x10] sm:$0xff]  ;;  %v10298_v27 = vmax.f32 %v7751_v20, 0.0  ;;  %v10295_v28 = vmax.f32 %v7754_v21, 0.0 }
  0x36   : > { %10371 = vst [vmem:[#allocation13_spill] sm:$0xff] %v7754_v21  ;;  %v7757_v22 = vld [vmem:[%s7739_s9 + $0x8] sm:$0xff]  ;;  %v10293_v30 = vmax.f32 %v7760_v23, 0.0  ;;  %v7116_v31 = vld [vmem:[%s10368_s4] sm:$0xff]  ;;  %v10297_v33 = vmax.f32 %v7766_v25, 0.0  ;;  %v7147_v39 = vld [vmem:[%s10376_s30 + $0x38] sm:$0xff] }
  0x37   : > { %1105 = vmatpush.bf16.msra.mxu0 %v7121_v6  ;;  %10372 = vst [vmem:[#allocation14_spill] sm:$0xff] %v7757_v22  ;;  %v7133_v24 = vld [vmem:[%s10368_s4 + $0x88] sm:$0xff]  ;;  %v10296_v29 = vmax.f32 %v7757_v22, 0.0  ;;  %v7124_v32 = vld [vmem:[%s10368_s4 + $0x40] sm:$0xff]  ;;  %v7790_v36 = vpack.c.bf16 %v10295_v28, %v10298_v27  ;;  %1414 = vmatpush.bf16.msra.mxu3 %v7147_v39  ;;  %v7811_v40 = vld [vmem:[%s7739_s9 + $0x30] sm:$0xff]  ;;  %s10450_s30 = sld [smem:[#allocation96_spill]] }
  0x38   : > { %1134 = vmatpush.bf16.msra.mxu1 %v7129_v7  ;;  %10373 = vst [vmem:[#allocation15_spill] sm:$0xff] %v7760_v23  ;;  %v7769_v26 = vld [vmem:[%s7739_s9 + $0x28] sm:$0xff]  ;;  %v7132_v35 = vld [vmem:[%s10368_s4 + $0x80] sm:$0xff]  ;;  %v7817_v42 = vld [vmem:[%s7739_s9 + $0x38] sm:$0xff]  ;;  %v10292_v46 = vmax.f32 %v7811_v40, 0.0 }
  0x39   : > { %1163 = vmatpush.bf16.msra.mxu2 %v7137_v8  ;;  %10374 = vst [vmem:[#allocation16_spill] sm:$0xff] %v7766_v25  ;;  %v10294_v34 = vmax.f32 %v7769_v26, 0.0  ;;  %v7796_v37 = vpack.c.bf16 %v10293_v30, %v10296_v29  ;;  %v7814_v41 = vld [vmem:[%s7739_s9 + $0x48] sm:$0xff]  ;;  %v7820_v43 = vld [vmem:[%s7739_s9 + $0x50] sm:$0xff]  ;;  %v7823_v44 = vld [vmem:[%s7739_s9 + $0x40] sm:$0xff]  ;;  %v10290_v48 = vmax.f32 %v7817_v42, 0.0 }
  0x3a   : > { %10375 = vst [vmem:[#allocation17_spill] sm:$0xff] %v7769_v26  ;;  %v7826_v45 = vld [vmem:[%s7739_s9 + $0x58] sm:$0xff]  ;;  %v10289_v47 = vmax.f32 %v7814_v41, 0.0  ;;  %v10287_v49 = vmax.f32 %v7820_v43, 0.0  ;;  %v10291_v50 = vmax.f32 %v7823_v44, 0.0  ;;  %v7146_v55 = vld [vmem:[%s10377_s10 + $0x30] sm:$0xff] }
  0x3b   : > { %1106 = vmatpush.bf16.msra.mxu0 %v7120_v9  ;;  %v7802_v38 = vpack.c.bf16 %v10294_v34, %v10297_v33  ;;  %10378 = vst [vmem:[#allocation18_spill] sm:$0xff] %v7811_v40  ;;  %v10288_v51 = vmax.f32 %v7826_v45, 0.0  ;;  %v7155_v56 = vld [vmem:[%s10377_s10 + $0x78] sm:$0xff]  ;;  %1415 = vmatpush.bf16.msra.mxu3 %v7146_v55  ;;  %v7145_v57 = vld [vmem:[%s10377_s10 + $0x28] sm:$0xff]  ;;  %v7154_v58 = vld [vmem:[%s10377_s10 + $0x70] sm:$0xff] }
  0x3c   : > { %1135 = vmatpush.bf16.msra.mxu1 %v7128_v10  ;;  %10379 = vst [vmem:[#allocation19_spill] sm:$0xff] %v7814_v41  ;;  %v7838_v52 = vpack.c.bf16 %v10289_v47, %v10292_v46  ;;  %v7844_v53 = vpack.c.bf16 %v10287_v49, %v10290_v48  ;;  %v7868_v59 = vld [vmem:[%s7739_s9 + $0x60] sm:$0xff]  ;;  %v7871_v60 = vld [vmem:[%s7739_s9 + $0x78] sm:$0xff]  ;;  %v7874_v61 = vld [vmem:[%s7739_s9 + $0x68] sm:$0xff] }
  0x3d   : > { %1164 = vmatpush.bf16.msra.mxu2 %v7136_v11  ;;  %10380 = vst [vmem:[#allocation20_spill] sm:$0xff] %v7817_v42  ;;  %v7850_v54 = vpack.c.bf16 %v10288_v51, %v10291_v50  ;;  %v7877_v62 = vld [vmem:[%s7739_s9 + $0x80] sm:$0xff]  ;;  %v7880_v63 = vld [vmem:[%s7739_s9 + $0x70] sm:$0xff]  ;;  %v7883_v0 = vld [vmem:[%s7739_s9 + $0x88] sm:$0xff]  ;;  %v10286_v3 = vmax.f32 %v7868_v59, 0.0  ;;  %v10283_v4 = vmax.f32 %v7871_v60, 0.0 }
  0x3e   : > { %10381 = vst [vmem:[#allocation21_spill] sm:$0xff] %v7820_v43  ;;  %v7144_v1 = vld [vmem:[%s10377_s10 + $0x20] sm:$0xff]  ;;  %v7153_v2 = vld [vmem:[%s10377_s10 + $0x68] sm:$0xff]  ;;  %v10284_v5 = vmax.f32 %v7874_v61, 0.0  ;;  %v10281_v6 = vmax.f32 %v7877_v62, 0.0  ;;  %v10285_v7 = vmax.f32 %v7880_v63, 0.0 }
  0x3f   : > { %1107 = vmatpush.bf16.msra.mxu0 %v7119_v12  ;;  %10382 = vst [vmem:[#allocation22_spill] sm:$0xff] %v7823_v44  ;;  %1416 = vmatpush.bf16.msra.mxu3 %v7145_v57  ;;  %v10282_v8 = vmax.f32 %v7883_v0, 0.0  ;;  %v7143_v9 = vld [vmem:[%s10377_s10 + $0x18] sm:$0xff]  ;;  %v7152_v10 = vld [vmem:[%s10377_s10 + $0x60] sm:$0xff]  ;;  %v7907_v11 = vpack.c.bf16 %v10283_v4, %v10286_v3  ;;  %v7149_v55 = vld [vmem:[%s10377_s10 + $0x48] sm:$0xff] }
  0x40   : > { %1136 = vmatpush.bf16.msra.mxu1 %v7127_v13  ;;  %10383 = vst [vmem:[#allocation23_spill] sm:$0xff] %v7826_v45  ;;  %v7913_v12 = vpack.c.bf16 %v10281_v6, %v10284_v5  ;;  %v7140_v39 = vld [vmem:[%s10377_s10] sm:$0xff] }
  0x41   : > { %1165 = vmatpush.bf16.msra.mxu2 %v7135_v14  ;;  %10384 = vst [vmem:[#allocation24_spill] sm:$0xff] %v7868_v59  ;;  %v7919_v13 = vpack.c.bf16 %v10282_v8, %v10285_v7  ;;  %v7142_v14 = vld [vmem:[%s10377_s10 + $0x10] sm:$0xff]  ;;  %v7411_v49 = vld [vmem:[%s10398_s29] ss:$0 sm:$0xff]  ;;  %s839_s29 = sand.u32 1, %s7479_s5  }
  0x42   : > { %10385 = vst [vmem:[#allocation25_spill] sm:$0xff] %v7871_v60  ;;  %s7367_s11 = smul.u32 192, %s839_s29  ;;  %s5695_s4 = scalar_lea.sflag [#allocation3], %s839_s29 }
  0x43   : > { %1108 = vmatpush.bf16.msra.mxu0 %v7118_v15  ;;  %10386 = vst [vmem:[#allocation26_spill] sm:$0xff] %v7874_v61  ;;  %1417 = vmatpush.bf16.msra.mxu3 %v7144_v1  ;;  %v7151_v15 = vld [vmem:[%s10377_s10 + $0x58] sm:$0xff] }
  0x44   : > { %1137 = vmatpush.bf16.msra.mxu1 %v7126_v16  ;;  %10387 = vst [vmem:[#allocation27_spill] sm:$0xff] %v7877_v62  ;;  %v7141_v16 = vld [vmem:[%s10377_s10 + $0x8] sm:$0xff] }
  0x45   : > { %1166 = vmatpush.bf16.msra.mxu2 %v7134_v17  ;;  %10388 = vst [vmem:[#allocation28_spill] sm:$0xff] %v7880_v63  ;;  %v7150_v17 = vld [vmem:[%s10377_s10 + $0x50] sm:$0xff] }
  0x46   : > { %10389 = vst [vmem:[#allocation29_spill] sm:$0xff] %v7883_v0 }
  0x47   : > { %1109 = vmatpush.bf16.msra.mxu0 %v7117_v18  ;;  %1418 = vmatpush.bf16.msra.mxu3 %v7143_v9  ;;  %v7937_v18 = vld [vmem:[%s7739_s9 + $0x90] sm:$0xff] }
  0x48   : > { %1138 = vmatpush.bf16.msra.mxu1 %v7125_v19  ;;  %10390 = vst [vmem:[#allocation30_spill] sm:$0xff] %v7937_v18  ;;  %v7940_v19 = vld [vmem:[%s7739_s9 + $0xa8] sm:$0xff] }
  0x49   : > { %1167 = vmatpush.bf16.msra.mxu2 %v7133_v24  ;;  %10391 = vst [vmem:[#allocation31_spill] sm:$0xff] %v7940_v19  ;;  %v7943_v24 = vld [vmem:[%s7739_s9 + $0x98] sm:$0xff]  ;;  %v10277_v57 = vmax.f32 %v7940_v19, 0.0 }
  0x4a   : > { %10392 = vst [vmem:[#allocation32_spill] sm:$0xff] %v7943_v24 }
  0x4b   : > { %1110 = vmatpush.bf16.msra.mxu0 %v7116_v31  ;;  %1419 = vmatpush.bf16.msra.mxu3 %v7142_v14  ;;  %v7946_v31 = vld [vmem:[%s7739_s9 + $0xb0] sm:$0xff] }
  0x4c   : > { %1139 = vmatpush.bf16.msra.mxu1 %v7124_v32  ;;  %10393 = vst [vmem:[#allocation33_spill] sm:$0xff] %v7946_v31  ;;  %v7949_v32 = vld [vmem:[%s7739_s9 + $0xa0] sm:$0xff]  ;;  %v10275_v1 = vmax.f32 %v7946_v31, 0.0 }
  0x4d   : > { %1168 = vmatpush.bf16.msra.mxu2 %v7132_v35  ;;  %10394 = vst [vmem:[#allocation34_spill] sm:$0xff] %v7949_v32  ;;  %v7952_v35 = vld [vmem:[%s7739_s9 + $0xb8] sm:$0xff]  ;;  %s10403_s9 = sld [smem:[#allocation85_spill]] }
  0x4e   : > { %1111 = vmatmul.bf16.vlgmr.msra.gmra.mxu0 %v7790_v36  ;;  %10395 = vst [vmem:[#allocation35_spill] sm:$0xff] %v7952_v35  ;;  %v10276_v9 = vmax.f32 %v7952_v35, 0.0 }
  0x4f   : > { %1140 = vmatmul.bf16.vlgmr.msra.gmra.mxu1 %v7796_v37  ;;  %1443 = vmatpush.bf16.msrb.mxu0 %v7155_v56  ;;  %v10280_v56 = vmax.f32 %v7937_v18, 0.0 }
  0x50   : > { %1169 = vmatmul.bf16.vlgmr.msra.gmra.mxu2 %v7802_v38  ;;  %1420 = vmatpush.bf16.msra.mxu3 %v7141_v16 }
  0x51   : > { %v7973_v14 = vpack.c.bf16 %v10277_v57, %v10280_v56  ;;  %v7176_v57 = vld [vmem:[%s10396_s0 + $0x60] sm:$0xff] }
  0x53   : > { %1444 = vmatpush.bf16.msrb.mxu0 %v7154_v58  ;;  %v10278_v58 = vmax.f32 %v7943_v24, 0.0  ;;  %s10404_s2 = smov %s10403_s9 }
  0x54   : > { %1421 = vmatpush.bf16.msra.mxu3 %v7140_v39  ;;  %v7179_v39 = vld [vmem:[%s10396_s0 + $0x78] sm:$0xff]  ;;  %v8283_v62 = vld [vmem:[%s10404_s2 + $0x50] sm:$0xff]  ;;  %v8436_v22 = vld [vmem:[%s10404_s2 + $0xa8] sm:$0xff] }
  0x55   : > { %10439 = vst [vmem:[#allocation73_spill] sm:$0xff] %v8436_v22  ;;  %v8443_v20 = vld [vmem:[%s10404_s2 + $0x100] sm:$0xff] }
  0x56   : > { %10440 = vst [vmem:[#allocation74_spill] sm:$0xff] %v8443_v20 }
  0x57   : > { %1445 = vmatpush.bf16.msrb.mxu0 %v7153_v2  ;;  %v10279_v2 = vmax.f32 %v7949_v32, 0.0  ;;  %1422 = vmatmul.bf16.vlgmr.msra.gmra.mxu3 %v7790_v36 }
  0x58   : > { %1754 = vmatpush.bf16.msrb.mxu3 %v7179_v39  ;;  %v7177_v39 = vld [vmem:[%s10396_s0 + $0x68] sm:$0xff] }
  0x59   : > { %v7985_v16 = vpack.c.bf16 %v10276_v9, %v10279_v2  ;;  %v7168_v9 = vld [vmem:[%s10396_s0 + $0x20] sm:$0xff] }
  0x5b   : > { %1446 = vmatpush.bf16.msrb.mxu0 %v7152_v10  ;;  %v7148_v10 = vld [vmem:[%s10377_s10 + $0x40] sm:$0xff] }
  0x5e   : > { %1116 = vmatmul.bf16.gmra.mxu0 %v7838_v52 }
  0x5f   : > { %1145 = vmatmul.bf16.gmra.mxu1 %v7844_v53  ;;  %1447 = vmatpush.bf16.msrb.mxu0 %v7151_v15  ;;  %v7979_v15 = vpack.c.bf16 %v10275_v1, %v10278_v58  ;;  %v7163_v1 = vld [vmem:[%s10377_s10 + $0xb8] sm:$0xff]  ;;  %v7186_v58 = vld [vmem:[%s10396_s0 + $0xb0] sm:$0xff] }
  0x60   : > { %1174 = vmatmul.bf16.gmra.mxu2 %v7850_v54  ;;  %1472 = vmatpush.bf16.msrb.mxu1 %v7163_v1  ;;  %v7161_v1 = vld [vmem:[%s10377_s10 + $0xa8] sm:$0xff] }
  0x63   : > { %1448 = vmatpush.bf16.msrb.mxu0 %v7150_v17  ;;  %v7171_v17 = vld [vmem:[%s10396_s0 + $0x38] sm:$0xff] }
  0x64   : > { %1725 = vmatpush.bf16.msrb.mxu2 %v7171_v17  ;;  %v7169_v17 = vld [vmem:[%s10396_s0 + $0x28] sm:$0xff] }
  0x67   : > { %1449 = vmatpush.bf16.msrb.mxu0 %v7149_v55  ;;  %v7170_v55 = vld [vmem:[%s10396_s0 + $0x30] sm:$0xff]  ;;  %1427 = vmatmul.bf16.gmra.mxu3 %v7838_v52 }
  0x68   : > { %1726 = vmatpush.bf16.msrb.mxu2 %v7170_v55  ;;  %v7187_v55 = vld [vmem:[%s10396_s0 + $0xb8] sm:$0xff] }
  0x6b   : > { %1450 = vmatpush.bf16.msrb.mxu0 %v7148_v10  ;;  %v7178_v10 = vld [vmem:[%s10396_s0 + $0x70] sm:$0xff] }
  0x6c   : > { %1755 = vmatpush.bf16.msrb.mxu3 %v7178_v10  ;;  %1727 = vmatpush.bf16.msrb.mxu2 %v7169_v17  ;;  %v7162_v10 = vld [vmem:[%s10377_s10 + $0xb0] sm:$0xff]  ;;  %v7167_v17 = vld [vmem:[%s10396_s0 + $0x18] sm:$0xff] }
  0x6d   : > { %1473 = vmatpush.bf16.msrb.mxu1 %v7162_v10  ;;  %v7184_v10 = vld [vmem:[%s10396_s0 + $0xa0] sm:$0xff] }
  0x6e   : > { %1121 = vmatmul.bf16.gmra.mxu0 %v7907_v11 }
  0x6f   : > { %1150 = vmatmul.bf16.gmra.mxu1 %v7913_v12  ;;  %1783 = vmatpush.bf16.msra.mxu0 %v7187_v55  ;;  %v7174_v55 = vld [vmem:[%s10396_s0 + $0x50] sm:$0xff] }
  0x70   : > { %1179 = vmatmul.bf16.gmra.mxu2 %v7919_v13  ;;  %1756 = vmatpush.bf16.msrb.mxu3 %v7177_v39  ;;  %v7175_v39 = vld [vmem:[%s10396_s0 + $0x58] sm:$0xff] }
  0x71   : > { %1728 = vmatpush.bf16.msrb.mxu2 %v7168_v9  ;;  %1474 = vmatpush.bf16.msrb.mxu1 %v7161_v1  ;;  %v7166_v9 = vld [vmem:[%s10396_s0 + $0x10] sm:$0xff]  ;;  %v7159_v1 = vld [vmem:[%s10377_s10 + $0x98] sm:$0xff] }
  0x73   : > { %1784 = vmatpush.bf16.msra.mxu0 %v7186_v58  ;;  %v7160_v58 = vld [vmem:[%s10377_s10 + $0xa0] sm:$0xff] }
  0x74   : > { %1757 = vmatpush.bf16.msrb.mxu3 %v7176_v57  ;;  %v7185_v57 = vld [vmem:[%s10396_s0 + $0xa8] sm:$0xff] }
  0x75   : > { %1729 = vmatpush.bf16.msrb.mxu2 %v7167_v17  ;;  %1475 = vmatpush.bf16.msrb.mxu1 %v7160_v58  ;;  %v7165_v17 = vld [vmem:[%s10396_s0 + $0x8] sm:$0xff]  ;;  %v7158_v58 = vld [vmem:[%s10377_s10 + $0x90] sm:$0xff] }
  0x77   : > { %1432 = vmatmul.bf16.gmra.mxu3 %v7907_v11  ;;  %1785 = vmatpush.bf16.msra.mxu0 %v7185_v57  ;;  %v7183_v57 = vld [vmem:[%s10396_s0 + $0x98] sm:$0xff] }
  0x78   : > { %1758 = vmatpush.bf16.msrb.mxu3 %v7175_v39  ;;  %v7173_v39 = vld [vmem:[%s10396_s0 + $0x48] sm:$0xff] }
  0x79   : > { %1730 = vmatpush.bf16.msrb.mxu2 %v7166_v9  ;;  %1476 = vmatpush.bf16.msrb.mxu1 %v7159_v1  ;;  %v7164_v9 = vld [vmem:[%s10396_s0] sm:$0xff]  ;;  %v7157_v1 = vld [vmem:[%s10377_s10 + $0x88] sm:$0xff] }
  0x7b   : > { %1786 = vmatpush.bf16.msra.mxu0 %v7184_v10  ;;  %v7182_v10 = vld [vmem:[%s10396_s0 + $0x90] sm:$0xff] }
  0x7c   : > { %1759 = vmatpush.bf16.msrb.mxu3 %v7174_v55  ;;  %v7172_v55 = vld [vmem:[%s10396_s0 + $0x40] sm:$0xff] }
  0x7d   : > { %1731 = vmatpush.bf16.msrb.mxu2 %v7165_v17  ;;  %1477 = vmatpush.bf16.msrb.mxu1 %v7158_v58  ;;  %v7181_v17 = vld [vmem:[%s10396_s0 + $0x88] sm:$0xff] }
  0x7e   : > { %1126 = vmatmul.bf16.gmra.mxu0 %v7973_v14 }
  0x7f   : > { %1155 = vmatmul.bf16.gmra.mxu1 %v7979_v15  ;;  %1787 = vmatpush.bf16.msra.mxu0 %v7183_v57  ;;  %v7180_v57 = vld [vmem:[%s10396_s0 + $0x80] sm:$0xff] }
  0x80   : > { %1184 = vmatmul.bf16.gmra.mxu2 %v7985_v16  ;;  %1760 = vmatpush.bf16.msrb.mxu3 %v7173_v39  ;;  %v7156_v39 = vld [vmem:[%s10377_s10 + $0x80] sm:$0xff] }
  0x81   : > { %1732 = vmatpush.bf16.msrb.mxu2 %v7164_v9  ;;  %1478 = vmatpush.bf16.msrb.mxu1 %v7157_v1 }
  0x83   : > { %1788 = vmatpush.bf16.msra.mxu0 %v7182_v10 }
  0x84   : > { %1761 = vmatpush.bf16.msrb.mxu3 %v7172_v55 }
  0x85   : > { %1479 = vmatpush.bf16.msrb.mxu1 %v7156_v39 }
  0x87   : > { %1437 = vmatmul.bf16.gmra.mxu3 %v7973_v14  ;;  %1789 = vmatpush.bf16.msra.mxu0 %v7181_v17 }
  0x8b   : > { %1790 = vmatpush.bf16.msra.mxu0 %v7180_v57 }
  0x8e   : > { %1451 = vmatmul.bf16.vlgmr.msrb.gmra.mxu0 %v7796_v37 }
  0x8f   : > { %1480 = vmatmul.bf16.vlgmr.msrb.gmra.mxu1 %v7802_v38 }
  0x90   : > { %1733 = vmatmul.bf16.vlgmr.msrb.gmra.mxu2 %v7790_v36 }
  0x97   : > { %1762 = vmatmul.bf16.vlgmr.msrb.gmra.mxu3 %v7796_v37 }
  0x9e   : > { %1456 = vmatmul.bf16.gmra.mxu0 %v7844_v53 }
  0x9f   : > { %1485 = vmatmul.bf16.gmra.mxu1 %v7850_v54 }
  0xa0   : > { %1738 = vmatmul.bf16.gmra.mxu2 %v7838_v52 }
  0xa7   : > { %1767 = vmatmul.bf16.gmra.mxu3 %v7844_v53 }
  0xae   : > { %1461 = vmatmul.bf16.gmra.mxu0 %v7913_v12 }
  0xaf   : > { %1490 = vmatmul.bf16.gmra.mxu1 %v7919_v13 }
  0xb0   : > { %1743 = vmatmul.bf16.gmra.mxu2 %v7907_v11  ;;  %v7199_v11 = vld [vmem:[%s10397_s12 + $0x18] sm:$0xff] }
  0xb1   : > { %2036 = vmatpush.bf16.msra.mxu3 %v7199_v11 }
  0xb7   : > { %1772 = vmatmul.bf16.gmra.mxu3 %v7913_v12  ;;  %v7198_v12 = vld [vmem:[%s10397_s12 + $0x10] sm:$0xff] }
  0xb8   : > { %2037 = vmatpush.bf16.msra.mxu3 %v7198_v12 }
  0xbe   : > { %1466 = vmatmul.bf16.gmra.mxu0 %v7979_v15 }
  0xbf   : > { %1495 = vmatmul.bf16.gmra.mxu1 %v7985_v16 }
  0xc0   : > { %1748 = vmatmul.bf16.gmra.mxu2 %v7973_v14 }
  0xc7   : > { %1777 = vmatmul.bf16.gmra.mxu3 %v7979_v15 }
  0xcb   : > { %v1112_v58 = vpop.f32.mrf.mxu0 }
  0xcc   : > { %v1141_v36 = vpop.f32.mrf.mxu1 }
  0xcd   : > { %v1142_v9 = vadd.f32 %v1141_v36, %v1112_v58 }
  0xce   : > { %1791 = vmatmul.bf16.vlgmr.msra.gmra.mxu0 %v7802_v38 }
  0xd3   : > { %v1170_v37 = vpop.f32.mrf.mxu2  ;;  %v1114_v10 = vpop.f32.mrf.mxu0 }
  0xd4   : > { %v8100_v55 = vadd.f32 %v1170_v37, %v1142_v9  ;;  %v1143_v1 = vpop.f32.mrf.mxu1 }
  0xdb   : > { %v1172_v17 = vpop.f32.mrf.mxu2  ;;  %v1117_v39 = vpop.f32.mrf.mxu0 }
  0xdc   : > { %v1146_v57 = vpop.f32.mrf.mxu1 }
  0xdd   : > { %v1147_v12 = vadd.f32 %v1146_v57, %v1117_v39 }
  0xde   : > { %1796 = vmatmul.bf16.gmra.mxu0 %v7850_v54 }
  0xe3   : > { %v1175_v52 = vpop.f32.mrf.mxu2  ;;  %v1119_v53 = vpop.f32.mrf.mxu0 }
  0xe4   : > { %v1148_v58 = vpop.f32.mrf.mxu1 }
  0xe5   : > { %v1149_v48 = vadd.f32 %v1148_v58, %v1119_v53 }
  0xeb   : > { %v1177_v38 = vpop.f32.mrf.mxu2  ;;  %v1122_v36 = vpop.f32.mrf.mxu0 }
  0xec   : > { %v1151_v9 = vpop.f32.mrf.mxu1 }
  0xed   : > { %v1152_v11 = vadd.f32 %v1151_v9, %v1122_v36  ;;  %v1144_v9 = vadd.f32 %v1143_v1, %v1114_v10 }
  0xee   : > { %1801 = vmatmul.bf16.gmra.mxu0 %v7919_v13  ;;  %v1423_v13 = vpop.f32.mrf.mxu3 }
  0xef   : > { %v1173_v57 = vadd.f32 %v1172_v17, %v1144_v9  ;;  %v7188_v9 = vld [vmem:[%s10403_s9] sm:$0xff] }
  0xf3   : > { %v1180_v54 = vpop.f32.mrf.mxu2  ;;  %v1124_v37 = vpop.f32.mrf.mxu0 }
  0xf4   : > { %v1153_v2 = vpop.f32.mrf.mxu1  ;;  %v1181_v50 = vadd.f32 %v1180_v54, %v1152_v11 }
  0xf5   : > { %v1154_v5 = vadd.f32 %v1153_v2, %v1124_v37  ;;  %v1178_v2 = vadd.f32 %v1177_v38, %v1149_v48  ;;  %v1195_v48 = vmul.f32 %v7411_v49, %v1173_v57 }
  0xf6   : > { %v8121_v47 = vpop.f32.mrf.mxu3 }
  0xf7   : > { %10399 = vst [vmem:[#allocation36_spill] sm:$0xff] %v8121_v47  ;;  %v1197_v53 = vmul.f32 %v7411_v49, %v1178_v2 }
  0xfb   : > { %v1182_v14 = vpop.f32.mrf.mxu2  ;;  %v1127_v56 = vpop.f32.mrf.mxu0 }
  0xfc   : > { %v1156_v15 = vpop.f32.mrf.mxu1  ;;  %v1183_v51 = vadd.f32 %v1182_v14, %v1154_v5  ;;  %v1176_v5 = vadd.f32 %v1175_v52, %v1147_v12  ;;  %v1198_v14 = vmul.f32 %v7411_v49, %v1181_v50  ;;  %v1194_v50 = vmul.f32 %v7411_v49, %v8100_v55 }
  0xfd   : > { %v1157_v6 = vadd.f32 %v1156_v15, %v1127_v56  ;;  %v7412_v56 = vld [vmem:[%s10400_s6] ss:$0 sm:$0xff]  ;;  %s10489_s6 = sld [smem:[#allocation93_spill]] }
  0xfe   : > { %1806 = vmatmul.bf16.gmra.mxu0 %v7985_v16  ;;  %v1196_v58 = vmul.f32 %v7411_v49, %v1176_v5  ;;  %v1210_v54 = vadd.f32 %v7412_v56, %v1198_v14  ;;  %v1207_v17 = vadd.f32 %v7412_v56, %v1195_v48  ;;  %v7194_v5 = vld [vmem:[%s10404_s2 + $0x20] sm:$0xff] }
 0x100   : > { %v1218_v1 = vmax.f32 %v1210_v54, 0.0 }
 0x103   : > { %v1185_v8 = vpop.f32.mrf.mxu2  ;;  %v1129_v4 = vpop.f32.mrf.mxu0 }
 0x104   : > { %v1186_v7 = vadd.f32 %v1185_v8, %v1157_v6  ;;  %v1158_v3 = vpop.f32.mrf.mxu1  ;;  %v1199_v6 = vmul.f32 %v7411_v49, %v1183_v51  ;;  %v1209_v51 = vadd.f32 %v7412_v56, %v1197_v53 }
 0x105   : > { %v1159_v16 = vadd.f32 %v1158_v3, %v1129_v4  ;;  %v1428_v4 = vpop.f32.mrf.mxu3 }
 0x106   : > { %v1200_v46 = vmul.f32 %v7411_v49, %v1186_v7  ;;  %v1211_v7 = vadd.f32 %v7412_v56, %v1199_v6  ;;  %v1217_v52 = vmax.f32 %v1209_v51, 0.0  ;;  %v8194_v51 = vld [vmem:[%s10404_s2 + $0x10] sm:$0xff] }
 0x108   : > { %v1212_v15 = vadd.f32 %v7412_v56, %v1200_v46  ;;  %v1208_v46 = vadd.f32 %v7412_v56, %v1196_v58 }
 0x10a   : > { %v1220_v11 = vmax.f32 %v1212_v15, 0.0 }
 0x10b   : > { %v1187_v30 = vpop.f32.mrf.mxu2  ;;  %v1452_v36 = vpop.f32.mrf.mxu0 }
 0x10c   : > { %v1188_v8 = vadd.f32 %v1187_v30, %v1159_v16  ;;  %v8126_v37 = vadd.f32 %v1452_v36, %v1423_v13  ;;  %v1219_v30 = vmax.f32 %v1211_v7, 0.0  ;;  %v1216_v16 = vmax.f32 %v1208_v46, 0.0  ;;  %v8173_v7 = vld [vmem:[%s10404_s2 + $0x8] sm:$0xff] }
 0x10d   : > { %v8138_v12 = vpop.f32.mrf.mxu3 }
 0x10e   : > { %v1201_v39 = vmul.f32 %v7411_v49, %v1188_v8  ;;  %v8136_v13 = vpack.c.bf16 %v1219_v30, %v1218_v1  ;;  %10402 = vst [vmem:[#allocation38_spill] sm:$0xff] %v8138_v12  ;;  %v1215_v49 = vmax.f32 %v1207_v17, 0.0  ;;  %v8143_v55 = vpack.c.bf16 %v1217_v52, %v1216_v16  ;;  %v8199_v30 = vld [vmem:[%s10404_s2 + $0x30] sm:$0xff]  ;;  %v1481_v1 = vpop.f32.mrf.mxu1 }
 0x10f   : > { %v8202_v17 = vadd.f32 %v1481_v1, %v8126_v37  ;;  %v8221_v37 = vld [vmem:[%s10404_s2 + $0x18] sm:$0xff] }
 0x110   : > { %v1213_v3 = vadd.f32 %v7412_v56, %v1201_v39 }
 0x111   : > { %10409 = vst [vmem:[#allocation43_spill] sm:$0xff] %v8202_v17 }
 0x112   : > { %v1221_v34 = vmax.f32 %v1213_v3, 0.0  ;;  %v8178_v3 = vld [vmem:[%s10404_s2 + $0x28] sm:$0xff] }
 0x113   : > { %v8130_v10 = vpop.f32.mrf.mxu0  ;;  %v1734_v48 = vpop.f32.mrf.mxu2 }
 0x114   : > { %v8128_v38 = vpack.c.bf16 %v1221_v34, %v1220_v11  ;;  %10401 = vst [vmem:[#allocation37_spill] sm:$0xff] %v8130_v10  ;;  %v1206_v34 = vadd.f32 %v7412_v56, %v1194_v50 }
 0x115   : > { %v1433_v36 = vpop.f32.mrf.mxu3 }
 0x116   : > { %1893 = vmatpush.bf16.msra.mxu1 %v8128_v38  ;;  %1971 = vmatpush.bf16.msra.mxu2 %v8128_v38  ;;  %v1214_v8 = vmax.f32 %v1206_v34, 0.0 }
 0x117   : > { %2297 = vmatpush.bf16.msrb.mxu3 %v8128_v38 }
 0x118   : > { %v8148_v56 = vpack.c.bf16 %v1215_v49, %v1214_v8  ;;  %v8214_v49 = vpop.f32.mrf.mxu1 }
 0x119   : > { %10413 = vst [vmem:[#allocation47_spill] sm:$0xff] %v8214_v49 }
 0x11a   : > { %1894 = vmatpush.bf16.msra.mxu1 %v8136_v13  ;;  %1972 = vmatpush.bf16.msra.mxu2 %v8136_v13 }
 0x11b   : > { %2298 = vmatpush.bf16.msrb.mxu3 %v8136_v13  ;;  %v1457_v2 = vpop.f32.mrf.mxu0  ;;  %v8210_v34 = vpop.f32.mrf.mxu2 }
 0x11c   : > { %v1458_v6 = vadd.f32 %v1457_v2, %v1428_v4  ;;  %10411 = vst [vmem:[#allocation45_spill] sm:$0xff] %v8210_v34 }
 0x11d   : > { %v8165_v15 = vpop.f32.mrf.mxu3 }
 0x11e   : > { %1895 = vmatpush.bf16.msra.mxu1 %v8143_v55  ;;  %1973 = vmatpush.bf16.msra.mxu2 %v8143_v55  ;;  %10406 = vst [vmem:[#allocation40_spill] sm:$0xff] %v8165_v15  ;;  %v7223_v15 = vld [vmem:[%s10397_s12 + $0x58] sm:$0xff] }
 0x11f   : > { %2299 = vmatpush.bf16.msrb.mxu3 %v8143_v55 }
 0x122   : > { %1896 = vmatpush.bf16.msra.mxu1 %v8148_v56  ;;  %1974 = vmatpush.bf16.msra.mxu2 %v8148_v56 }
 0x123   : > { %2300 = vmatpush.bf16.msrb.mxu3 %v8148_v56  ;;  %v8160_v14 = vpop.f32.mrf.mxu0 }
 0x124   : > { %10405 = vst [vmem:[#allocation39_spill] sm:$0xff] %v8160_v14 }
 0x125   : > { %6083 = vmatmul.msk.bf16.vlgmr.msra.gmra.mxu1 %vm1876_vm0, %v7188_v9  ;;  %6111 = vmatmul.msk.bf16.vlgmr.msra.gmra.mxu2 %vm1876_vm0, %v7194_v5  ;;  %v1438_v53 = vpop.f32.mrf.mxu3  ;;  %v8226_v9 = vld [vmem:[%s10404_s2 + $0x38] sm:$0xff] }
 0x126   : > { %2157 = vmatpush.bf16.msrb.mxu1 %v8128_v38 }
 0x12a   : > { %2158 = vmatpush.bf16.msrb.mxu1 %v8136_v13 }
 0x12b   : > { %v1462_v39 = vpop.f32.mrf.mxu0 }
 0x12c   : > { %v1463_v57 = vadd.f32 %v1462_v39, %v1433_v36  ;;  %v1739_v36 = vpop.f32.mrf.mxu2 }
 0x12d   : > { %v8188_v58 = vpop.f32.mrf.mxu3 }
 0x12e   : > { %2159 = vmatpush.bf16.msrb.mxu1 %v8143_v55  ;;  %10408 = vst [vmem:[#allocation42_spill] sm:$0xff] %v8188_v58 }
 0x132   : > { %2160 = vmatpush.bf16.msrb.mxu1 %v8148_v56 }
 0x133   : > { %v8181_v4 = vpop.f32.mrf.mxu0 }
 0x134   : > { %10407 = vst [vmem:[#allocation41_spill] sm:$0xff] %v8181_v4 }
 0x135   : > { %6084 = vmatmul.msk.bf16.gmra.mxu1 %vm1876_vm0, %v8173_v7  ;;  %6112 = vmatmul.msk.bf16.gmra.mxu2 %vm1876_vm0, %v8178_v3  ;;  %v1763_v50 = vpop.f32.mrf.mxu3 }
 0x136   : > { %2437 = vmatpush.bf16.msra.mxu1 %v8128_v38  ;;  %v1764_v46 = vadd.f32 %v1763_v50, %v1734_v48  ;;  %v8236_v50 = vpop.f32.mrf.mxu2 }
 0x137   : > { %10417 = vst [vmem:[#allocation51_spill] sm:$0xff] %v8236_v50 }
 0x13a   : > { %2438 = vmatpush.bf16.msra.mxu1 %v8136_v13 }
 0x13b   : > { %v1467_v54 = vpop.f32.mrf.mxu0 }
 0x13c   : > { %v1468_v11 = vadd.f32 %v1467_v54, %v1438_v53  ;;  %v1486_v53 = vpop.f32.mrf.mxu1 }
 0x13d   : > { %v8212_v16 = vpop.f32.mrf.mxu3  ;;  %v8228_v54 = vadd.f32 %v1486_v53, %v1458_v6  ;;  %v8247_v6 = vld [vmem:[%s10404_s2 + $0x40] sm:$0xff] }
 0x13e   : > { %2439 = vmatpush.bf16.msra.mxu1 %v8143_v55  ;;  %10412 = vst [vmem:[#allocation46_spill] sm:$0xff] %v8212_v16 }
 0x13f   : > { %10415 = vst [vmem:[#allocation49_spill] sm:$0xff] %v8228_v54 }
 0x142   : > { %2440 = vmatpush.bf16.msra.mxu1 %v8148_v56 }
 0x143   : > { %v8204_v52 = vpop.f32.mrf.mxu0 }
 0x144   : > { %10410 = vst [vmem:[#allocation44_spill] sm:$0xff] %v8204_v52  ;;  %v8240_v1 = vpop.f32.mrf.mxu1 }
 0x145   : > { %6085 = vmatmul.msk.bf16.gmra.mxu1 %vm1876_vm0, %v8194_v51  ;;  %6113 = vmatmul.msk.bf16.gmra.mxu2 %vm1876_vm0, %v8199_v30  ;;  %v1768_v5 = vpop.f32.mrf.mxu3  ;;  %10419 = vst [vmem:[#allocation53_spill] sm:$0xff] %v8240_v1 }
 0x146   : > { %v1769_v39 = vadd.f32 %v1768_v5, %v1739_v36  ;;  %v1744_v36 = vpop.f32.mrf.mxu2 }
 0x14b   : > { %v1792_v2 = vpop.f32.mrf.mxu0 }
 0x14c   : > { %v8216_v8 = vadd.f32 %v1792_v2, %v1764_v46  ;;  %v1491_v29 = vpop.f32.mrf.mxu1 }
 0x14d   : > { %v8238_v46 = vpop.f32.mrf.mxu3  ;;  %v8249_v33 = vadd.f32 %v1491_v29, %v1463_v57  ;;  %v8269_v29 = vld [vmem:[%s10404_s2 + $0x48] sm:$0xff] }
 0x14e   : > { %10414 = vst [vmem:[#allocation48_spill] sm:$0xff] %v8216_v8 }
 0x14f   : > { %10418 = vst [vmem:[#allocation52_spill] sm:$0xff] %v8238_v46  ;;  %v8486_v46 = vld [vmem:[%s10404_s2 + $0xb8] sm:$0xff] }
 0x150   : > { %10421 = vst [vmem:[#allocation55_spill] sm:$0xff] %v8249_v33 }
 0x151   : > { %10443 = vst [vmem:[#allocation77_spill] sm:$0xff] %v8486_v46 }
 0x153   : > { %v8230_v48 = vpop.f32.mrf.mxu0 }
 0x154   : > { %10416 = vst [vmem:[#allocation50_spill] sm:$0xff] %v8230_v48  ;;  %v8261_v31 = vpop.f32.mrf.mxu1 }
 0x155   : > { %6086 = vmatmul.msk.bf16.gmra.mxu1 %vm1876_vm0, %v8221_v37  ;;  %6114 = vmatmul.msk.bf16.gmra.mxu2 %vm1876_vm0, %v8226_v9  ;;  %v1773_v5 = vpop.f32.mrf.mxu3  ;;  %10425 = vst [vmem:[#allocation59_spill] sm:$0xff] %v8261_v31  ;;  %v8541_v31 = vld [vmem:[%s10404_s2 + $0xf0] sm:$0xff] }
 0x156   : > { %v1774_v53 = vadd.f32 %v1773_v5, %v1744_v36  ;;  %10448 = vst [vmem:[#allocation82_spill] sm:$0xff] %v8541_v31 }
 0x15b   : > { %v1797_v2 = vpop.f32.mrf.mxu0 }
 0x15c   : > { %v8242_v28 = vadd.f32 %v1797_v2, %v1769_v39  ;;  %v8256_v39 = vpop.f32.mrf.mxu2  ;;  %v1496_v24 = vpop.f32.mrf.mxu1 }
 0x15d   : > { %10423 = vst [vmem:[#allocation57_spill] sm:$0xff] %v8256_v39  ;;  %v8258_v2 = vpop.f32.mrf.mxu3  ;;  %v8272_v32 = vadd.f32 %v1496_v24, %v1468_v11  ;;  %v8290_v24 = vld [vmem:[%s10404_s2 + $0x58] sm:$0xff]  ;;  %v7193_v11 = vld [vmem:[%s10397_s12 + $0x8] sm:$0xff] }
 0x15e   : > { %10420 = vst [vmem:[#allocation54_spill] sm:$0xff] %v8242_v28  ;;  %2089 = vmatpush.bf16.msrb.mxu0 %v7193_v11 }
 0x15f   : > { %10424 = vst [vmem:[#allocation58_spill] sm:$0xff] %v8258_v2  ;;  %v8461_v2 = vld [vmem:[%s10404_s2 + $0xb0] sm:$0xff] }
 0x160   : > { %10427 = vst [vmem:[#allocation61_spill] sm:$0xff] %v8272_v32 }
 0x161   : > { %10441 = vst [vmem:[#allocation75_spill] sm:$0xff] %v8461_v2 }
 0x163   : > { %v8251_v27 = vpop.f32.mrf.mxu0 }
 0x164   : > { %10422 = vst [vmem:[#allocation56_spill] sm:$0xff] %v8251_v27  ;;  %v1749_v57 = vpop.f32.mrf.mxu2  ;;  %v7210_v27 = vld [vmem:[%s10397_s12 + $0x30] sm:$0xff] }
 0x165   : > { %6167 = vmatmul.msk.bf16.vlgmr.msrb.gmra.mxu1 %vm1876_vm0, %v8247_v6  ;;  %v1778_v5 = vpop.f32.mrf.mxu3 }
 0x166   : > { %2717 = vmatpush.bf16.msrb.mxu1 %v8128_v38  ;;  %v1779_v19 = vadd.f32 %v1778_v5, %v1749_v57  ;;  %v8300_v57 = vpop.f32.mrf.mxu1 }
 0x167   : > { %10430 = vst [vmem:[#allocation64_spill] sm:$0xff] %v8300_v57 }
 0x16a   : > { %2718 = vmatpush.bf16.msrb.mxu1 %v8136_v13 }
 0x16b   : > { %v1802_v35 = vpop.f32.mrf.mxu0 }
 0x16c   : > { %v8263_v36 = vadd.f32 %v1802_v35, %v1774_v53  ;;  %v8302_v5 = vpop.f32.mrf.mxu2 }
 0x16d   : > { %10431 = vst [vmem:[#allocation65_spill] sm:$0xff] %v8302_v5  ;;  %v7216_v5 = vld [vmem:[%s10397_s12 + $0x40] sm:$0xff] }
 0x16e   : > { %10426 = vst [vmem:[#allocation60_spill] sm:$0xff] %v8263_v36  ;;  %2719 = vmatpush.bf16.msrb.mxu1 %v8143_v55 }
 0x172   : > { %2720 = vmatpush.bf16.msrb.mxu1 %v8148_v56 }
 0x173   : > { %v8274_v18 = vpop.f32.mrf.mxu0 }
 0x174   : > { %10428 = vst [vmem:[#allocation62_spill] sm:$0xff] %v8274_v18 }
 0x175   : > { %6168 = vmatmul.msk.bf16.gmra.mxu1 %vm1876_vm0, %v8269_v29 }
 0x17b   : > { %v1807_v35 = vpop.f32.mrf.mxu0 }
 0x17c   : > { %v8278_v53 = vadd.f32 %v1807_v35, %v1779_v19  ;;  %v7192_v19 = vld [vmem:[%s10397_s12] sm:$0xff] }
 0x17d   : > { %2090 = vmatpush.bf16.msrb.mxu0 %v7192_v19  ;;  %v8307_v35 = vld [vmem:[%s10404_s2 + $0x80] sm:$0xff] }
 0x17e   : > { %10429 = vst [vmem:[#allocation63_spill] sm:$0xff] %v8278_v53 }
 0x185   : > { %6169 = vmatmul.msk.bf16.gmra.mxu1 %vm1876_vm0, %v8283_v62 }
 0x195   : > { %6170 = vmatmul.msk.bf16.gmra.mxu1 %vm1876_vm0, %v8290_v24 }
 0x1a2   : > { %v1898_v0 = vpop.f32.mrf.mxu1 }
 0x1a5   : > { %6255 = vmatmul.msk.bf16.vlgmr.msra.gmra.mxu1 %vm1876_vm0, %v8307_v35 }
 0x1a6   : > { %2997 = vmatpush.bf16.msra.mxu1 %v8128_v38 }
 0x1a8   : > { %v1976_v11 = vpop.f32.mrf.mxu2 }
 0x1aa   : > { %2998 = vmatpush.bf16.msra.mxu1 %v8136_v13  ;;  %v1900_v60 = vpop.f32.mrf.mxu1 }
 0x1ab   : > { %v1918_v19 = vpack.c.bf16 %v1900_v60, %v1898_v0 }
 0x1ad   : > { %6139 = vmatmul.msk.bf16.vlgmr.msrb.gmra.mxu0 %vm2017_vm1, %v1918_v19 }
 0x1ae   : > { %2999 = vmatpush.bf16.msra.mxu1 %v8143_v55 }
 0x1b0   : > { %v1978_v61 = vpop.f32.mrf.mxu2 }
 0x1b1   : > { %v1996_v63 = vpack.c.bf16 %v1978_v61, %v1976_v11 }
 0x1b2   : > { %3000 = vmatpush.bf16.msra.mxu1 %v8148_v56  ;;  %v1903_v59 = vpop.f32.mrf.mxu1 }
 0x1b3   : > { %6127 = vmatmul.msk.bf16.vlgmr.msra.gmra.mxu3 %vm2017_vm1, %v1996_v63  ;;  %v7205_v63 = vld [vmem:[%s10397_s12 + $0x28] sm:$0xff] }
 0x1b4   : > { %2577 = vmatpush.bf16.msra.mxu3 %v8128_v38  ;;  %2221 = vmatpush.bf16.msrb.mxu2 %v7205_v63 }
 0x1b8   : > { %2578 = vmatpush.bf16.msra.mxu3 %v8136_v13  ;;  %v1981_v43 = vpop.f32.mrf.mxu2 }
 0x1ba   : > { %v1905_v45 = vpop.f32.mrf.mxu1 }
 0x1bb   : > { %v1919_v41 = vpack.c.bf16 %v1905_v45, %v1903_v59  ;;  %v7204_v45 = vld [vmem:[%s10397_s12 + $0x20] sm:$0xff] }
 0x1bc   : > { %2579 = vmatpush.bf16.msra.mxu3 %v8143_v55  ;;  %2222 = vmatpush.bf16.msrb.mxu2 %v7204_v45 }
 0x1bd   : > { %6140 = vmatmul.msk.bf16.gmra.mxu0 %vm2017_vm1, %v1919_v41 }
 0x1c0   : > { %2580 = vmatpush.bf16.msra.mxu3 %v8148_v56  ;;  %v1983_v60 = vpop.f32.mrf.mxu2 }
 0x1c1   : > { %v1997_v61 = vpack.c.bf16 %v1983_v60, %v1981_v43 }
 0x1c2   : > { %v1908_v0 = vpop.f32.mrf.mxu1 }
 0x1c3   : > { %6128 = vmatmul.msk.bf16.gmra.mxu3 %vm2017_vm1, %v1997_v61  ;;  %v8334_v61 = vld [vmem:[%s10404_s2 + $0x88] sm:$0xff] }
 0x1c4   : > { %6256 = vmatmul.msk.bf16.gmra.mxu1 %vm1876_vm0, %v8334_v61 }
 0x1c8   : > { %v1986_v11 = vpop.f32.mrf.mxu2 }
 0x1ca   : > { %v1910_v59 = vpop.f32.mrf.mxu1 }
 0x1cb   : > { %v1920_v19 = vpack.c.bf16 %v1910_v59, %v1908_v0 }
 0x1cd   : > { %6141 = vmatmul.msk.bf16.gmra.mxu0 %vm2017_vm1, %v1920_v19 }
 0x1d0   : > { %v1988_v41 = vpop.f32.mrf.mxu2 }
 0x1d1   : > { %v1998_v43 = vpack.c.bf16 %v1988_v41, %v1986_v11  ;;  %v8343_v11 = vld [vmem:[%s10404_s2 + $0x90] sm:$0xff] }
 0x1d2   : > { %v1913_v60 = vpop.f32.mrf.mxu1 }
 0x1d3   : > { %6129 = vmatmul.msk.bf16.gmra.mxu3 %vm2017_vm1, %v1998_v43  ;;  %v8358_v43 = vld [vmem:[%s10404_s2 + $0x98] sm:$0xff] }
 0x1d4   : > { %6257 = vmatmul.msk.bf16.gmra.mxu1 %vm1876_vm0, %v8343_v11 }
 0x1d8   : > { %v1991_v63 = vpop.f32.mrf.mxu2 }
 0x1da   : > { %v1915_v42 = vpop.f32.mrf.mxu1 }
 0x1db   : > { %v1921_v44 = vpack.c.bf16 %v1915_v42, %v1913_v60  ;;  %v8351_v42 = vld [vmem:[%s10404_s2 + $0x60] sm:$0xff] }
 0x1dd   : > { %6142 = vmatmul.msk.bf16.gmra.mxu0 %vm2017_vm1, %v1921_v44 }
 0x1e0   : > { %v1993_v0 = vpop.f32.mrf.mxu2 }
 0x1e1   : > { %v1999_v45 = vpack.c.bf16 %v1993_v0, %v1991_v63  ;;  %v8369_v0 = vld [vmem:[%s10404_s2 + $0x68] sm:$0xff] }
 0x1e2   : > { %v2162_v59 = vpop.f32.mrf.mxu1 }
 0x1e3   : > { %6130 = vmatmul.msk.bf16.gmra.mxu3 %vm2017_vm1, %v1999_v45 }
 0x1e4   : > { %6258 = vmatmul.msk.bf16.gmra.mxu1 %vm1876_vm0, %v8358_v43 }
 0x1ea   : > { %v2164_v19 = vpop.f32.mrf.mxu1 }
 0x1eb   : > { %v2182_v41 = vpack.c.bf16 %v2164_v19, %v2162_v59  ;;  %v8392_v19 = vld [vmem:[%s10404_s2 + $0xc8] sm:$0xff] }
 0x1ed   : > { %6183 = vmatmul.msk.bf16.vlgmr.msrb.gmra.mxu2 %vm2017_vm1, %v2182_v41 }
 0x1f2   : > { %v2167_v44 = vpop.f32.mrf.mxu1 }
 0x1f3   : > { %6211 = vmatmul.msk.bf16.vlgmr.msrb.gmra.mxu3 %vm1876_vm0, %v8351_v42 }
 0x1f4   : > { %2857 = vmatpush.bf16.msrb.mxu3 %v8128_v38  ;;  %v8377_v38 = vld [vmem:[%s10404_s2 + $0xc0] sm:$0xff] }
 0x1f5   : > { %6343 = vmatmul.msk.bf16.vlgmr.msrb.gmra.mxu1 %vm1876_vm0, %v8377_v38 }
 0x1f8   : > { %2858 = vmatpush.bf16.msrb.mxu3 %v8136_v13 }
 0x1fa   : > { %v2169_v60 = vpop.f32.mrf.mxu1 }
 0x1fb   : > { %v2183_v63 = vpack.c.bf16 %v2169_v60, %v2167_v44  ;;  %v8400_v60 = vld [vmem:[%s10404_s2 + $0x78] sm:$0xff] }
 0x1fc   : > { %2859 = vmatpush.bf16.msrb.mxu3 %v8143_v55  ;;  %10433 = vst [vmem:[#allocation67_spill] sm:$0xff] %v8400_v60 }
 0x1fd   : > { %6184 = vmatmul.msk.bf16.gmra.mxu2 %vm2017_vm1, %v2183_v63  ;;  %v8402_v63 = vpop.f32.mrf.mxu0 }
 0x1fe   : > { %10434 = vst [vmem:[#allocation68_spill] sm:$0xff] %v8402_v63 }
 0x200   : > { %2860 = vmatpush.bf16.msrb.mxu3 %v8148_v56  ;;  %v8385_v56 = vld [vmem:[%s10404_s2 + $0x70] sm:$0xff] }
 0x201   : > { %10432 = vst [vmem:[#allocation66_spill] sm:$0xff] %v8385_v56 }
 0x202   : > { %v2172_v45 = vpop.f32.mrf.mxu1 }
 0x203   : > { %6212 = vmatmul.msk.bf16.gmra.mxu3 %vm1876_vm0, %v8369_v0 }
 0x205   : > { %6344 = vmatmul.msk.bf16.gmra.mxu1 %vm1876_vm0, %v8392_v19 }
 0x20a   : > { %v2174_v13 = vpop.f32.mrf.mxu1 }
 0x20b   : > { %v2184_v55 = vpack.c.bf16 %v2174_v13, %v2172_v45  ;;  %v8409_v45 = vld [vmem:[%s10404_s2 + $0xd0] sm:$0xff] }
 0x20c   : > { %10435 = vst [vmem:[#allocation69_spill] sm:$0xff] %v8409_v45 }
 0x20d   : > { %6185 = vmatmul.msk.bf16.gmra.mxu2 %vm2017_vm1, %v2184_v55  ;;  %v8413_v55 = vpop.f32.mrf.mxu3 }
 0x20e   : > { %10436 = vst [vmem:[#allocation70_spill] sm:$0xff] %v8413_v55 }
 0x212   : > { %v2177_v59 = vpop.f32.mrf.mxu1 }
 0x213   : > { %6213 = vmatmul.msk.bf16.gmra.mxu3 %vm1876_vm0, %v8385_v56 }
 0x215   : > { %6345 = vmatmul.msk.bf16.gmra.mxu1 %vm1876_vm0, %v8409_v45 }
 0x21a   : > { %v2179_v41 = vpop.f32.mrf.mxu1 }
 0x21b   : > { %v2185_v44 = vpack.c.bf16 %v2179_v41, %v2177_v59  ;;  %v8418_v59 = vld [vmem:[%s10404_s2 + $0xa0] sm:$0xff] }
 0x21c   : > { %10437 = vst [vmem:[#allocation71_spill] sm:$0xff] %v8418_v59 }
 0x21d   : > { %6186 = vmatmul.msk.bf16.gmra.mxu2 %vm2017_vm1, %v2185_v44  ;;  %v8427_v44 = vld [vmem:[%s10404_s2 + $0xd8] sm:$0xff] }
 0x21e   : > { %10438 = vst [vmem:[#allocation72_spill] sm:$0xff] %v8427_v44 }
 0x222   : > { %v2442_v25 = vpop.f32.mrf.mxu1 }
 0x223   : > { %6214 = vmatmul.msk.bf16.gmra.mxu3 %vm1876_vm0, %v8400_v60 }
 0x225   : > { %6346 = vmatmul.msk.bf16.gmra.mxu1 %vm1876_vm0, %v8427_v44 }
 0x22a   : > { %v2092_v13 = vpop.f32.mrf.mxu0  ;;  %v2444_v55 = vpop.f32.mrf.mxu1 }
 0x22b   : > { %v2462_v36 = vpack.c.bf16 %v2444_v55, %v2442_v25 }
 0x232   : > { %v8420_v41 = vpop.f32.mrf.mxu0 }
 0x233   : > { %6299 = vmatmul.msk.bf16.vlgmr.msra.gmra.mxu3 %vm1876_vm0, %v8418_v59 }
 0x235   : > { %6431 = vmatmul.msk.bf16.vlgmr.msra.gmra.mxu1 %vm1876_vm0, %v8443_v20 }
 0x236   : > { %v2039_v40 = vpop.f32.mrf.mxu3 }
 0x237   : > { %v2093_v23 = vadd.f32 %v2092_v13, %v2039_v40  ;;  %v7217_v40 = vld [vmem:[%s10397_s12 + $0x48] sm:$0xff] }
 0x238   : > { %2501 = vmatpush.bf16.msra.mxu2 %v7217_v40 }
 0x23a   : > { %v2097_v26 = vpop.f32.mrf.mxu0 }
 0x23c   : > { %2502 = vmatpush.bf16.msra.mxu2 %v7216_v5  ;;  %v8471_v5 = vld [vmem:[%s10404_s2 + $0x108] sm:$0xff] }
 0x23d   : > { %10442 = vst [vmem:[#allocation76_spill] sm:$0xff] %v8471_v5 }
 0x23e   : > { %v8431_v21 = vpop.f32.mrf.mxu3 }
 0x23f   : > { %6271 = vmatmul.msk.bf16.vlgmr.msra.gmra.mxu2 %vm2017_vm1, %v2462_v36 }
 0x241   : > { %v2447_v25 = vpop.f32.mrf.mxu1 }
 0x242   : > { %v8448_v53 = vpop.f32.mrf.mxu0 }
 0x243   : > { %6300 = vmatmul.msk.bf16.gmra.mxu3 %vm1876_vm0, %v8436_v22 }
 0x245   : > { %6432 = vmatmul.msk.bf16.gmra.mxu1 %vm1876_vm0, %v8471_v5 }
 0x246   : > { %v2044_v13 = vpop.f32.mrf.mxu3 }
 0x247   : > { %v2098_v63 = vadd.f32 %v2097_v26, %v2044_v13  ;;  %v7211_v26 = vld [vmem:[%s10397_s12 + $0x38] sm:$0xff] }
 0x248   : > { %2361 = vmatpush.bf16.msra.mxu0 %v7211_v26 }
 0x249   : > { %v2449_v13 = vpop.f32.mrf.mxu1 }
 0x24a   : > { %v2102_v39 = vpop.f32.mrf.mxu0  ;;  %v2463_v28 = vpack.c.bf16 %v2449_v13, %v2447_v25  ;;  %v8493_v25 = vld [vmem:[%s10404_s2 + $0x110] sm:$0xff] }
 0x24b   : > { %10444 = vst [vmem:[#allocation78_spill] sm:$0xff] %v8493_v25 }
 0x24c   : > { %2362 = vmatpush.bf16.msra.mxu0 %v7210_v27  ;;  %v8503_v27 = vld [vmem:[%s10404_s2 + $0xe0] sm:$0xff] }
 0x24d   : > { %10445 = vst [vmem:[#allocation79_spill] sm:$0xff] %v8503_v27 }
 0x24e   : > { %v8455_v18 = vpop.f32.mrf.mxu3 }
 0x24f   : > { %6272 = vmatmul.msk.bf16.gmra.mxu2 %vm2017_vm1, %v2463_v28 }
 0x250   : > { %2641 = vmatpush.bf16.msrb.mxu0 %v7223_v15 }
 0x252   : > { %v8475_v40 = vpop.f32.mrf.mxu0 }
 0x253   : > { %6301 = vmatmul.msk.bf16.gmra.mxu3 %vm1876_vm0, %v8461_v2 }
 0x255   : > { %6433 = vmatmul.msk.bf16.gmra.mxu1 %vm1876_vm0, %v8493_v25 }
 0x256   : > { %v2049_v36 = vpop.f32.mrf.mxu3 }
 0x257   : > { %v2103_v55 = vadd.f32 %v2102_v39, %v2049_v36  ;;  %v2452_v39 = vpop.f32.mrf.mxu1 }
 0x25a   : > { %v2107_v36 = vpop.f32.mrf.mxu0 }
 0x25e   : > { %v8480_v26 = vpop.f32.mrf.mxu3 }
 0x25f   : > { %v2454_v50 = vpop.f32.mrf.mxu1 }
 0x260   : > { %v2464_v8 = vpack.c.bf16 %v2454_v50, %v2452_v39  ;;  %v8512_v50 = vld [vmem:[%s10404_s2 + $0x118] sm:$0xff] }
 0x261   : > { %10446 = vst [vmem:[#allocation80_spill] sm:$0xff] %v8512_v50 }
 0x262   : > { %6273 = vmatmul.msk.bf16.gmra.mxu2 %vm2017_vm1, %v2464_v8 }
 0x263   : > { %6302 = vmatmul.msk.bf16.gmra.mxu3 %vm1876_vm0, %v8486_v46 }
 0x265   : > { %6434 = vmatmul.msk.bf16.gmra.mxu1 %vm1876_vm0, %v8512_v50 }
 0x266   : > { %v2054_v13 = vpop.f32.mrf.mxu3 }
 0x267   : > { %v2108_v28 = vadd.f32 %v2107_v36, %v2054_v13  ;;  %v2457_v32 = vpop.f32.mrf.mxu1 }
 0x26e   : > { %v8497_v48 = vpop.f32.mrf.mxu3 }
 0x26f   : > { %v2459_v36 = vpop.f32.mrf.mxu1 }
 0x270   : > { %v2224_v16 = vpop.f32.mrf.mxu2  ;;  %v2465_v13 = vpack.c.bf16 %v2459_v36, %v2457_v32  ;;  %v7229_v32 = vld [vmem:[%s10397_s12 + $0x68] sm:$0xff] }
 0x271   : > { %v8505_v34 = vadd.f32 %v2224_v16, %v2093_v23  ;;  %v8522_v16 = vld [vmem:[%s10404_s2 + $0xe8] sm:$0xff]  ;;  %2781 = vmatpush.bf16.msrb.mxu2 %v7229_v32 }
 0x272   : > { %6274 = vmatmul.msk.bf16.gmra.mxu2 %vm2017_vm1, %v2465_v13  ;;  %10447 = vst [vmem:[#allocation81_spill] sm:$0xff] %v8522_v16 }
 0x273   : > { %6387 = vmatmul.msk.bf16.vlgmr.msrb.gmra.mxu3 %vm1876_vm0, %v8503_v27 }
 0x276   : > { %v2302_v39 = vpop.f32.mrf.mxu3 }
 0x277   : > { %v2722_v33 = vpop.f32.mrf.mxu1 }
 0x278   : > { %v8516_v8 = vpop.f32.mrf.mxu2 }
 0x27e   : > { %v2304_v57 = vpop.f32.mrf.mxu3 }
 0x27f   : > { %v2322_v23 = vpack.c.bf16 %v2304_v57, %v2302_v39  ;;  %v7228_v39 = vld [vmem:[%s10397_s12 + $0x60] sm:$0xff] }
 0x280   : > { %v2229_v52 = vpop.f32.mrf.mxu2  ;;  %2782 = vmatpush.bf16.msrb.mxu2 %v7228_v39 }
 0x281   : > { %v8524_v58 = vadd.f32 %v2229_v52, %v2098_v63  ;;  %6227 = vmatmul.msk.bf16.vlgmr.msra.gmra.mxu0 %vm2017_vm1, %v2322_v23  ;;  %v2724_v52 = vpop.f32.mrf.mxu1 }
 0x282   : > { %v2742_v63 = vpack.c.bf16 %v2724_v52, %v2722_v33 }
 0x283   : > { %6388 = vmatmul.msk.bf16.gmra.mxu3 %vm1876_vm0, %v8522_v16 }
 0x284   : > { %6359 = vmatmul.msk.bf16.vlgmr.msrb.gmra.mxu2 %vm2017_vm1, %v2742_v63 }
 0x286   : > { %v2307_v36 = vpop.f32.mrf.mxu3 }
 0x288   : > { %v8532_v57 = vpop.f32.mrf.mxu2 }
 0x289   : > { %v2727_v33 = vpop.f32.mrf.mxu1 }
 0x28e   : > { %v2309_v13 = vpop.f32.mrf.mxu3 }
 0x28f   : > { %v2323_v23 = vpack.c.bf16 %v2309_v13, %v2307_v36 }
 0x290   : > { %v2234_v4 = vpop.f32.mrf.mxu2 }
 0x291   : > { %v8543_v32 = vadd.f32 %v2234_v4, %v2103_v55  ;;  %6228 = vmatmul.msk.bf16.gmra.mxu0 %vm2017_vm1, %v2323_v23  ;;  %v2729_v52 = vpop.f32.mrf.mxu1  ;;  %v7222_v4 = vld [vmem:[%s10397_s12 + $0x50] sm:$0xff]  ;;  %v8560_v23 = vld [vmem:[%s10404_s2 + $0xf8] sm:$0xff] }
 0x292   : > { %v2743_v63 = vpack.c.bf16 %v2729_v52, %v2727_v33  ;;  %10449 = vst [vmem:[#allocation83_spill] sm:$0xff] %v8560_v23  ;;  %2642 = vmatpush.bf16.msrb.mxu0 %v7222_v4 }
 0x293   : > { %6389 = vmatmul.msk.bf16.gmra.mxu3 %vm1876_vm0, %v8541_v31  ;;  %v8595_v31 = vpop.f32.mrf.mxu0 }
 0x294   : > { %6360 = vmatmul.msk.bf16.gmra.mxu2 %vm2017_vm1, %v2743_v63 }
 0x296   : > { %v2312_v36 = vpop.f32.mrf.mxu3 }
 0x298   : > { %v8551_v39 = vpop.f32.mrf.mxu2 }
 0x299   : > { %v2732_v33 = vpop.f32.mrf.mxu1 }
 0x29e   : > { %v2314_v55 = vpop.f32.mrf.mxu3 }
 0x29f   : > { %v2324_v13 = vpack.c.bf16 %v2314_v55, %v2312_v36 }
 0x2a0   : > { %v2239_v15 = vpop.f32.mrf.mxu2 }
 0x2a1   : > { %v8562_v54 = vadd.f32 %v2239_v15, %v2108_v28  ;;  %6229 = vmatmul.msk.bf16.gmra.mxu0 %vm2017_vm1, %v2324_v13  ;;  %v2734_v1 = vpop.f32.mrf.mxu1 }
 0x2a2   : > { %v2744_v14 = vpack.c.bf16 %v2734_v1, %v2732_v33  ;;  %v7241_v1 = vld [vmem:[%s10397_s12 + $0x88] sm:$0xff] }
 0x2a3   : > { %6390 = vmatmul.msk.bf16.gmra.mxu3 %vm1876_vm0, %v8560_v23  ;;  %3061 = vmatpush.bf16.msra.mxu2 %v7241_v1 }
 0x2a4   : > { %6361 = vmatmul.msk.bf16.gmra.mxu2 %vm2017_vm1, %v2744_v14  ;;  %v7240_v14 = vld [vmem:[%s10397_s12 + $0x80] sm:$0xff] }
 0x2a6   : > { %v2317_v52 = vpop.f32.mrf.mxu3 }
 0x2a7   : > { %3062 = vmatpush.bf16.msra.mxu2 %v7240_v14 }
 0x2a9   : > { %v2737_v55 = vpop.f32.mrf.mxu1 }
 0x2ae   : > { %v2319_v63 = vpop.f32.mrf.mxu3 }
 0x2af   : > { %v2325_v36 = vpack.c.bf16 %v2319_v63, %v2317_v52  ;;  %v8577_v52 = vpop.f32.mrf.mxu2 }
 0x2b1   : > { %6230 = vmatmul.msk.bf16.gmra.mxu0 %vm2017_vm1, %v2325_v36  ;;  %v2739_v12 = vpop.f32.mrf.mxu1 }
 0x2b2   : > { %v2745_v28 = vpack.c.bf16 %v2739_v12, %v2737_v55 }
 0x2b4   : > { %6362 = vmatmul.msk.bf16.gmra.mxu2 %vm2017_vm1, %v2745_v28  ;;  %v7235_v28 = vld [vmem:[%s10397_s12 + $0x78] sm:$0xff] }
 0x2b5   : > { %2921 = vmatpush.bf16.msra.mxu0 %v7235_v28 }
 0x2b6   : > { %v2582_v4 = vpop.f32.mrf.mxu3 }
 0x2b9   : > { %v3002_v17 = vpop.f32.mrf.mxu1 }
 0x2be   : > { %v2584_v15 = vpop.f32.mrf.mxu3 }
 0x2bf   : > { %v2602_v13 = vpack.c.bf16 %v2584_v15, %v2582_v4 }
 0x2c1   : > { %6315 = vmatmul.msk.bf16.vlgmr.msrb.gmra.mxu0 %vm2017_vm1, %v2602_v13  ;;  %v3004_v12 = vpop.f32.mrf.mxu1 }
 0x2c2   : > { %v3022_v63 = vpack.c.bf16 %v3004_v12, %v3002_v17  ;;  %v2504_v4 = vpop.f32.mrf.mxu2  ;;  %v7234_v17 = vld [vmem:[%s10397_s12 + $0x70] sm:$0xff] }
 0x2c3   : > { %2922 = vmatpush.bf16.msra.mxu0 %v7234_v17 }
 0x2c4   : > { %6447 = vmatmul.msk.bf16.vlgmr.msra.gmra.mxu2 %vm2017_vm1, %v3022_v63 }
 0x2c6   : > { %v2587_v33 = vpop.f32.mrf.mxu3 }
 0x2c9   : > { %v3007_v15 = vpop.f32.mrf.mxu1 }
 0x2ca   : > { %v8584_v1 = vpop.f32.mrf.mxu2 }
 0x2ce   : > { %v2589_v36 = vpop.f32.mrf.mxu3 }
 0x2cf   : > { %v2603_v55 = vpack.c.bf16 %v2589_v36, %v2587_v33 }
 0x2d1   : > { %6316 = vmatmul.msk.bf16.gmra.mxu0 %vm2017_vm1, %v2603_v55  ;;  %v3009_v49 = vpop.f32.mrf.mxu1 }
 0x2d2   : > { %v3023_v10 = vpack.c.bf16 %v3009_v49, %v3007_v15  ;;  %v2509_v63 = vpop.f32.mrf.mxu2 }
 0x2d4   : > { %6448 = vmatmul.msk.bf16.gmra.mxu2 %vm2017_vm1, %v3023_v10 }
 0x2d6   : > { %v2592_v13 = vpop.f32.mrf.mxu3 }
 0x2d9   : > { %v3012_v12 = vpop.f32.mrf.mxu1 }
 0x2da   : > { %v8592_v15 = vpop.f32.mrf.mxu2 }
 0x2de   : > { %v2594_v14 = vpop.f32.mrf.mxu3 }
 0x2df   : > { %v2604_v33 = vpack.c.bf16 %v2594_v14, %v2592_v13 }
 0x2e1   : > { %6317 = vmatmul.msk.bf16.gmra.mxu0 %vm2017_vm1, %v2604_v33  ;;  %v3014_v55 = vpop.f32.mrf.mxu1 }
 0x2e2   : > { %v3024_v28 = vpack.c.bf16 %v3014_v55, %v3012_v12 }
 0x2e4   : > { %6449 = vmatmul.msk.bf16.gmra.mxu2 %vm2017_vm1, %v3024_v28 }
 0x2e5   : > { %v2514_v13 = vpop.f32.mrf.mxu2 }
 0x2e6   : > { %v2597_v36 = vpop.f32.mrf.mxu3 }
 0x2e9   : > { %v3017_v23 = vpop.f32.mrf.mxu1 }
 0x2ee   : > { %v2599_v47 = vpop.f32.mrf.mxu3 }
 0x2ef   : > { %v2605_v49 = vpack.c.bf16 %v2599_v47, %v2597_v36  ;;  %v8600_v36 = vpop.f32.mrf.mxu2 }
 0x2f1   : > { %6318 = vmatmul.msk.bf16.gmra.mxu0 %vm2017_vm1, %v2605_v49  ;;  %v3019_v17 = vpop.f32.mrf.mxu1 }
 0x2f2   : > { %v3025_v14 = vpack.c.bf16 %v3019_v17, %v3017_v23 }
 0x2f4   : > { %6450 = vmatmul.msk.bf16.gmra.mxu2 %vm2017_vm1, %v3025_v14 }
 0x2f6   : > { %v2862_v10 = vpop.f32.mrf.mxu3 }
 0x2f7   : > { %v2519_v27 = vpop.f32.mrf.mxu2 }
 0x2fe   : > { %v2364_v33 = vpop.f32.mrf.mxu0  ;;  %v2864_v16 = vpop.f32.mrf.mxu3 }
 0x2ff   : > { %v2384_v12 = vadd.f32 %v2364_v33, %v8505_v34  ;;  %v2882_v55 = vpack.c.bf16 %v2864_v16, %v2862_v10  ;;  %v8604_v34 = vpop.f32.mrf.mxu2 }
 0x301   : > { %6403 = vmatmul.msk.bf16.vlgmr.msra.gmra.mxu0 %vm2017_vm1, %v2882_v55  ;;  %v2524_v47 = vadd.f32 %v2504_v4, %v2384_v12 }
 0x306   : > { %v2366_v28 = vpop.f32.mrf.mxu0  ;;  %v2867_v49 = vpop.f32.mrf.mxu3 }
 0x307   : > { %v2784_v55 = vpop.f32.mrf.mxu2 }
 0x30e   : > { %v2369_v46 = vpop.f32.mrf.mxu0  ;;  %v2869_v50 = vpop.f32.mrf.mxu3 }
 0x30f   : > { %v2386_v2 = vadd.f32 %v2369_v46, %v8524_v58  ;;  %v2883_v23 = vpack.c.bf16 %v2869_v50, %v2867_v49  ;;  %v2786_v46 = vpop.f32.mrf.mxu2 }
 0x311   : > { %6404 = vmatmul.msk.bf16.gmra.mxu0 %vm2017_vm1, %v2883_v23  ;;  %v2526_v17 = vadd.f32 %v2509_v63, %v2386_v2 }
 0x316   : > { %v2371_v14 = vpop.f32.mrf.mxu0  ;;  %v2872_v25 = vpop.f32.mrf.mxu3 }
 0x31e   : > { %v2374_v16 = vpop.f32.mrf.mxu0  ;;  %v2874_v10 = vpop.f32.mrf.mxu3 }
 0x31f   : > { %v2388_v4 = vadd.f32 %v2374_v16, %v8543_v32  ;;  %v2884_v33 = vpack.c.bf16 %v2874_v10, %v2872_v25  ;;  %v2789_v32 = vpop.f32.mrf.mxu2 }
 0x321   : > { %6405 = vmatmul.msk.bf16.gmra.mxu0 %vm2017_vm1, %v2884_v33  ;;  %v2528_v12 = vadd.f32 %v2514_v13, %v2388_v4 }
 0x326   : > { %v8608_v22 = vpop.f32.mrf.mxu0  ;;  %v2877_v58 = vpop.f32.mrf.mxu3 }
 0x327   : > { %v2791_v10 = vpop.f32.mrf.mxu2 }
 0x32e   : > { %v2379_v50 = vpop.f32.mrf.mxu0  ;;  %v2879_v49 = vpop.f32.mrf.mxu3 }
 0x32f   : > { %v2390_v2 = vadd.f32 %v2379_v50, %v8562_v54  ;;  %v2885_v63 = vpack.c.bf16 %v2879_v49, %v2877_v58  ;;  %v2794_v33 = vpop.f32.mrf.mxu2 }
 0x331   : > { %6406 = vmatmul.msk.bf16.gmra.mxu0 %vm2017_vm1, %v2885_v63  ;;  %v2530_v23 = vadd.f32 %v2519_v27, %v2390_v2 }
 0x336   : > { %v8612_v5 = vpop.f32.mrf.mxu0 }
 0x337   : > { %v8614_v44 = vpop.f32.mrf.mxu2 }
 0x33e   : > { %v2644_v25 = vpop.f32.mrf.mxu0 }
 0x33f   : > { %v2664_v16 = vadd.f32 %v2644_v25, %v2524_v47  ;;  %v2799_v58 = vpop.f32.mrf.mxu2 }
 0x341   : > { %v2804_v13 = vadd.f32 %v2784_v55, %v2664_v16 }
 0x346   : > { %v2646_v4 = vpop.f32.mrf.mxu0 }
 0x347   : > { %v8616_v2 = vpop.f32.mrf.mxu2 }
 0x34e   : > { %v2649_v59 = vpop.f32.mrf.mxu0 }
 0x34f   : > { %v2666_v20 = vadd.f32 %v2649_v59, %v2526_v17  ;;  %v3064_v55 = vpop.f32.mrf.mxu2 }
 0x351   : > { %v2806_v60 = vadd.f32 %v2789_v32, %v2666_v20  ;;  %v2095_v20 = vadd.f32 %v8420_v41, %v8431_v21  ;;  %v2100_v21 = vadd.f32 %v8448_v53, %v8455_v18 }
 0x353   : > { %v2245_v59 = vadd.f32 %v8516_v8, %v2095_v20  ;;  %v8637_v8 = vld [vmem:[%s10451_s13] ss:$0 sm:$0xff] }
 0x355   : > { %v2385_v17 = vadd.f32 %v2366_v28, %v2245_v59  ;;  %v2247_v28 = vadd.f32 %v8532_v57, %v2100_v21 }
 0x356   : > { %v2651_v56 = vpop.f32.mrf.mxu0 }
 0x357   : > { %v3066_v32 = vpop.f32.mrf.mxu2 }
 0x35e   : > { %v2654_v54 = vpop.f32.mrf.mxu0 }
 0x35f   : > { %v2668_v50 = vadd.f32 %v2654_v54, %v2528_v12  ;;  %v2525_v12 = vadd.f32 %v8584_v1, %v2385_v17 }
 0x361   : > { %v2808_v49 = vadd.f32 %v2794_v33, %v2668_v50  ;;  %v2665_v54 = vadd.f32 %v2646_v4, %v2525_v12  ;;  %v2387_v4 = vadd.f32 %v2371_v14, %v2247_v28  ;;  %v2105_v14 = vadd.f32 %v8475_v40, %v8480_v26  ;;  %v7246_v26 = vld [vmem:[%s10452_s14 + $0x20] sm:$0xff] }
 0x363   : > { %v2527_v18 = vadd.f32 %v8592_v15, %v2387_v4  ;;  %v2249_v21 = vadd.f32 %v8551_v39, %v2105_v14 }
 0x366   : > { %v2656_v27 = vpop.f32.mrf.mxu0 }
 0x36e   : > { %v2659_v63 = vpop.f32.mrf.mxu0 }
 0x36f   : > { %v2670_v45 = vadd.f32 %v2659_v63, %v2530_v23  ;;  %v2805_v23 = vadd.f32 %v2786_v46, %v2665_v54 }
 0x371   : > { %v8618_v47 = vadd.f32 %v2799_v58, %v2670_v45  ;;  %v8629_v45 = vld [vmem:[%s10450_s30] ss:$0 sm:$0xff]  ;;  %v3069_v58 = vpop.f32.mrf.mxu2 }
 0x376   : > { %v8620_v25 = vpop.f32.mrf.mxu0 }
 0x379   : > { %v3071_v12 = vpop.f32.mrf.mxu2 }
 0x37e   : > { %v2924_v16 = vpop.f32.mrf.mxu0 }
 0x37f   : > { %v2944_v33 = vadd.f32 %v2924_v16, %v2804_v13 }
 0x381   : > { %v3084_v50 = vadd.f32 %v3064_v55, %v2944_v33  ;;  %v2667_v33 = vadd.f32 %v2651_v56, %v2527_v18  ;;  %v3074_v15 = vpop.f32.mrf.mxu2  ;;  %v2389_v56 = vadd.f32 %v8608_v22, %v2249_v21 }
 0x383   : > { %v3096_v41 = vmul.f32 %v8629_v45, %v3084_v50  ;;  %v2807_v57 = vadd.f32 %v2791_v10, %v2667_v33 }
 0x385   : > { %v3108_v55 = vadd.f32 %v8637_v8, %v3096_v41 }
 0x386   : > { %v2926_v63 = vpop.f32.mrf.mxu0 }
 0x387   : > { %v2945_v1 = vadd.f32 %v2926_v63, %v2805_v23  ;;  %v3116_v53 = vmax.f32 %v3108_v55, 0.0 }
 0x389   : > { %v3085_v13 = vadd.f32 %v3066_v32, %v2945_v1  ;;  %v2529_v1 = vadd.f32 %v8600_v36, %v2389_v56  ;;  %v2110_v36 = vadd.f32 %v8595_v31, %v8497_v48 }
 0x38b   : > { %v3097_v46 = vmul.f32 %v8629_v45, %v3085_v13  ;;  %v2669_v55 = vadd.f32 %v2656_v27, %v2529_v1  ;;  %v2251_v27 = vadd.f32 %v8577_v52, %v2110_v36 }
 0x38d   : > { %v3109_v20 = vadd.f32 %v8637_v8, %v3097_v46  ;;  %v7245_v46 = vld [vmem:[%s10452_s14 + $0x18] sm:$0xff]  ;;  %v2809_v18 = vadd.f32 %v8614_v44, %v2669_v55 }
 0x38e   : > { %v2929_v59 = vpop.f32.mrf.mxu0  ;;  %v7249_v55 = vld [vmem:[%s10452_s14 + $0x38] sm:$0xff] }
 0x38f   : > { %v3117_v17 = vmax.f32 %v3109_v20, 0.0  ;;  %v2946_v16 = vadd.f32 %v2929_v59, %v2806_v60  ;;  %v7247_v60 = vld [vmem:[%s10452_s14 + $0x28] sm:$0xff]  ;;  %v3076_v59 = vpop.f32.mrf.mxu2 }
 0x390   : > { %3243 = vmatpush.bf16.msrb.mxu1 %v7247_v60 }
 0x391   : > { %v8644_v54 = vpack.c.bf16 %v3117_v17, %v3116_v53  ;;  %v3086_v50 = vadd.f32 %v3069_v58, %v2946_v16 }
 0x393   : > { %v3098_v23 = vmul.f32 %v8629_v45, %v3086_v50 }
 0x394   : > { %3244 = vmatpush.bf16.msrb.mxu1 %v7246_v26 }
 0x395   : > { %v3110_v58 = vadd.f32 %v8637_v8, %v3098_v23 }
 0x396   : > { %v2931_v32 = vpop.f32.mrf.mxu0 }
 0x397   : > { %v2947_v63 = vadd.f32 %v2931_v32, %v2807_v57  ;;  %v3118_v28 = vmax.f32 %v3110_v58, 0.0  ;;  %v3079_v32 = vpop.f32.mrf.mxu2 }
 0x398   : > { %3245 = vmatpush.bf16.msrb.mxu1 %v7245_v46 }
 0x399   : > { %v3087_v41 = vadd.f32 %v3071_v12, %v2947_v63  ;;  %v2391_v12 = vadd.f32 %v8612_v5, %v2251_v27 }
 0x39b   : > { %v3099_v10 = vmul.f32 %v8629_v45, %v3087_v41  ;;  %v2531_v14 = vadd.f32 %v8604_v34, %v2391_v12 }
 0x39d   : > { %v3111_v40 = vadd.f32 %v8637_v8, %v3099_v10  ;;  %v2671_v63 = vadd.f32 %v8620_v25, %v2531_v14 }
 0x39e   : > { %v2934_v39 = vpop.f32.mrf.mxu0 }
 0x39f   : > { %v3119_v13 = vmax.f32 %v3111_v40, 0.0  ;;  %v2948_v4 = vadd.f32 %v2934_v39, %v2808_v49  ;;  %v2811_v5 = vadd.f32 %v8616_v2, %v2671_v63  ;;  %v3081_v56 = vpop.f32.mrf.mxu2  ;;  %v7423_v2 = vld [vmem:[%s10404_s2] sm:$0xff] }
 0x3a1   : > { %v8661_v22 = vpack.c.bf16 %v3119_v13, %v3118_v28  ;;  %v3088_v20 = vadd.f32 %v3074_v15, %v2948_v4 }
 0x3a3   : > { %v3100_v17 = vmul.f32 %v8629_v45, %v3088_v20 }
 0x3a5   : > { %v3112_v33 = vadd.f32 %v8637_v8, %v3100_v17 }
 0x3a6   : > { %v2936_v53 = vpop.f32.mrf.mxu0 }
 0x3a7   : > { %v2949_v49 = vadd.f32 %v2936_v53, %v2809_v18  ;;  %v3120_v23 = vmax.f32 %v3112_v33, 0.0 }
 0x3a9   : > { %v3089_v16 = vadd.f32 %v3076_v59, %v2949_v49  ;;  %v7248_v59 = vld [vmem:[%s10452_s14 + $0x30] sm:$0xff] }
 0x3ab   : > { %v3101_v50 = vmul.f32 %v8629_v45, %v3089_v16 }
 0x3ad   : > { %v3113_v57 = vadd.f32 %v8637_v8, %v3101_v50 }
 0x3ae   : > { %v2939_v44 = vpop.f32.mrf.mxu0 }
 0x3af   : > { %v3121_v31 = vmax.f32 %v3113_v57, 0.0  ;;  %v2950_v48 = vadd.f32 %v2939_v44, %v8618_v47  ;;  %v10453_v57 = vld [vmem:[#allocation69_spill] sm:$0xff] }
 0x3b1   : > { %v8678_v52 = vpack.c.bf16 %v3121_v31, %v3120_v23  ;;  %v3090_v21 = vadd.f32 %v3079_v32, %v2950_v48  ;;  %v7256_v32 = vld [vmem:[%s10452_s14 + $0x70] sm:$0xff]  ;;  %v10455_v23 = vld [vmem:[#allocation72_spill] sm:$0xff]  ;;  %v10456_v48 = vld [vmem:[#allocation67_spill] sm:$0xff] }
 0x3b3   : > { %v3102_v60 = vmul.f32 %v8629_v45, %v3090_v21  ;;  %v10457_v21 = vld [vmem:[#allocation74_spill] sm:$0xff] }
 0x3b5   : > { %v3114_v10 = vadd.f32 %v8637_v8, %v3102_v60  ;;  %v10458_v60 = vld [vmem:[#allocation71_spill] sm:$0xff] }
 0x3b6   : > { %v2941_v41 = vpop.f32.mrf.mxu0 }
 0x3b7   : > { %v2951_v15 = vadd.f32 %v2941_v41, %v2811_v5  ;;  %v3122_v47 = vmax.f32 %v3114_v10, 0.0  ;;  %v10459_v10 = vld [vmem:[#allocation76_spill] sm:$0xff] }
 0x3b9   : > { %v3091_v58 = vadd.f32 %v3081_v56, %v2951_v15 }
 0x3bb   : > { %v3103_v34 = vmul.f32 %v8629_v45, %v3091_v58  ;;  %v7424_v45 = vld [vmem:[%s10404_s2 + $0x20] sm:$0xff] }
 0x3bd   : > { %v3115_v40 = vadd.f32 %v8637_v8, %v3103_v34 }
 0x3bf   : > { %v3123_v26 = vmax.f32 %v3115_v40, 0.0 }
 0x3c1   : > { %v8685_v25 = vpack.c.bf16 %v3123_v26, %v3122_v47 }
 0x3c3   : > { %3132 = vmatpush.bf16.msra.mxu3 %v8685_v25  ;;  %3171 = vmatpush.bf16.msrb.mxu0 %v8685_v25 }
 0x3c4   : > { %3437 = vmatpush.bf16.msra.mxu1 %v8685_v25 }
 0x3c7   : > { %3133 = vmatpush.bf16.msra.mxu3 %v8678_v52  ;;  %3172 = vmatpush.bf16.msrb.mxu0 %v8678_v52 }
 0x3c8   : > { %3438 = vmatpush.bf16.msra.mxu1 %v8678_v52 }
 0x3cb   : > { %3134 = vmatpush.bf16.msra.mxu3 %v8661_v22  ;;  %3173 = vmatpush.bf16.msrb.mxu0 %v8661_v22 }
 0x3cc   : > { %3439 = vmatpush.bf16.msra.mxu1 %v8661_v22 }
 0x3cf   : > { %3135 = vmatpush.bf16.msra.mxu3 %v8644_v54  ;;  %3174 = vmatpush.bf16.msrb.mxu0 %v8644_v54 }
 0x3d0   : > { %3440 = vmatpush.bf16.msra.mxu1 %v8644_v54 }
 0x3d2   : > { %6451 = vmatmul.msk.bf16.vlgmr.msra.gmra.mxu3 %vm1876_vm0, %v7423_v2  ;;  %6455 = vmatmul.msk.bf16.vlgmr.msrb.gmra.mxu0 %vm1876_vm0, %v7424_v45 }
 0x3d3   : > { %3330 = vmatpush.bf16.msrb.mxu3 %v8685_v25 }
 0x3d7   : > { %3331 = vmatpush.bf16.msrb.mxu3 %v8678_v52 }
 0x3db   : > { %3332 = vmatpush.bf16.msrb.mxu3 %v8661_v22 }
 0x3df   : > { %3333 = vmatpush.bf16.msrb.mxu3 %v8644_v54 }
 0x3e2   : > { %6452 = vmatmul.msk.bf16.gmra.mxu3 %vm1876_vm0, %v8173_v7  ;;  %6456 = vmatmul.msk.bf16.gmra.mxu0 %vm1876_vm0, %v8178_v3  ;;  %v7244_v7 = vld [vmem:[%s10452_s14 + $0x10] sm:$0xff]  ;;  %v7243_v3 = vld [vmem:[%s10452_s14 + $0x8] sm:$0xff] }
 0x3e3   : > { %3544 = vmatpush.bf16.msra.mxu3 %v8685_v25  ;;  %3302 = vmatpush.bf16.msrb.mxu2 %v7244_v7 }
 0x3e7   : > { %3545 = vmatpush.bf16.msra.mxu3 %v8678_v52  ;;  %3303 = vmatpush.bf16.msrb.mxu2 %v7243_v3 }
 0x3eb   : > { %3546 = vmatpush.bf16.msra.mxu3 %v8661_v22 }
 0x3ef   : > { %3547 = vmatpush.bf16.msra.mxu3 %v8644_v54 }
 0x3f2   : > { %6453 = vmatmul.msk.bf16.gmra.mxu3 %vm1876_vm0, %v8194_v51  ;;  %6457 = vmatmul.msk.bf16.gmra.mxu0 %vm1876_vm0, %v8199_v30  ;;  %v7242_v51 = vld [vmem:[%s10452_s14] sm:$0xff] }
 0x3f3   : > { %3304 = vmatpush.bf16.msrb.mxu2 %v7242_v51  ;;  %v7253_v51 = vld [vmem:[%s10452_s14 + $0x58] sm:$0xff] }
 0x3f7   : > { %3508 = vmatpush.bf16.msra.mxu2 %v7253_v51  ;;  %v7257_v51 = vld [vmem:[%s10452_s14 + $0x78] sm:$0xff] }
 0x402   : > { %6454 = vmatmul.msk.bf16.gmra.mxu3 %vm1876_vm0, %v8221_v37  ;;  %6458 = vmatmul.msk.bf16.gmra.mxu0 %vm1876_vm0, %v8226_v9 }
 0x412   : > { %6497 = vmatmul.msk.bf16.vlgmr.msrb.gmra.mxu3 %vm1876_vm0, %v8247_v6 }
 0x413   : > { %3758 = vmatpush.bf16.msrb.mxu3 %v8685_v25 }
 0x417   : > { %3759 = vmatpush.bf16.msrb.mxu3 %v8678_v52 }
 0x41b   : > { %3760 = vmatpush.bf16.msrb.mxu3 %v8661_v22 }
 0x41f   : > { %3761 = vmatpush.bf16.msrb.mxu3 %v8644_v54 }
 0x422   : > { %6498 = vmatmul.msk.bf16.gmra.mxu3 %vm1876_vm0, %v8269_v29 }
 0x432   : > { %6499 = vmatmul.msk.bf16.gmra.mxu3 %vm1876_vm0, %v8283_v62 }
 0x442   : > { %6500 = vmatmul.msk.bf16.gmra.mxu3 %vm1876_vm0, %v8290_v24 }
 0x44f   : > { %v3176_v30 = vpop.f32.mrf.mxu0 }
 0x452   : > { %6549 = vmatmul.msk.bf16.vlgmr.msra.gmra.mxu3 %vm1876_vm0, %v8307_v35 }
 0x453   : > { %3972 = vmatpush.bf16.msra.mxu3 %v8685_v25 }
 0x455   : > { %v3137_v62 = vpop.f32.mrf.mxu3 }
 0x457   : > { %3973 = vmatpush.bf16.msra.mxu3 %v8678_v52  ;;  %v3178_v37 = vpop.f32.mrf.mxu0 }
 0x458   : > { %v3196_v9 = vpack.c.bf16 %v3178_v37, %v3176_v30  ;;  %v10461_v30 = vld [vmem:[#allocation78_spill] sm:$0xff] }
 0x45a   : > { %6477 = vmatmul.msk.bf16.vlgmr.msrb.gmra.mxu1 %vm3225_vm2, %v3196_v9  ;;  %v7262_v9 = vld [vmem:[%s10452_s14 + $0xa0] sm:$0xff] }
 0x45b   : > { %3651 = vmatpush.bf16.msrb.mxu1 %v8685_v25  ;;  %3974 = vmatpush.bf16.msra.mxu3 %v8661_v22 }
 0x45d   : > { %v3139_v6 = vpop.f32.mrf.mxu3 }
 0x45e   : > { %v3157_v29 = vpack.c.bf16 %v3139_v6, %v3137_v62 }
 0x45f   : > { %3652 = vmatpush.bf16.msrb.mxu1 %v8678_v52  ;;  %3975 = vmatpush.bf16.msra.mxu3 %v8644_v54  ;;  %v3181_v24 = vpop.f32.mrf.mxu0 }
 0x460   : > { %6493 = vmatmul.msk.bf16.vlgmr.msrb.gmra.mxu2 %vm3225_vm2, %v3157_v29 }
 0x462   : > { %6550 = vmatmul.msk.bf16.gmra.mxu3 %vm1876_vm0, %v8334_v61  ;;  %v7250_v61 = vld [vmem:[%s10452_s14 + $0x40] sm:$0xff] }
 0x463   : > { %3653 = vmatpush.bf16.msrb.mxu1 %v8661_v22  ;;  %3401 = vmatpush.bf16.msra.mxu0 %v7250_v61  ;;  %v7251_v61 = vld [vmem:[%s10452_s14 + $0x48] sm:$0xff] }
 0x465   : > { %v3142_v35 = vpop.f32.mrf.mxu3 }
 0x467   : > { %3654 = vmatpush.bf16.msrb.mxu1 %v8644_v54  ;;  %v3183_v8 = vpop.f32.mrf.mxu0  ;;  %3402 = vmatpush.bf16.msra.mxu0 %v7249_v55  ;;  %v10463_v55 = vld [vmem:[#allocation80_spill] sm:$0xff] }
 0x468   : > { %v3197_v39 = vpack.c.bf16 %v3183_v8, %v3181_v24  ;;  %v7261_v24 = vld [vmem:[%s10452_s14 + $0x98] sm:$0xff]  ;;  %v7252_v8 = vld [vmem:[%s10452_s14 + $0x50] sm:$0xff] }
 0x469   : > { %3509 = vmatpush.bf16.msra.mxu2 %v7252_v8 }
 0x46a   : > { %6478 = vmatmul.msk.bf16.gmra.mxu1 %vm3225_vm2, %v3197_v39 }
 0x46b   : > { %3403 = vmatpush.bf16.msra.mxu0 %v7248_v59 }
 0x46d   : > { %v3144_v1 = vpop.f32.mrf.mxu3  ;;  %3510 = vmatpush.bf16.msra.mxu2 %v7251_v61 }
 0x46e   : > { %v3158_v28 = vpack.c.bf16 %v3144_v1, %v3142_v35  ;;  %v10462_v35 = vld [vmem:[#allocation75_spill] sm:$0xff]  ;;  %v7260_v1 = vld [vmem:[%s10452_s14 + $0x90] sm:$0xff] }
 0x46f   : > { %v3186_v13 = vpop.f32.mrf.mxu0  ;;  %3615 = vmatpush.bf16.msrb.mxu0 %v7256_v32 }
 0x470   : > { %6494 = vmatmul.msk.bf16.gmra.mxu2 %vm3225_vm2, %v3158_v28 }
 0x472   : > { %6551 = vmatmul.msk.bf16.gmra.mxu3 %vm1876_vm0, %v8343_v11 }
 0x475   : > { %v3147_v4 = vpop.f32.mrf.mxu3 }
 0x477   : > { %v3188_v46 = vpop.f32.mrf.mxu0 }
 0x478   : > { %v3198_v20 = vpack.c.bf16 %v3188_v46, %v3186_v13 }
 0x47a   : > { %6479 = vmatmul.msk.bf16.gmra.mxu1 %vm3225_vm2, %v3198_v20 }
 0x47d   : > { %v3149_v11 = vpop.f32.mrf.mxu3 }
 0x47e   : > { %v3159_v18 = vpack.c.bf16 %v3149_v11, %v3147_v4 }
 0x47f   : > { %v3191_v53 = vpop.f32.mrf.mxu0 }
 0x480   : > { %6495 = vmatmul.msk.bf16.gmra.mxu2 %vm3225_vm2, %v3159_v18  ;;  %v10464_v18 = vld [vmem:[#allocation77_spill] sm:$0xff] }
 0x482   : > { %6552 = vmatmul.msk.bf16.gmra.mxu3 %vm1876_vm0, %v8358_v43 }
 0x485   : > { %v3152_v36 = vpop.f32.mrf.mxu3 }
 0x487   : > { %v3193_v17 = vpop.f32.mrf.mxu0 }
 0x488   : > { %v3199_v49 = vpack.c.bf16 %v3193_v17, %v3191_v53 }
 0x48a   : > { %6480 = vmatmul.msk.bf16.gmra.mxu1 %vm3225_vm2, %v3199_v49 }
 0x48d   : > { %v3154_v27 = vpop.f32.mrf.mxu3 }
 0x48e   : > { %v3160_v16 = vpack.c.bf16 %v3154_v27, %v3152_v36 }
 0x490   : > { %6496 = vmatmul.msk.bf16.gmra.mxu2 %vm3225_vm2, %v3160_v16 }
 0x492   : > { %6601 = vmatmul.msk.bf16.vlgmr.msrb.gmra.mxu3 %vm1876_vm0, %v8377_v38 }
 0x495   : > { %v3335_v12 = vpop.f32.mrf.mxu3 }
 0x49a   : > { %6523 = vmatmul.msk.bf16.vlgmr.msra.gmra.mxu1 %vm1876_vm0, %v8351_v42 }
 0x49b   : > { %3865 = vmatpush.bf16.msra.mxu1 %v8685_v25  ;;  %v10460_v25 = vld [vmem:[#allocation73_spill] sm:$0xff] }
 0x49d   : > { %v3337_v33 = vpop.f32.mrf.mxu3 }
 0x49e   : > { %v3355_v43 = vpack.c.bf16 %v3337_v33, %v3335_v12 }
 0x49f   : > { %3866 = vmatpush.bf16.msra.mxu1 %v8678_v52 }
 0x4a0   : > { %6519 = vmatmul.msk.bf16.vlgmr.msra.gmra.mxu0 %vm3225_vm2, %v3355_v43  ;;  %v10465_v43 = vld [vmem:[#allocation79_spill] sm:$0xff] }
 0x4a2   : > { %6602 = vmatmul.msk.bf16.gmra.mxu3 %vm1876_vm0, %v8392_v19 }
 0x4a3   : > { %3867 = vmatpush.bf16.msra.mxu1 %v8661_v22  ;;  %v10454_v22 = vld [vmem:[#allocation66_spill] sm:$0xff] }
 0x4a5   : > { %v3340_v50 = vpop.f32.mrf.mxu3 }
 0x4a7   : > { %3868 = vmatpush.bf16.msra.mxu1 %v8644_v54  ;;  %v7255_v54 = vld [vmem:[%s10452_s14 + $0x68] sm:$0xff] }
 0x4a8   : > { %3616 = vmatpush.bf16.msrb.mxu0 %v7255_v54 }
 0x4aa   : > { %6524 = vmatmul.msk.bf16.gmra.mxu1 %vm1876_vm0, %v8369_v0  ;;  %v7254_v0 = vld [vmem:[%s10452_s14 + $0x60] sm:$0xff] }
 0x4ac   : > { %3617 = vmatpush.bf16.msrb.mxu0 %v7254_v0 }
 0x4ad   : > { %v3342_v42 = vpop.f32.mrf.mxu3 }
 0x4ae   : > { %v3356_v38 = vpack.c.bf16 %v3342_v42, %v3340_v50 }
 0x4b0   : > { %6520 = vmatmul.msk.bf16.gmra.mxu0 %vm3225_vm2, %v3356_v38 }
 0x4b1   : > { %3829 = vmatpush.bf16.msra.mxu0 %v7262_v9 }
 0x4b2   : > { %6603 = vmatmul.msk.bf16.gmra.mxu3 %vm1876_vm0, %v10453_v57 }
 0x4b5   : > { %v3345_v19 = vpop.f32.mrf.mxu3  ;;  %3830 = vmatpush.bf16.msra.mxu0 %v7261_v24 }
 0x4b9   : > { %3831 = vmatpush.bf16.msra.mxu0 %v7260_v1 }
 0x4ba   : > { %6525 = vmatmul.msk.bf16.gmra.mxu1 %vm1876_vm0, %v10454_v22 }
 0x4bd   : > { %v3347_v44 = vpop.f32.mrf.mxu3 }
 0x4be   : > { %v3357_v14 = vpack.c.bf16 %v3347_v44, %v3345_v19 }
 0x4c0   : > { %6521 = vmatmul.msk.bf16.gmra.mxu0 %vm3225_vm2, %v3357_v14 }
 0x4c2   : > { %6604 = vmatmul.msk.bf16.gmra.mxu3 %vm1876_vm0, %v10455_v23  ;;  %v10466_v23 = vld [vmem:[#allocation81_spill] sm:$0xff] }
 0x4c5   : > { %v3350_v31 = vpop.f32.mrf.mxu3 }
 0x4ca   : > { %6526 = vmatmul.msk.bf16.gmra.mxu1 %vm1876_vm0, %v10456_v48 }
 0x4cd   : > { %v3352_v63 = vpop.f32.mrf.mxu3 }
 0x4ce   : > { %v3358_v52 = vpack.c.bf16 %v3352_v63, %v3350_v31 }
 0x4d0   : > { %6522 = vmatmul.msk.bf16.gmra.mxu0 %vm3225_vm2, %v3358_v52 }
 0x4d2   : > { %6653 = vmatmul.msk.bf16.vlgmr.msra.gmra.mxu3 %vm1876_vm0, %v10457_v21 }
 0x4d5   : > { %v3549_v5 = vpop.f32.mrf.mxu3 }
 0x4d7   : > { %v3247_v41 = vpop.f32.mrf.mxu1 }
 0x4da   : > { %6575 = vmatmul.msk.bf16.vlgmr.msrb.gmra.mxu1 %vm1876_vm0, %v10458_v60 }
 0x4dd   : > { %v3551_v15 = vpop.f32.mrf.mxu3 }
 0x4de   : > { %v3569_v56 = vpack.c.bf16 %v3551_v15, %v3549_v5  ;;  %v7268_v15 = vld [vmem:[%s10452_s14 + $0xd0] sm:$0xff] }
 0x4df   : > { %v3249_v58 = vpop.f32.mrf.mxu1 }
 0x4e0   : > { %6571 = vmatmul.msk.bf16.vlgmr.msrb.gmra.mxu0 %vm3225_vm2, %v3569_v56 }
 0x4e1   : > { %4043 = vmatpush.bf16.msrb.mxu0 %v7268_v15  ;;  %v10469_v15 = vld [vmem:[#allocation36_spill] sm:$0xff] }
 0x4e2   : > { %6654 = vmatmul.msk.bf16.gmra.mxu3 %vm1876_vm0, %v10459_v10 }
 0x4e3   : > { %v3306_v34 = vpop.f32.mrf.mxu2 }
 0x4e4   : > { %v3307_v40 = vadd.f32 %v3306_v34, %v3247_v41  ;;  %v7259_v41 = vld [vmem:[%s10452_s14 + $0x88] sm:$0xff] }
 0x4e5   : > { %v3554_v47 = vpop.f32.mrf.mxu3  ;;  %3722 = vmatpush.bf16.msrb.mxu2 %v7259_v41 }
 0x4e7   : > { %v3252_v26 = vpop.f32.mrf.mxu1 }
 0x4ea   : > { %6576 = vmatmul.msk.bf16.gmra.mxu1 %vm1876_vm0, %v10460_v25  ;;  %v7266_v25 = vld [vmem:[%s10452_s14 + $0xc0] sm:$0xff] }
 0x4eb   : > { %v3308_v2 = vpop.f32.mrf.mxu2 }
 0x4ec   : > { %v3309_v54 = vadd.f32 %v3308_v2, %v3249_v58 }
 0x4ed   : > { %v3556_v45 = vpop.f32.mrf.mxu3 }
 0x4ee   : > { %v3570_v7 = vpack.c.bf16 %v3556_v45, %v3554_v47  ;;  %v7258_v47 = vld [vmem:[%s10452_s14 + $0x80] sm:$0xff] }
 0x4ef   : > { %v8823_v3 = vpop.f32.mrf.mxu1  ;;  %3723 = vmatpush.bf16.msrb.mxu2 %v7258_v47  ;;  %v7413_v47 = vld [vmem:[%s10471_s8] ss:$0 sm:$0xff]  ;;  %s10060_s8 = scalar_lea.vmem [#allocation2], %s7367_s11 }
 0x4f0   : > { %6572 = vmatmul.msk.bf16.gmra.mxu0 %vm3225_vm2, %v3570_v7 }
 0x4f2   : > { %6655 = vmatmul.msk.bf16.gmra.mxu3 %vm1876_vm0, %v10461_v30 }
 0x4f3   : > { %v3311_v62 = vpop.f32.mrf.mxu2  ;;  %3724 = vmatpush.bf16.msrb.mxu2 %v7257_v51  ;;  %v10473_v51 = vld [vmem:[#allocation43_spill] sm:$0xff] }
 0x4f4   : > { %v3312_v37 = vadd.f32 %v3311_v62, %v3252_v26  ;;  %v10467_v26 = vld [vmem:[#allocation82_spill] sm:$0xff] }
 0x4f5   : > { %v3559_v6 = vpop.f32.mrf.mxu3 }
 0x4f7   : > { %v3257_v29 = vpop.f32.mrf.mxu1 }
 0x4fa   : > { %6577 = vmatmul.msk.bf16.gmra.mxu1 %vm1876_vm0, %v10462_v35  ;;  %v10468_v35 = vld [vmem:[#allocation83_spill] sm:$0xff] }
 0x4fb   : > { %v3313_v39 = vpop.f32.mrf.mxu2 }
 0x4fc   : > { %v3314_v60 = vadd.f32 %v3313_v39, %v8823_v3 }
 0x4fd   : > { %v3561_v28 = vpop.f32.mrf.mxu3 }
 0x4fe   : > { %v3571_v13 = vpack.c.bf16 %v3561_v28, %v3559_v6 }
 0x4ff   : > { %v8848_v4 = vpop.f32.mrf.mxu1 }
 0x500   : > { %6573 = vmatmul.msk.bf16.gmra.mxu0 %vm3225_vm2, %v3571_v13 }
 0x502   : > { %6656 = vmatmul.msk.bf16.gmra.mxu3 %vm1876_vm0, %v10463_v55 }
 0x503   : > { %v3316_v46 = vpop.f32.mrf.mxu2 }
 0x504   : > { %v3317_v20 = vadd.f32 %v3316_v46, %v3257_v29 }
 0x505   : > { %v3564_v59 = vpop.f32.mrf.mxu3 }
 0x507   : > { %v3262_v11 = vpop.f32.mrf.mxu1 }
 0x50a   : > { %6578 = vmatmul.msk.bf16.gmra.mxu1 %vm1876_vm0, %v10464_v18 }
 0x50b   : > { %v3318_v53 = vpop.f32.mrf.mxu2 }
 0x50d   : > { %v3566_v36 = vpop.f32.mrf.mxu3 }
 0x50e   : > { %v3572_v17 = vpack.c.bf16 %v3566_v36, %v3564_v59 }
 0x50f   : > { %v8855_v49 = vpop.f32.mrf.mxu1 }
 0x510   : > { %6574 = vmatmul.msk.bf16.gmra.mxu0 %vm3225_vm2, %v3572_v17 }
 0x513   : > { %v3321_v27 = vpop.f32.mrf.mxu2 }
 0x514   : > { %v3322_v16 = vadd.f32 %v3321_v27, %v3262_v11 }
 0x515   : > { %v3763_v12 = vpop.f32.mrf.mxu3 }
 0x517   : > { %v3442_v33 = vpop.f32.mrf.mxu1 }
 0x51a   : > { %6627 = vmatmul.msk.bf16.vlgmr.msra.gmra.mxu1 %vm1876_vm0, %v10465_v43 }
 0x51b   : > { %v3323_v55 = vpop.f32.mrf.mxu2 }
 0x51d   : > { %v3405_v50 = vpop.f32.mrf.mxu0  ;;  %v3765_v42 = vpop.f32.mrf.mxu3 }
 0x51e   : > { %v8860_v38 = vadd.f32 %v3405_v50, %v3307_v40  ;;  %v3783_v57 = vpack.c.bf16 %v3765_v42, %v3763_v12  ;;  %v7267_v40 = vld [vmem:[%s10452_s14 + $0xc8] sm:$0xff] }
 0x51f   : > { %v3444_v32 = vpop.f32.mrf.mxu1  ;;  %4044 = vmatpush.bf16.msrb.mxu0 %v7267_v40 }
 0x520   : > { %v3462_v19 = vpack.c.bf16 %v3444_v32, %v3442_v33  ;;  %6623 = vmatmul.msk.bf16.vlgmr.msra.gmra.mxu0 %vm3225_vm2, %v3783_v57  ;;  %v7265_v57 = vld [vmem:[%s10452_s14 + $0xb8] sm:$0xff] }
 0x522   : > { %6545 = vmatmul.msk.bf16.vlgmr.msra.gmra.mxu2 %vm3225_vm2, %v3462_v19 }
 0x523   : > { %4045 = vmatpush.bf16.msrb.mxu0 %v7266_v25  ;;  %3936 = vmatpush.bf16.msra.mxu2 %v7265_v57  ;;  %v10479_v57 = vld [vmem:[#allocation40_spill] sm:$0xff] }
 0x525   : > { %v3407_v22 = vpop.f32.mrf.mxu0  ;;  %v3768_v0 = vpop.f32.mrf.mxu3 }
 0x526   : > { %v8864_v44 = vadd.f32 %v3407_v22, %v3309_v54  ;;  %v7282_v22 = vld [vmem:[%s10253_s20 + $0x8] sm:$0xff] }
 0x527   : > { %v3447_v14 = vpop.f32.mrf.mxu1  ;;  %4416 = vmatpush.bf16.msra.mxu0 %v7282_v22 }
 0x52a   : > { %6628 = vmatmul.msk.bf16.gmra.mxu1 %vm1876_vm0, %v10466_v23 }
 0x52d   : > { %v3410_v31 = vpop.f32.mrf.mxu0  ;;  %v3770_v48 = vpop.f32.mrf.mxu3 }
 0x52e   : > { %v8868_v63 = vadd.f32 %v3410_v31, %v3312_v37  ;;  %v3784_v52 = vpack.c.bf16 %v3770_v48, %v3768_v0  ;;  %v3319_v37 = vadd.f32 %v3318_v53, %v8848_v4  ;;  %v3324_v4 = vadd.f32 %v3323_v55, %v8855_v49  ;;  %v7264_v0 = vld [vmem:[%s10452_s14 + $0xb0] sm:$0xff]  ;;  %v7263_v48 = vld [vmem:[%s10452_s14 + $0xa8] sm:$0xff] }
 0x52f   : > { %v3449_v21 = vpop.f32.mrf.mxu1  ;;  %3937 = vmatpush.bf16.msra.mxu2 %v7264_v0 }
 0x530   : > { %v3463_v5 = vpack.c.bf16 %v3449_v21, %v3447_v14  ;;  %6624 = vmatmul.msk.bf16.gmra.mxu0 %vm3225_vm2, %v3784_v52  ;;  %v7281_v14 = vld [vmem:[%s10253_s20] sm:$0xff] }
 0x531   : > { %4417 = vmatpush.bf16.msra.mxu0 %v7281_v14 }
 0x532   : > { %6546 = vmatmul.msk.bf16.gmra.mxu2 %vm3225_vm2, %v3463_v5 }
 0x533   : > { %3938 = vmatpush.bf16.msra.mxu2 %v7263_v48 }
 0x535   : > { %v3412_v56 = vpop.f32.mrf.mxu0  ;;  %v3773_v58 = vpop.f32.mrf.mxu3 }
 0x536   : > { %v8879_v10 = vadd.f32 %v3412_v56, %v3314_v60  ;;  %v10470_v56 = vld [vmem:[#allocation37_spill] sm:$0xff] }
 0x537   : > { %v3452_v34 = vpop.f32.mrf.mxu1 }
 0x53a   : > { %6629 = vmatmul.msk.bf16.gmra.mxu1 %vm1876_vm0, %v10467_v26  ;;  %v10472_v26 = vld [vmem:[#allocation47_spill] sm:$0xff] }
 0x53d   : > { %v3415_v2 = vpop.f32.mrf.mxu0  ;;  %v3775_v45 = vpop.f32.mrf.mxu3 }
 0x53e   : > { %v8892_v7 = vadd.f32 %v3415_v2, %v3317_v20  ;;  %v3785_v3 = vpack.c.bf16 %v3775_v45, %v3773_v58  ;;  %v1455_v58 = vadd.f32 %v10470_v56, %v10469_v15 }
 0x53f   : > { %v3454_v30 = vpop.f32.mrf.mxu1 }
 0x540   : > { %v3464_v62 = vpack.c.bf16 %v3454_v30, %v3452_v34  ;;  %6625 = vmatmul.msk.bf16.gmra.mxu0 %vm3225_vm2, %v3785_v3  ;;  %v1484_v25 = vadd.f32 %v10472_v26, %v1455_v58  ;;  %v1505_v30 = vmul.f32 %v7413_v47, %v10473_v51 }
 0x542   : > { %6547 = vmatmul.msk.bf16.gmra.mxu2 %vm3225_vm2, %v3464_v62  ;;  %v7414_v62 = vld [vmem:[%s10474_s1] ss:$0 sm:$0xff]  ;;  %s5708_s1 = sshll.u32 %s10060_s8, 4  ;;  %s5709_s1 = int_to_ptr.vmem [resolvable:$true] %s5708_s1 }
 0x545   : > { %v3417_v9 = vpop.f32.mrf.mxu0  ;;  %v3778_v6 = vpop.f32.mrf.mxu3 }
 0x546   : > { %v8900_v29 = vadd.f32 %v3417_v9, %v3319_v37  ;;  %v1506_v37 = vmul.f32 %v7413_v47, %v1484_v25 }
 0x547   : > { %v3457_v24 = vpop.f32.mrf.mxu1 }
 0x54a   : > { %6630 = vmatmul.msk.bf16.gmra.mxu1 %vm1876_vm0, %v10468_v35 }
 0x54d   : > { %v3420_v8 = vpop.f32.mrf.mxu0  ;;  %v3780_v39 = vpop.f32.mrf.mxu3 }
 0x54e   : > { %v8904_v1 = vadd.f32 %v3420_v8, %v3322_v16  ;;  %v3786_v28 = vpack.c.bf16 %v3780_v39, %v3778_v6  ;;  %v1517_v6 = vadd.f32 %v7414_v62, %v1505_v30  ;;  %v10475_v8 = vld [vmem:[#allocation38_spill] sm:$0xff]  ;;  %v10476_v39 = vld [vmem:[#allocation39_spill] sm:$0xff] }
 0x54f   : > { %v3459_v13 = vpop.f32.mrf.mxu1 }
 0x550   : > { %v3465_v61 = vpack.c.bf16 %v3459_v13, %v3457_v24  ;;  %6626 = vmatmul.msk.bf16.gmra.mxu0 %vm3225_vm2, %v3786_v28  ;;  %v1518_v24 = vadd.f32 %v7414_v62, %v1506_v37  ;;  %v1460_v28 = vadd.f32 %v10476_v39, %v10475_v8  ;;  %v1525_v13 = vmax.f32 %v1517_v6, 0.0 }
 0x552   : > { %6548 = vmatmul.msk.bf16.gmra.mxu2 %vm3225_vm2, %v3465_v61  ;;  %v1526_v61 = vmax.f32 %v1518_v24, 0.0  ;;  %v10485_v24 = vld [vmem:[#allocation64_spill] sm:$0xff] }
 0x554   : > { %v4378_v55 = vpack.c.bf16 %v1526_v61, %v1525_v13  ;;  %v10486_v13 = vld [vmem:[#allocation61_spill] sm:$0xff] }
 0x555   : > { %v3422_v46 = vpop.f32.mrf.mxu0  ;;  %v3977_v20 = vpop.f32.mrf.mxu3  ;;  %v1511_v61 = vmul.f32 %v7413_v47, %v10486_v13 }
 0x556   : > { %v8909_v59 = vadd.f32 %v3422_v46, %v3324_v4  ;;  %v10477_v4 = vld [vmem:[#allocation53_spill] sm:$0xff] }
 0x557   : > { %v3656_v11 = vpop.f32.mrf.mxu1  ;;  %v1489_v46 = vadd.f32 %v10477_v4, %v1460_v28  ;;  %v1523_v4 = vadd.f32 %v7414_v62, %v1511_v61  ;;  %v6707_v61 = vld [vmem:[%s10250_s17 + $0x3c] sm:$0xf0] }
 0x55d   : > { %v3979_v18 = vpop.f32.mrf.mxu3  ;;  %v8913_v27 = vpop.f32.mrf.mxu0 }
 0x55e   : > { %v3997_v53 = vpack.c.bf16 %v3979_v18, %v3977_v20 }
 0x55f   : > { %v3658_v36 = vpop.f32.mrf.mxu1 }
 0x560   : > { %v3676_v17 = vpack.c.bf16 %v3658_v36, %v3656_v11  ;;  %6675 = vmatmul.msk.bf16.vlgmr.msrb.gmra.mxu0 %vm3225_vm2, %v3997_v53  ;;  %v10478_v53 = vld [vmem:[#allocation49_spill] sm:$0xff] }
 0x561   : > { %v1507_v36 = vmul.f32 %v7413_v47, %v10478_v53 }
 0x562   : > { %6597 = vmatmul.msk.bf16.vlgmr.msrb.gmra.mxu2 %vm3225_vm2, %v3676_v17  ;;  %v1508_v17 = vmul.f32 %v7413_v47, %v1489_v46 }
 0x565   : > { %v3982_v16 = vpop.f32.mrf.mxu3  ;;  %v8915_v33 = vpop.f32.mrf.mxu0 }
 0x567   : > { %v3661_v12 = vpop.f32.mrf.mxu1 }
 0x56d   : > { %v3984_v49 = vpop.f32.mrf.mxu3  ;;  %v8922_v19 = vpop.f32.mrf.mxu0 }
 0x56e   : > { %v3998_v43 = vpack.c.bf16 %v3984_v49, %v3982_v16  ;;  %v1520_v49 = vadd.f32 %v7414_v62, %v1508_v17 }
 0x56f   : > { %v3663_v50 = vpop.f32.mrf.mxu1 }
 0x570   : > { %v3677_v42 = vpack.c.bf16 %v3663_v50, %v3661_v12  ;;  %6676 = vmatmul.msk.bf16.gmra.mxu0 %vm3225_vm2, %v3998_v43  ;;  %v1519_v12 = vadd.f32 %v7414_v62, %v1507_v36  ;;  %v1528_v0 = vmax.f32 %v1520_v49, 0.0  ;;  %v1531_v36 = vmax.f32 %v1523_v4, 0.0 }
 0x572   : > { %6598 = vmatmul.msk.bf16.gmra.mxu2 %vm3225_vm2, %v3677_v42  ;;  %v1527_v22 = vmax.f32 %v1519_v12, 0.0 }
 0x574   : > { %v4379_v48 = vpack.c.bf16 %v1528_v0, %v1527_v22 }
 0x575   : > { %v3987_v32 = vpop.f32.mrf.mxu3  ;;  %v8937_v5 = vpop.f32.mrf.mxu0 }
 0x577   : > { %v3666_v54 = vpop.f32.mrf.mxu1 }
 0x57d   : > { %v3989_v23 = vpop.f32.mrf.mxu3  ;;  %v8942_v34 = vpop.f32.mrf.mxu0 }
 0x57e   : > { %v3999_v31 = vpack.c.bf16 %v3989_v23, %v3987_v32  ;;  %v10480_v32 = vld [vmem:[#allocation41_spill] sm:$0xff]  ;;  %v10481_v23 = vld [vmem:[#allocation59_spill] sm:$0xff] }
 0x57f   : > { %v3668_v52 = vpop.f32.mrf.mxu1 }
 0x580   : > { %v3678_v21 = vpack.c.bf16 %v3668_v52, %v3666_v54  ;;  %6677 = vmatmul.msk.bf16.gmra.mxu0 %vm3225_vm2, %v3999_v31  ;;  %v1465_v54 = vadd.f32 %v10480_v32, %v10479_v57 }
 0x582   : > { %6599 = vmatmul.msk.bf16.gmra.mxu2 %vm3225_vm2, %v3678_v21  ;;  %v1494_v31 = vadd.f32 %v10481_v23, %v1465_v54 }
 0x585   : > { %v3992_v41 = vpop.f32.mrf.mxu3  ;;  %v8954_v9 = vpop.f32.mrf.mxu0 }
 0x587   : > { %v3671_v60 = vpop.f32.mrf.mxu1 }
 0x58d   : > { %v3994_v40 = vpop.f32.mrf.mxu3  ;;  %v8959_v20 = vpop.f32.mrf.mxu0 }
 0x58e   : > { %v4000_v2 = vpack.c.bf16 %v3994_v40, %v3992_v41  ;;  %v10482_v41 = vld [vmem:[#allocation55_spill] sm:$0xff] }
 0x58f   : > { %v3673_v45 = vpop.f32.mrf.mxu1 }
 0x590   : > { %v3679_v3 = vpack.c.bf16 %v3673_v45, %v3671_v60  ;;  %6678 = vmatmul.msk.bf16.gmra.mxu0 %vm3225_vm2, %v4000_v2  ;;  %v1509_v60 = vmul.f32 %v7413_v47, %v10482_v41  ;;  %v10483_v2 = vld [vmem:[#allocation42_spill] sm:$0xff]  ;;  %v10484_v45 = vld [vmem:[#allocation44_spill] sm:$0xff] }
 0x592   : > { %6600 = vmatmul.msk.bf16.gmra.mxu2 %vm3225_vm2, %v3679_v3  ;;  %v1521_v58 = vadd.f32 %v7414_v62, %v1509_v60  ;;  %v1470_v3 = vadd.f32 %v10484_v45, %v10483_v2  ;;  %v6725_v45 = vld [vmem:[%s10250_s17 + $0x50] sm:$0xf] }
 0x594   : > { %v1529_v51 = vmax.f32 %v1521_v58, 0.0 }
 0x595   : > { %v8965_v42 = vpop.f32.mrf.mxu0 }
 0x597   : > { %v3870_v35 = vpop.f32.mrf.mxu1 }
 0x59d   : > { %v3833_v15 = vpop.f32.mrf.mxu0 }
 0x59f   : > { %v3872_v11 = vpop.f32.mrf.mxu1 }
 0x5a0   : > { %v3890_v18 = vpack.c.bf16 %v3872_v11, %v3870_v35  ;;  %6747 = vmatmul.msk.bf16.vlgmr.msra.gmra.mxu0 %vm2017_vm1, %v4378_v55  ;;  %v1499_v35 = vadd.f32 %v10485_v24, %v1470_v3 }
 0x5a2   : > { %6649 = vmatmul.msk.bf16.vlgmr.msra.gmra.mxu2 %vm3225_vm2, %v3890_v18 }
 0x5a5   : > { %v3512_v16 = vpop.f32.mrf.mxu2  ;;  %v8978_v37 = vpop.f32.mrf.mxu0 }
 0x5a6   : > { %v3532_v43 = vadd.f32 %v3512_v16, %v8860_v38  ;;  %v1510_v38 = vmul.f32 %v7413_v47, %v1494_v31 }
 0x5a7   : > { %v3875_v50 = vpop.f32.mrf.mxu1 }
 0x5a8   : > { %v1522_v40 = vadd.f32 %v7414_v62, %v1510_v38  ;;  %v3639_v54 = vadd.f32 %v8913_v27, %v3532_v43 }
 0x5aa   : > { %v1530_v30 = vmax.f32 %v1522_v40, 0.0 }
 0x5ac   : > { %v4380_v8 = vpack.c.bf16 %v1530_v30, %v1529_v51  ;;  %v7280_v51 = vld [vmem:[%s10250_s17 + $0x58] sm:$0xf0] }
 0x5ad   : > { %v8969_v14 = vpop.f32.mrf.mxu2  ;;  %v3838_v18 = vpop.f32.mrf.mxu0  ;;  %v6726_v30 = vor.u32 %v7280_v51, %v6725_v45 }
 0x5af   : > { %v3877_v52 = vpop.f32.mrf.mxu1  ;;  %4265 = vmatpush.bf16.msrb.mxu3 %v6726_v30 }
 0x5b0   : > { %v3891_v21 = vpack.c.bf16 %v3877_v52, %v3875_v50  ;;  %6748 = vmatmul.msk.bf16.gmra.mxu0 %vm2017_vm1, %v4379_v48 }
 0x5b2   : > { %6650 = vmatmul.msk.bf16.gmra.mxu2 %vm3225_vm2, %v3891_v21 }
 0x5b5   : > { %v3517_v56 = vpop.f32.mrf.mxu2  ;;  %v8990_v57 = vpop.f32.mrf.mxu0 }
 0x5b6   : > { %v3534_v26 = vadd.f32 %v3517_v56, %v8868_v63  ;;  %v1512_v63 = vmul.f32 %v7413_v47, %v1499_v35 }
 0x5b7   : > { %v3880_v25 = vpop.f32.mrf.mxu1 }
 0x5b8   : > { %v1524_v46 = vadd.f32 %v7414_v62, %v1512_v63  ;;  %v3641_v21 = vadd.f32 %v8922_v19, %v3534_v26  ;;  %v6717_v19 = vld [vmem:[%s10250_s17 + $0x48] sm:$0xf]  ;;  %v7279_v26 = vld [vmem:[%s10250_s17 + $0x50] sm:$0xf0]  ;;  %v6713_v63 = vld [vmem:[%s10250_s17 + $0x38] sm:$0xf] }
 0x5b9   : > { %v6718_v2 = vor.u32 %v7279_v26, %v6717_v19 }
 0x5ba   : > { %v1532_v17 = vmax.f32 %v1524_v46, 0.0 }
 0x5bb   : > { %4207 = vmatpush.bf16.msrb.mxu1 %v6718_v2 }
 0x5bc   : > { %v4381_v12 = vpack.c.bf16 %v1532_v17, %v1531_v36  ;;  %v6695_v17 = vld [vmem:[%s10250_s17 + $0x24] sm:$0xf0] }
 0x5bd   : > { %v8980_v6 = vpop.f32.mrf.mxu2  ;;  %v3843_v32 = vpop.f32.mrf.mxu0 }
 0x5bf   : > { %v3882_v39 = vpop.f32.mrf.mxu1 }
 0x5c0   : > { %v3892_v28 = vpack.c.bf16 %v3882_v39, %v3880_v25  ;;  %6749 = vmatmul.msk.bf16.gmra.mxu0 %vm2017_vm1, %v4380_v8  ;;  %v7278_v25 = vld [vmem:[%s10250_s17 + $0x4c] sm:$0xf]  ;;  %v6705_v8 = vld [vmem:[%s10250_s17 + $0x30] sm:$0xf]  ;;  %v7276_v39 = vld [vmem:[%s10250_s17 + $0x38] sm:$0xf0] }
 0x5c1   : > { %v6706_v13 = vor.u32 %v7276_v39, %v6705_v8 }
 0x5c2   : > { %6651 = vmatmul.msk.bf16.gmra.mxu2 %vm3225_vm2, %v3892_v28  ;;  %v7275_v28 = vld [vmem:[%s10250_s17 + $0x34] sm:$0xf] }
 0x5c3   : > { %v6710_v4 = vor.u32 %v7275_v28, %v6707_v61  ;;  %4208 = vmatpush.bf16.msrb.mxu1 %v6706_v13 }
 0x5c5   : > { %v3522_v55 = vpop.f32.mrf.mxu2  ;;  %v8997_v22 = vpop.f32.mrf.mxu0 }
 0x5c6   : > { %v3536_v11 = vadd.f32 %v3522_v55, %v8892_v7  ;;  %v7277_v55 = vld [vmem:[%s10250_s17 + $0x40] sm:$0xf0] }
 0x5c7   : > { %v3885_v53 = vpop.f32.mrf.mxu1  ;;  %v6714_v46 = vor.u32 %v7277_v55, %v6713_v63 }
 0x5c8   : > { %v3643_v43 = vadd.f32 %v8942_v34, %v3536_v11  ;;  %v6719_v34 = vld [vmem:[%s10250_s17 + $0x54] sm:$0xf0] }
 0x5c9   : > { %v6722_v3 = vor.u32 %v7278_v25, %v6719_v34  ;;  %v6693_v11 = vld [vmem:[%s10250_s17 + $0x18] sm:$0xf]  ;;  %4266 = vmatpush.bf16.msrb.mxu3 %v6714_v46  ;;  %v3533_v34 = vadd.f32 %v8969_v14, %v8864_v44 }
 0x5cb   : > { %4236 = vmatpush.bf16.msrb.mxu2 %v6722_v3  ;;  %v3640_v3 = vadd.f32 %v8915_v33, %v3533_v34  ;;  %v9113_v33 = vld [vmem:[%s10249_s16] ss:$0 sm:$0xff]  ;;  %v7356_v34 = vld [vmem:[%s10257_s24 + $0x8] sm:$0xf0] }
 0x5cd   : > { %v8987_v16 = vpop.f32.mrf.mxu2  ;;  %v9003_v52 = vpop.f32.mrf.mxu0 }
 0x5cf   : > { %v3887_v49 = vpop.f32.mrf.mxu1  ;;  %4237 = vmatpush.bf16.msrb.mxu2 %v6710_v4 }
 0x5d0   : > { %v3893_v50 = vpack.c.bf16 %v3887_v49, %v3885_v53  ;;  %6750 = vmatmul.msk.bf16.gmra.mxu0 %vm2017_vm1, %v4381_v12  ;;  %v7272_v53 = vld [vmem:[%s10250_s17 + $0x1c] sm:$0xf]  ;;  %v6701_v12 = vld [vmem:[%s10250_s17 + $0x20] sm:$0xf]  ;;  %v7274_v49 = vld [vmem:[%s10250_s17 + $0x28] sm:$0xf0] }
 0x5d2   : > { %6652 = vmatmul.msk.bf16.gmra.mxu2 %vm3225_vm2, %v3893_v50  ;;  %v6698_v50 = vor.u32 %v7272_v53, %v6695_v17 }
 0x5d4   : > { %4238 = vmatpush.bf16.msrb.mxu2 %v6698_v50 }
 0x5d5   : > { %v3527_v47 = vpop.f32.mrf.mxu2  ;;  %v9008_v38 = vpop.f32.mrf.mxu0 }
 0x5d6   : > { %v3538_v62 = vadd.f32 %v3527_v47, %v8904_v1  ;;  %v6702_v47 = vor.u32 %v7274_v49, %v6701_v12 }
 0x5d8   : > { %4267 = vmatpush.bf16.msrb.mxu3 %v6702_v47 }
 0x5dd   : > { %v8994_v7 = vpop.f32.mrf.mxu2  ;;  %v9012_v27 = vpop.f32.mrf.mxu0 }
 0x5e5   : > { %v3726_v0 = vpop.f32.mrf.mxu2  ;;  %v4049_v24 = vpop.f32.mrf.mxu0 }
 0x5e6   : > { %v3746_v23 = vadd.f32 %v3726_v0, %v3639_v54  ;;  %v6681_v0 = vld [vmem:[%s10250_s17] sm:$0xf] }
 0x5e8   : > { %v8999_v31 = vadd.f32 %v3833_v15, %v3746_v23  ;;  %v7270_v23 = vld [vmem:[%s10250_s17 + $0x8] sm:$0xf0] }
 0x5ed   : > { %v9001_v48 = vpop.f32.mrf.mxu2 }
 0x5ee   : > { %v3747_v30 = vadd.f32 %v9001_v48, %v3640_v3  ;;  %v3535_v48 = vadd.f32 %v8980_v6, %v8879_v10 }
 0x5f0   : > { %v3854_v28 = vadd.f32 %v8978_v37, %v3747_v30  ;;  %v3642_v4 = vadd.f32 %v8937_v5, %v3535_v48 }
 0x5f5   : > { %v3731_v41 = vpop.f32.mrf.mxu2 }
 0x5f6   : > { %v3748_v60 = vadd.f32 %v3731_v41, %v3641_v21  ;;  %v7269_v21 = vld [vmem:[%s10250_s17 + $0x4] sm:$0xf] }
 0x5f8   : > { %v9006_v1 = vadd.f32 %v3838_v18, %v3748_v60  ;;  %v7273_v18 = vld [vmem:[%s10250_s17 + $0x20] sm:$0xf0]  ;;  %v6682_v60 = vor.u32 %v7270_v23, %v6681_v0 }
 0x5f9   : > { %v6694_v36 = vor.u32 %v7273_v18, %v6693_v11 }
 0x5fb   : > { %4209 = vmatpush.bf16.msrb.mxu1 %v6694_v36 }
 0x5fd   : > { %v9010_v56 = vpop.f32.mrf.mxu2 }
 0x5fe   : > { %v3749_v53 = vadd.f32 %v9010_v56, %v3642_v4 }
 0x5ff   : > { %4210 = vmatpush.bf16.msrb.mxu1 %v6682_v60 }
 0x600   : > { %v3856_v10 = vadd.f32 %v8990_v57, %v3749_v53 }
 0x605   : > { %v3736_v15 = vpop.f32.mrf.mxu2 }
 0x606   : > { %v3750_v58 = vadd.f32 %v3736_v15, %v3643_v43  ;;  %v7271_v43 = vld [vmem:[%s10250_s17 + $0x10] sm:$0xf0]  ;;  %v4052_v15 = vpop.f32.mrf.mxu0 }
 0x608   : > { %v9015_v40 = vadd.f32 %v3843_v32, %v3750_v58  ;;  %v3645_v32 = vadd.f32 %v8959_v20, %v3538_v62  ;;  %v6683_v20 = vld [vmem:[%s10250_s17 + $0xc] sm:$0xf0]  ;;  %v6689_v62 = vld [vmem:[%s10250_s17 + $0x8] sm:$0xf] }
 0x609   : > { %v6686_v58 = vor.u32 %v7269_v21, %v6683_v20  ;;  %v6690_v19 = vor.u32 %v7271_v43, %v6689_v62  ;;  %v6767_v62 = vld [vmem:[%s10257_s24 + $0x24] sm:$0xf0]  ;;  %v6773_v43 = vld [vmem:[%s10257_s24 + $0x20] sm:$0xf] }
 0x60b   : > { %4239 = vmatpush.bf16.msrb.mxu2 %v6686_v58  ;;  %4268 = vmatpush.bf16.msrb.mxu3 %v6690_v19 }
 0x60d   : > { %v9035_v35 = vpop.f32.mrf.mxu2 }
 0x60e   : > { %v4054_v2 = vpop.f32.mrf.mxu0 }
 0x615   : > { %v3741_v54 = vpop.f32.mrf.mxu2 }
 0x616   : > { %v3752_v41 = vadd.f32 %v3741_v54, %v3645_v32  ;;  %v4057_v39 = vpop.f32.mrf.mxu0 }
 0x618   : > { %v9093_v26 = vadd.f32 %v9003_v52, %v3752_v41  ;;  %v9106_v52 = vld [vmem:[%s10248_s15] ss:$0 sm:$0xff] }
 0x61d   : > { %v9095_v25 = vpop.f32.mrf.mxu2 }
 0x61e   : > { %v4059_v37 = vpop.f32.mrf.mxu0 }
 0x625   : > { %v3940_v45 = vpop.f32.mrf.mxu2 }
 0x626   : > { %v3960_v51 = vadd.f32 %v3940_v45, %v8999_v31  ;;  %v4062_v12 = vpop.f32.mrf.mxu0  ;;  %v7355_v45 = vld [vmem:[%s10257_s24 + $0x4] sm:$0xf] }
 0x628   : > { %v4067_v8 = vadd.f32 %v9012_v27, %v3960_v51 }
 0x62a   : > { %v4079_v44 = vmul.f32 %v9106_v52, %v4067_v8  ;;  %v6755_v8 = vld [vmem:[%s10257_s24 + $0xc] sm:$0xf0] }
 0x62c   : > { %v4091_v27 = vadd.f32 %v9113_v33, %v4079_v44 }
 0x62d   : > { %v3942_v13 = vpop.f32.mrf.mxu2 }
 0x62e   : > { %v3961_v14 = vadd.f32 %v3942_v13, %v3854_v28  ;;  %v4099_v46 = vmax.f32 %v4091_v27, 0.0  ;;  %v4064_v60 = vpop.f32.mrf.mxu0  ;;  %v6758_v28 = vor.u32 %v7355_v45, %v6755_v8  ;;  %v7357_v13 = vld [vmem:[%s10257_s24 + $0x10] sm:$0xf0] }
 0x62f   : > { %v7329_v8 = vld [vmem:[%s10256_s23 + $0x170] sm:$0xf0] }
 0x630   : > { %v4068_v31 = vadd.f32 %v4049_v24, %v3961_v14 }
 0x632   : > { %v4080_v61 = vmul.f32 %v9106_v52, %v4068_v31  ;;  %v3539_v31 = vadd.f32 %v8994_v7, %v8909_v59 }
 0x634   : > { %v4092_v63 = vadd.f32 %v9113_v33, %v4080_v61  ;;  %v3646_v4 = vadd.f32 %v8965_v42, %v3539_v31 }
 0x635   : > { %v3945_v55 = vpop.f32.mrf.mxu2 }
 0x636   : > { %v4100_v11 = vmax.f32 %v4092_v63, 0.0  ;;  %v3962_v18 = vadd.f32 %v3945_v55, %v9006_v1  ;;  %v3537_v1 = vadd.f32 %v8987_v16, %v8900_v29  ;;  %v6765_v29 = vld [vmem:[%s10257_s24 + $0x18] sm:$0xf]  ;;  %v7358_v16 = vld [vmem:[%s10257_s24 + $0x1c] sm:$0xf]  ;;  %v4419_v61 = vpop.f32.mrf.mxu0 }
 0x637   : > { %v6770_v19 = vor.u32 %v7358_v16, %v6767_v62 }
 0x638   : > { %v4107_v24 = vpack.c.bf16 %v4100_v11, %v4099_v46  ;;  %v4069_v36 = vadd.f32 %v4052_v15, %v3962_v18  ;;  %v3644_v54 = vadd.f32 %v8954_v9, %v3537_v1  ;;  %v7359_v9 = vld [vmem:[%s10257_s24 + $0x20] sm:$0xf0]  ;;  %v7360_v15 = vld [vmem:[%s10257_s24 + $0x28] sm:$0xf0]  ;;  %v3753_v18 = vadd.f32 %v9095_v25, %v3646_v4 }
 0x639   : > { %4670 = vmatpush.bf16.msra.mxu2 %v6770_v19 }
 0x63a   : > { %6727 = vmatmul.msk.bf16.vlgmr.msrb.gmra.mxu1 %vm1876_vm0, %v4107_v24  ;;  %6731 = vmatmul.msk.bf16.vlgmr.msrb.gmra.mxu2 %vm1876_vm0, %v4107_v24  ;;  %v4081_v17 = vmul.f32 %v9106_v52, %v4069_v36  ;;  %v3751_v21 = vadd.f32 %v9035_v35, %v3644_v54  ;;  %v6766_v35 = vor.u32 %v7359_v9, %v6765_v29  ;;  %v6875_v9 = vld [vmem:[%s10256_s23 + $0xb4] sm:$0xf0] }
 0x63b   : > { %6735 = vmatmul.msk.bf16.vlgmr.msrb.gmra.mxu3 %vm1876_vm0, %v4107_v24  ;;  %v3860_v53 = vadd.f32 %v9008_v38, %v3753_v18  ;;  %v9196_v38 = vld [vmem:[%s10254_s21] ss:$0 sm:$0xff]  ;;  %v7053_v18 = vld [vmem:[%s10256_s23 + $0x210] sm:$0xf] }
 0x63c   : > { %v4093_v56 = vadd.f32 %v9113_v33, %v4081_v17  ;;  %4641 = vmatpush.bf16.msra.mxu1 %v6766_v35 }
 0x63d   : > { %v3947_v6 = vpop.f32.mrf.mxu2  ;;  %4671 = vmatpush.bf16.msra.mxu2 %v6758_v28 }
 0x63e   : > { %v3963_v5 = vadd.f32 %v3947_v6, %v3856_v10  ;;  %v4101_v0 = vmax.f32 %v4093_v56, 0.0  ;;  %v4421_v24 = vpop.f32.mrf.mxu0 }
 0x63f   : > { %v4444_v56 = vmul.f32 %v9196_v38, %v4421_v24  ;;  %v6837_v24 = vld [vmem:[%s10256_s23 + $0x60] sm:$0xf] }
 0x640   : > { %v4070_v49 = vadd.f32 %v4054_v2, %v3963_v5  ;;  %v6774_v2 = vor.u32 %v7360_v15, %v6773_v43 }
 0x642   : > { %v4082_v50 = vmul.f32 %v9106_v52, %v4070_v49  ;;  %4699 = vmatpush.bf16.msra.mxu3 %v6774_v2  ;;  %v6861_v2 = vld [vmem:[%s10256_s23 + $0x90] sm:$0xf] }
 0x644   : > { %v4094_v47 = vadd.f32 %v9113_v33, %v4082_v50 }
 0x645   : > { %v3950_v32 = vpop.f32.mrf.mxu2 }
 0x646   : > { %v4102_v57 = vmax.f32 %v4094_v47, 0.0  ;;  %v3964_v23 = vadd.f32 %v3950_v32, %v9015_v40  ;;  %v3858_v40 = vadd.f32 %v8997_v22, %v3751_v21  ;;  %v6753_v22 = vld [vmem:[%s10257_s24] sm:$0xf]  ;;  %v4424_v49 = vpop.f32.mrf.mxu0  ;;  %v6873_v21 = vld [vmem:[%s10256_s23 + $0xa8] sm:$0xf] }
 0x647   : > { %v6754_v30 = vor.u32 %v7356_v34, %v6753_v22  ;;  %v7302_v22 = vld [vmem:[%s10256_s23 + $0x98] sm:$0xf0]  ;;  %v7301_v34 = vld [vmem:[%s10256_s23 + $0x94] sm:$0xf] }
 0x648   : > { %v4108_v41 = vpack.c.bf16 %v4102_v57, %v4101_v0  ;;  %v4071_v20 = vadd.f32 %v4057_v39, %v3964_v23  ;;  %v6761_v39 = vld [vmem:[%s10257_s24 + $0x8] sm:$0xf] }
 0x649   : > { %v6762_v14 = vor.u32 %v7357_v13, %v6761_v39  ;;  %4642 = vmatpush.bf16.msra.mxu1 %v6754_v30  ;;  %v6969_v30 = vld [vmem:[%s10256_s23 + $0x168] sm:$0xf] }
 0x64a   : > { %6728 = vmatmul.msk.bf16.gmra.mxu1 %vm1876_vm0, %v4108_v41  ;;  %6732 = vmatmul.msk.bf16.gmra.mxu2 %vm1876_vm0, %v4108_v41  ;;  %v4083_v3 = vmul.f32 %v9106_v52, %v4071_v20  ;;  %v6970_v28 = vor.u32 %v7329_v8, %v6969_v30  ;;  %v7065_v13 = vld [vmem:[%s10256_s23 + $0x228] sm:$0xf]  ;;  %v7341_v8 = vld [vmem:[%s10256_s23 + $0x1d0] sm:$0xf0] }
 0x64b   : > { %6736 = vmatmul.msk.bf16.gmra.mxu3 %vm1876_vm0, %v4108_v41  ;;  %v7305_v41 = vld [vmem:[%s10256_s23 + $0xb0] sm:$0xf0]  ;;  %v7017_v30 = vld [vmem:[%s10256_s23 + $0x1c8] sm:$0xf] }
 0x64c   : > { %v4095_v48 = vadd.f32 %v9113_v33, %v4083_v3  ;;  %4700 = vmatpush.bf16.msra.mxu3 %v6762_v14  ;;  %v6874_v29 = vor.u32 %v7305_v41, %v6873_v21  ;;  %v6862_v3 = vor.u32 %v7302_v22, %v6861_v2  ;;  %v6849_v14 = vld [vmem:[%s10256_s23 + $0x78] sm:$0xf]  ;;  %v6815_v2 = vld [vmem:[%s10256_s23 + $0x3c] sm:$0xf0] }
 0x64d   : > { %v3952_v58 = vpop.f32.mrf.mxu2  ;;  %5135 = vmatpush.bf16.msrb.mxu1 %v6970_v28  ;;  %v6827_v21 = vld [vmem:[%s10256_s23 + $0x54] sm:$0xf0] }
 0x64e   : > { %v3965_v51 = vadd.f32 %v3952_v58, %v3858_v40  ;;  %v4103_v46 = vmax.f32 %v4095_v48, 0.0  ;;  %v4426_v47 = vpop.f32.mrf.mxu0  ;;  %v4445_v40 = vmul.f32 %v9196_v38, %v4424_v49  ;;  %5106 = vmatpush.bf16.msrb.mxu0 %v6874_v29  ;;  %v7323_v49 = vld [vmem:[%s10256_s23 + $0x140] sm:$0xf0]  ;;  %v7320_v29 = vld [vmem:[%s10256_s23 + $0x128] sm:$0xf0] }
 0x64f   : > { %v4446_v20 = vmul.f32 %v9196_v38, %v4426_v47  ;;  %v6801_v28 = vld [vmem:[%s10256_s23 + $0x18] sm:$0xf] }
 0x650   : > { %v4072_v44 = vadd.f32 %v4059_v37, %v3965_v51  ;;  %v6863_v51 = vld [vmem:[%s10256_s23 + $0x9c] sm:$0xf0] }
 0x651   : > { %v6866_v39 = vor.u32 %v7301_v34, %v6863_v51  ;;  %v6921_v34 = vld [vmem:[%s10256_s23 + $0x108] sm:$0xf] }
 0x652   : > { %v4084_v27 = vmul.f32 %v9106_v52, %v4072_v44  ;;  %v7353_v44 = vld [vmem:[%s10256_s23 + $0x230] sm:$0xf0]  ;;  %5107 = vmatpush.bf16.msrb.mxu0 %v6862_v3 }
 0x653   : > { %v7066_v48 = vor.u32 %v7353_v44, %v7065_v13  ;;  %v7287_v13 = vld [vmem:[%s10256_s23 + $0x20] sm:$0xf0] }
 0x654   : > { %v4096_v63 = vadd.f32 %v9113_v33, %v4084_v27  ;;  %v7299_v27 = vld [vmem:[%s10256_s23 + $0x80] sm:$0xf0]  ;;  %v6802_v44 = vor.u32 %v7287_v13, %v6801_v28  ;;  %v6971_v28 = vld [vmem:[%s10256_s23 + $0x174] sm:$0xf0]  ;;  %v6977_v13 = vld [vmem:[%s10256_s23 + $0x170] sm:$0xf] }
 0x655   : > { %v3955_v55 = vpop.f32.mrf.mxu2  ;;  %v6850_v4 = vor.u32 %v7299_v27, %v6849_v14  ;;  %5164 = vmatpush.bf16.msrb.mxu2 %v7066_v48  ;;  %v7286_v14 = vld [vmem:[%s10256_s23 + $0x1c] sm:$0xf]  ;;  %v6909_v27 = vld [vmem:[%s10256_s23 + $0xf0] sm:$0xf] }
 0x656   : > { %v4104_v11 = vmax.f32 %v4096_v63, 0.0  ;;  %v3966_v37 = vadd.f32 %v3955_v55, %v9093_v26  ;;  %v4429_v23 = vpop.f32.mrf.mxu0  ;;  %v6851_v63 = vld [vmem:[%s10256_s23 + $0x84] sm:$0xf0] }
 0x657   : > { %v4447_v31 = vmul.f32 %v9196_v38, %v4429_v23  ;;  %5108 = vmatpush.bf16.msrb.mxu0 %v6850_v4  ;;  %v7292_v23 = vld [vmem:[%s10256_s23 + $0x4c] sm:$0xf] }
 0x658   : > { %v4109_v59 = vpack.c.bf16 %v4104_v11, %v4103_v46  ;;  %v4073_v7 = vadd.f32 %v4062_v12, %v3966_v37  ;;  %v6957_v11 = vld [vmem:[%s10256_s23 + $0x150] sm:$0xf]  ;;  %v7326_v37 = vld [vmem:[%s10256_s23 + $0x158] sm:$0xf0] }
 0x65a   : > { %6729 = vmatmul.msk.bf16.gmra.mxu1 %vm1876_vm0, %v4109_v59  ;;  %6733 = vmatmul.msk.bf16.gmra.mxu2 %vm1876_vm0, %v4109_v59  ;;  %v4085_v42 = vmul.f32 %v9106_v52, %v4073_v7  ;;  %v6958_v7 = vor.u32 %v7326_v37, %v6957_v11  ;;  %v6789_v37 = vld [vmem:[%s10256_s23] sm:$0xf] }
 0x65b   : > { %6737 = vmatmul.msk.bf16.gmra.mxu3 %vm1876_vm0, %v4109_v59 }
 0x65c   : > { %v4097_v26 = vadd.f32 %v9113_v33, %v4085_v42  ;;  %5136 = vmatpush.bf16.msrb.mxu1 %v6958_v7 }
 0x65d   : > { %v3957_v36 = vpop.f32.mrf.mxu2 }
 0x65e   : > { %v3967_v10 = vadd.f32 %v3957_v36, %v3860_v53  ;;  %v4105_v5 = vmax.f32 %v4097_v26, 0.0  ;;  %v4431_v15 = vpop.f32.mrf.mxu0  ;;  %v7350_v53 = vld [vmem:[%s10256_s23 + $0x218] sm:$0xf0]  ;;  %v7296_v36 = vld [vmem:[%s10256_s23 + $0x68] sm:$0xf0] }
 0x65f   : > { %v4448_v45 = vmul.f32 %v9196_v38, %v4431_v15  ;;  %v7054_v42 = vor.u32 %v7350_v53, %v7053_v18  ;;  %v7289_v15 = vld [vmem:[%s10256_s23 + $0x34] sm:$0xf]  ;;  %v7284_v18 = vld [vmem:[%s10256_s23 + $0x8] sm:$0xf0]  ;;  %v6791_v53 = vld [vmem:[%s10256_s23 + $0xc] sm:$0xf0] }
 0x660   : > { %v4074_v6 = vadd.f32 %v4064_v60, %v3967_v10  ;;  %v7304_v60 = vld [vmem:[%s10256_s23 + $0xac] sm:$0xf]  ;;  %v7295_v10 = vld [vmem:[%s10256_s23 + $0x64] sm:$0xf]  ;;  %v6818_v22 = vor.u32 %v7289_v15, %v6815_v2  ;;  %v6790_v7 = vor.u32 %v7284_v18, %v6789_v37 }
 0x661   : > { %v6878_v16 = vor.u32 %v7304_v60, %v6875_v9  ;;  %5165 = vmatpush.bf16.msrb.mxu2 %v7054_v42  ;;  %v6830_v60 = vor.u32 %v7292_v23, %v6827_v21  ;;  %v7311_v42 = vld [vmem:[%s10256_s23 + $0xe0] sm:$0xf0] }
 0x662   : > { %v4086_v25 = vmul.f32 %v9106_v52, %v4074_v6  ;;  %v4443_v52 = vmul.f32 %v9196_v38, %v4419_v61  ;;  %v7298_v61 = vld [vmem:[%s10256_s23 + $0x7c] sm:$0xf]  ;;  %v6839_v6 = vld [vmem:[%s10256_s23 + $0x6c] sm:$0xf0] }
 0x663   : > { %5193 = vmatpush.bf16.msrb.mxu3 %v6878_v16  ;;  %v6854_v46 = vor.u32 %v7298_v61, %v6851_v63  ;;  %v7029_v16 = vld [vmem:[%s10256_s23 + $0x1e0] sm:$0xf]  ;;  %v7314_v61 = vld [vmem:[%s10256_s23 + $0xf8] sm:$0xf0]  ;;  %v7005_v63 = vld [vmem:[%s10256_s23 + $0x1b0] sm:$0xf] }
 0x664   : > { %v4098_v17 = vadd.f32 %v9113_v33, %v4086_v25  ;;  %v9206_v33 = vld [vmem:[%s10255_s22] ss:$0 sm:$0xff]  ;;  %v6838_v25 = vor.u32 %v7296_v36, %v6837_v24  ;;  %v6910_v4 = vor.u32 %v7314_v61, %v6909_v27  ;;  %v6897_v36 = vld [vmem:[%s10256_s23 + $0xd8] sm:$0xf] }
 0x665   : > { %v4456_v50 = vadd.f32 %v9206_v33, %v4444_v56  ;;  %v4455_v32 = vadd.f32 %v9206_v33, %v4443_v52  ;;  %v4458_v35 = vadd.f32 %v9206_v33, %v4446_v20  ;;  %v4457_v62 = vadd.f32 %v9206_v33, %v4445_v40  ;;  %v6933_v20 = vld [vmem:[%s10256_s23 + $0x120] sm:$0xf]  ;;  %v7344_v40 = vld [vmem:[%s10256_s23 + $0x1e8] sm:$0xf0] }
 0x666   : > { %v4106_v12 = vmax.f32 %v4098_v17, 0.0  ;;  %v9270_v55 = vpop.f32.mrf.mxu0  ;;  %v4460_v59 = vadd.f32 %v9206_v33, %v4448_v45  ;;  %v4459_v26 = vadd.f32 %v9206_v33, %v4447_v31  ;;  %v6842_v17 = vor.u32 %v7295_v10, %v6839_v6  ;;  %5109 = vmatpush.bf16.msrb.mxu0 %v6838_v25  ;;  %v7317_v45 = vld [vmem:[%s10256_s23 + $0x110] sm:$0xf0]  ;;  %v6803_v31 = vld [vmem:[%s10256_s23 + $0x24] sm:$0xf0] }
 0x667   : > { %v4464_v54 = vmax.f32 %v4456_v50, 0.0  ;;  %v4463_v0 = vmax.f32 %v4455_v32, 0.0  ;;  %v4466_v43 = vmax.f32 %v4458_v35, 0.0  ;;  %v4465_v58 = vmax.f32 %v4457_v62, 0.0  ;;  %5194 = vmatpush.bf16.msrb.mxu3 %v6866_v39  ;;  %v7347_v50 = vld [vmem:[%s10256_s23 + $0x200] sm:$0xf0] }
 0x668   : > { %v4110_v1 = vpack.c.bf16 %v4106_v12, %v4105_v5  ;;  %v4468_v5 = vmax.f32 %v4460_v59, 0.0  ;;  %v6945_v12 = vld [vmem:[%s10256_s23 + $0x138] sm:$0xf]  ;;  %v4467_v56 = vmax.f32 %v4459_v26, 0.0  ;;  %v6825_v32 = vld [vmem:[%s10256_s23 + $0x48] sm:$0xf]  ;;  %v6934_v9 = vor.u32 %v7320_v29, %v6933_v20 }
 0x669   : > { %v4579_v57 = vpack.c.bf16 %v4464_v54, %v4463_v0  ;;  %v4580_v19 = vpack.c.bf16 %v4466_v43, %v4465_v58  ;;  %v6946_v52 = vor.u32 %v7323_v49, %v6945_v12  ;;  %v7293_v54 = vld [vmem:[%s10256_s23 + $0x50] sm:$0xf0]  ;;  %v7030_v35 = vor.u32 %v7344_v40, %v7029_v16  ;;  %v6813_v62 = vld [vmem:[%s10256_s23 + $0x30] sm:$0xf]  ;;  %v7290_v43 = vld [vmem:[%s10256_s23 + $0x38] sm:$0xf0] }
 0x66a   : > { %6730 = vmatmul.msk.bf16.gmra.mxu1 %vm1876_vm0, %v4110_v1  ;;  %6734 = vmatmul.msk.bf16.gmra.mxu2 %vm1876_vm0, %v4110_v1  ;;  %v4581_v0 = vpack.c.bf16 %v4468_v5, %v4467_v56  ;;  %v4449_v3 = vmul.f32 %v9196_v38, %v9270_v55  ;;  %v6922_v51 = vor.u32 %v7317_v45, %v6921_v34  ;;  %v7283_v59 = vld [vmem:[%s10256_s23 + $0x4] sm:$0xf]  ;;  %v6993_v10 = vld [vmem:[%s10256_s23 + $0x198] sm:$0xf]  ;;  %v6885_v12 = vld [vmem:[%s10256_s23 + $0xc0] sm:$0xf] }
 0x66b   : > { %6738 = vmatmul.msk.bf16.gmra.mxu3 %vm1876_vm0, %v4110_v1  ;;  %v7041_v1 = vld [vmem:[%s10256_s23 + $0x1f8] sm:$0xf]  ;;  %5137 = vmatpush.bf16.msrb.mxu1 %v6946_v52  ;;  %v7018_v39 = vor.u32 %v7341_v8, %v7017_v30  ;;  %v6806_v48 = vor.u32 %v7286_v14, %v6803_v31  ;;  %v6794_v24 = vor.u32 %v7283_v59, %v6791_v53  ;;  %v7335_v25 = vld [vmem:[%s10256_s23 + $0x1a0] sm:$0xf0]  ;;  %v7308_v49 = vld [vmem:[%s10256_s23 + $0xc8] sm:$0xf0] }
 0x66c   : > { %5195 = vmatpush.bf16.msrb.mxu3 %v6854_v46  ;;  %v7042_v47 = vor.u32 %v7347_v50, %v7041_v1  ;;  %v4461_v55 = vadd.f32 %v9206_v33, %v4449_v3  ;;  %v7338_v46 = vld [vmem:[%s10256_s23 + $0x1b8] sm:$0xf0]  ;;  %v6898_v26 = vor.u32 %v7311_v42, %v6897_v36  ;;  %v6981_v1 = vld [vmem:[%s10256_s23 + $0x180] sm:$0xf]  ;;  %v6886_v56 = vor.u32 %v7308_v49, %v6885_v12  ;;  %v7332_v52 = vld [vmem:[%s10256_s23 + $0x188] sm:$0xf0] }
 0x66d   : > { %v7006_v11 = vor.u32 %v7338_v46, %v7005_v63  ;;  %v6982_v50 = vor.u32 %v7332_v52, %v6981_v1  ;;  %v7330_v14 = vld [vmem:[%s10256_s23 + $0x178] sm:$0xf0]  ;;  %v6959_v46 = vld [vmem:[%s10256_s23 + $0x15c] sm:$0xf0]  ;;  %v6965_v59 = vld [vmem:[%s10256_s23 + $0x158] sm:$0xf] }
 0x66e   : > { %v4436_v41 = vpop.f32.mrf.mxu0  ;;  %5166 = vmatpush.bf16.msrb.mxu2 %v7042_v47  ;;  %v4469_v6 = vmax.f32 %v4461_v55, 0.0  ;;  %v4290_v47 = vld [vmem:[%s10251_s18] sm:$0x7]  ;;  %v7352_v36 = vld [vmem:[%s10256_s23 + $0x22c] sm:$0xf] }
 0x66f   : > { %v4450_v58 = vmul.f32 %v9196_v38, %v4436_v41  ;;  %5138 = vmatpush.bf16.msrb.mxu1 %v6934_v9  ;;  %v9440_v41 = vperm.slane %v4290_v47, 1  ;;  %v9442_v20 = vperm.slane %v4290_v47, 2  ;;  %v7067_v42 = vld [vmem:[%s10256_s23 + $0x234] sm:$0xf0]  ;;  %v7322_v12 = vld [vmem:[%s10256_s23 + $0x13c] sm:$0xf] }
 0x670   : > { %5196 = vmatpush.bf16.msrb.mxu3 %v6842_v17  ;;  %v6994_v17 = vor.u32 %v7335_v25, %v6993_v10  ;;  %v6881_v10 = vld [vmem:[%s10256_s23 + $0xb0] sm:$0xf]  ;;  %v7306_v25 = vld [vmem:[%s10256_s23 + $0xb8] sm:$0xf0]  ;;  %v6947_v49 = vld [vmem:[%s10256_s23 + $0x144] sm:$0xf0] }
 0x671   : > { %v4462_v38 = vadd.f32 %v9206_v33, %v4450_v58  ;;  %v6953_v1 = vld [vmem:[%s10256_s23 + $0x140] sm:$0xf] }
 0x672   : > { %5167 = vmatpush.bf16.msrb.mxu2 %v7030_v35 }
 0x673   : > { %5139 = vmatpush.bf16.msrb.mxu1 %v6922_v51  ;;  %v4470_v33 = vmax.f32 %v4462_v38, 0.0 }
 0x674   : > { %5197 = vmatpush.bf16.msrb.mxu3 %v6830_v60 }
 0x675   : > { %v4582_v5 = vpack.c.bf16 %v4470_v33, %v4469_v6  ;;  %v7327_v33 = vld [vmem:[%s10256_s23 + $0x160] sm:$0xf0] }
 0x676   : > { %5168 = vmatpush.bf16.msrb.mxu2 %v7018_v39  ;;  %v7328_v39 = vld [vmem:[%s10256_s23 + $0x16c] sm:$0xf] }
 0x677   : > { %5140 = vmatpush.bf16.msrb.mxu1 %v6910_v4  ;;  %v7325_v4 = vld [vmem:[%s10256_s23 + $0x154] sm:$0xf] }
 0x678   : > { %5198 = vmatpush.bf16.msrb.mxu3 %v6818_v22  ;;  %v6962_v18 = vor.u32 %v7325_v4, %v6959_v46  ;;  %v7316_v4 = vld [vmem:[%s10256_s23 + $0x10c] sm:$0xf]  ;;  %v6923_v46 = vld [vmem:[%s10256_s23 + $0x114] sm:$0xf0] }
 0x67a   : > { %6775 = vmatmul.msk.bf16.vlgmr.msra.gmra.mxu1 %vm2017_vm1, %v4579_v57  ;;  %6779 = vmatmul.msk.bf16.vlgmr.msra.gmra.mxu2 %vm2017_vm1, %v4579_v57 }
 0x67b   : > { %6783 = vmatmul.msk.bf16.vlgmr.msra.gmra.mxu3 %vm2017_vm1, %v4579_v57  ;;  %v6826_v57 = vor.u32 %v7293_v54, %v6825_v32  ;;  %5169 = vmatpush.bf16.msrb.mxu2 %v7006_v11  ;;  %v9432_v54 = vperm.slane %v4290_v47, 0  ;;  %v7324_v47 = vld [vmem:[%s10256_s23 + $0x148] sm:$0xf0] }
 0x67c   : > { %5199 = vmatpush.bf16.msrb.mxu3 %v6806_v48  ;;  %5141 = vmatpush.bf16.msrb.mxu1 %v6898_v26  ;;  %v6978_v48 = vor.u32 %v7330_v14, %v6977_v13  ;;  %v7070_v26 = vor.u32 %v7352_v36, %v7067_v42  ;;  %v7343_v36 = vld [vmem:[%s10256_s23 + $0x1e4] sm:$0xf]  ;;  %v7031_v42 = vld [vmem:[%s10256_s23 + $0x1ec] sm:$0xf0] }
 0x67d   : > { %5110 = vmatpush.bf16.msrb.mxu0 %v6826_v57 }
 0x67f   : > { %5170 = vmatpush.bf16.msrb.mxu2 %v6994_v17 }
 0x680   : > { %5200 = vmatpush.bf16.msrb.mxu3 %v6794_v24  ;;  %5142 = vmatpush.bf16.msrb.mxu1 %v6886_v56  ;;  %v6966_v24 = vor.u32 %v7327_v33, %v6965_v59  ;;  %v6926_v59 = vor.u32 %v7316_v4, %v6923_v46  ;;  %v7318_v33 = vld [vmem:[%s10256_s23 + $0x118] sm:$0xf0]  ;;  %v6887_v4 = vld [vmem:[%s10256_s23 + $0xcc] sm:$0xf0] }
 0x683   : > { %5171 = vmatpush.bf16.msrb.mxu2 %v6982_v50  ;;  %v6950_v50 = vor.u32 %v7322_v12, %v6947_v49 }
 0x684   : > { %5309 = vmatpush.bf16.msra.mxu3 %v6978_v48  ;;  %5251 = vmatpush.bf16.msra.mxu1 %v7070_v26  ;;  %v7300_v48 = vld [vmem:[%s10256_s23 + $0x88] sm:$0xf0] }
 0x688   : > { %5310 = vmatpush.bf16.msra.mxu3 %v6966_v24 }
 0x68a   : > { %6776 = vmatmul.msk.bf16.gmra.mxu1 %vm2017_vm1, %v4580_v19  ;;  %6780 = vmatmul.msk.bf16.gmra.mxu2 %vm2017_vm1, %v4580_v19 }
 0x68b   : > { %6784 = vmatmul.msk.bf16.gmra.mxu3 %vm2017_vm1, %v4580_v19  ;;  %v6814_v19 = vor.u32 %v7290_v43, %v6813_v62 }
 0x68d   : > { %5111 = vmatpush.bf16.msrb.mxu0 %v6814_v19 }
 0x691   : > { %5112 = vmatpush.bf16.msrb.mxu0 %v6802_v44  ;;  %v6974_v44 = vor.u32 %v7328_v39, %v6971_v28  ;;  %v7043_v39 = vld [vmem:[%s10256_s23 + $0x204] sm:$0xf0]  ;;  %v6857_v28 = vld [vmem:[%s10256_s23 + $0x80] sm:$0xf] }
 0x695   : > { %5113 = vmatpush.bf16.msrb.mxu0 %v6790_v7 }
 0x699   : > { %5222 = vmatpush.bf16.msra.mxu0 %v6974_v44 }
 0x69a   : > { %6777 = vmatmul.msk.bf16.gmra.mxu1 %vm2017_vm1, %v4581_v0  ;;  %6781 = vmatmul.msk.bf16.gmra.mxu2 %vm2017_vm1, %v4581_v0 }
 0x69b   : > { %6785 = vmatmul.msk.bf16.gmra.mxu3 %vm2017_vm1, %v4581_v0  ;;  %v4322_v0 = vld [vmem:[%s10252_s19] sm:$0x7] }
 0x69c   : > { %v9438_v23 = vperm.slane %v4322_v0, 0  ;;  %v9447_v35 = vperm.slane %v4322_v0, 1  ;;  %v9451_v15 = vperm.slane %v4322_v0, 2  ;;  %v7349_v0 = vld [vmem:[%s10256_s23 + $0x214] sm:$0xf] }
 0x69d   : > { %5223 = vmatpush.bf16.msra.mxu0 %v6962_v18 }
 0x6a1   : > { %5224 = vmatpush.bf16.msra.mxu0 %v6950_v50 }
 0x6aa   : > { %6778 = vmatmul.msk.bf16.gmra.mxu1 %vm2017_vm1, %v4582_v5  ;;  %6782 = vmatmul.msk.bf16.gmra.mxu2 %vm2017_vm1, %v4582_v5 }
 0x6ab   : > { %6786 = vmatmul.msk.bf16.gmra.mxu3 %vm2017_vm1, %v4582_v5  ;;  %v6882_v5 = vor.u32 %v7306_v25, %v6881_v10  ;;  %v6845_v10 = vld [vmem:[%s10256_s23 + $0x68] sm:$0xf]  ;;  %v7034_v25 = vor.u32 %v7343_v36, %v7031_v42  ;;  %v7334_v36 = vld [vmem:[%s10256_s23 + $0x19c] sm:$0xf] }
 0x6ac   : > { %v6995_v42 = vld [vmem:[%s10256_s23 + $0x1a4] sm:$0xf0] }
 0x6ad   : > { %5280 = vmatpush.bf16.msra.mxu2 %v6882_v5 }
 0x6b7   : > { %v4212_v32 = vpop.f32.mrf.mxu1 }
 0x6b8   : > { %v4298_v57 = vmul.f32 %v9432_v54, %v4212_v32  ;;  %v6954_v32 = vor.u32 %v7324_v47, %v6953_v1  ;;  %v7313_v1 = vld [vmem:[%s10256_s23 + $0xf4] sm:$0xf] }
 0x6ba   : > { %v4330_v9 = vadd.f32 %v9438_v23, %v4298_v57  ;;  %v7055_v57 = vld [vmem:[%s10256_s23 + $0x21c] sm:$0xf0]  ;;  %5311 = vmatpush.bf16.msra.mxu3 %v6954_v32  ;;  %v6917_v32 = vld [vmem:[%s10256_s23 + $0xf8] sm:$0xf] }
 0x6bc   : > { %v4354_v58 = vmax.f32 %v4330_v9, 0.0  ;;  %v7058_v9 = vor.u32 %v7349_v0, %v7055_v57  ;;  %v7315_v0 = vld [vmem:[%s10256_s23 + $0x100] sm:$0xf0] }
 0x6bd   : > { %v4241_v21 = vpop.f32.mrf.mxu2 }
 0x6be   : > { %v4270_v60 = vpop.f32.mrf.mxu3  ;;  %v4299_v40 = vmul.f32 %v9440_v41, %v4241_v21  ;;  %v6869_v21 = vld [vmem:[%s10256_s23 + $0x98] sm:$0xf]  ;;  %5252 = vmatpush.bf16.msra.mxu1 %v7058_v9 }
 0x6bf   : > { %v4214_v29 = vpop.f32.mrf.mxu1  ;;  %v4300_v43 = vmul.f32 %v9442_v20, %v4270_v60  ;;  %v7019_v9 = vld [vmem:[%s10256_s23 + $0x1d4] sm:$0xf0] }
 0x6c0   : > { %v4301_v16 = vmul.f32 %v9432_v54, %v4214_v29  ;;  %v4331_v22 = vadd.f32 %v9447_v35, %v4299_v40 }
 0x6c1   : > { %v4332_v51 = vadd.f32 %v9451_v15, %v4300_v43  ;;  %v7319_v43 = vld [vmem:[%s10256_s23 + $0x124] sm:$0xf] }
 0x6c2   : > { %v4333_v62 = vadd.f32 %v9438_v23, %v4301_v16  ;;  %v4355_v27 = vmax.f32 %v4331_v22, 0.0  ;;  %v7303_v16 = vld [vmem:[%s10256_s23 + $0xa0] sm:$0xf0] }
 0x6c3   : > { %v4356_v63 = vmax.f32 %v4332_v51, 0.0 }
 0x6c4   : > { %v4357_v19 = vmax.f32 %v4333_v62, 0.0  ;;  %v6870_v62 = vor.u32 %v7303_v16, %v6869_v21  ;;  %v6833_v16 = vld [vmem:[%s10256_s23 + $0x50] sm:$0xf] }
 0x6c5   : > { %v4243_v2 = vpop.f32.mrf.mxu2 }
 0x6c6   : > { %v9454_v34 = vpack.c.bf16 %v4357_v19, %v4354_v58  ;;  %v4302_v45 = vmul.f32 %v9440_v41, %v4243_v2  ;;  %v4272_v3 = vpop.f32.mrf.mxu3  ;;  %v6935_v58 = vld [vmem:[%s10256_s23 + $0x12c] sm:$0xf0]  ;;  %5281 = vmatpush.bf16.msra.mxu2 %v6870_v62 }
 0x6c7   : > { %v4303_v30 = vmul.f32 %v9442_v20, %v4272_v3  ;;  %v4217_v8 = vpop.f32.mrf.mxu1  ;;  %v6938_v22 = vor.u32 %v7319_v43, %v6935_v58  ;;  %v7321_v3 = vld [vmem:[%s10256_s23 + $0x130] sm:$0xf0]  ;;  %v7294_v43 = vld [vmem:[%s10256_s23 + $0x58] sm:$0xf0] }
 0x6c8   : > { %v4334_v38 = vadd.f32 %v9447_v35, %v4302_v45  ;;  %5114 = vmatmul.bf16.vlgmr.msrb.gmra.mxu0 %v9454_v34  ;;  %5201 = vmatmul.bf16.vlgmr.msrb.gmra.mxu3 %v9454_v34  ;;  %v4304_v37 = vmul.f32 %v9432_v54, %v4217_v8  ;;  %v6941_v45 = vld [vmem:[%s10256_s23 + $0x128] sm:$0xf]  ;;  %v7346_v8 = vld [vmem:[%s10256_s23 + $0x1fc] sm:$0xf] }
 0x6c9   : > { %v4335_v31 = vadd.f32 %v9451_v15, %v4303_v30  ;;  %v6942_v30 = vor.u32 %v7321_v3, %v6941_v45  ;;  %5225 = vmatpush.bf16.msra.mxu0 %v6938_v22  ;;  %v6899_v22 = vld [vmem:[%s10256_s23 + $0xe4] sm:$0xf0]  ;;  %v6905_v45 = vld [vmem:[%s10256_s23 + $0xe0] sm:$0xf] }
 0x6ca   : > { %v4358_v61 = vmax.f32 %v4334_v38, 0.0  ;;  %v4336_v56 = vadd.f32 %v9438_v23, %v4304_v37  ;;  %v6929_v37 = vld [vmem:[%s10256_s23 + $0x110] sm:$0xf] }
 0x6cb   : > { %v4359_v55 = vmax.f32 %v4335_v31, 0.0  ;;  %v7046_v31 = vor.u32 %v7346_v8, %v7043_v39  ;;  %5312 = vmatpush.bf16.msra.mxu3 %v6942_v30  ;;  %v6930_v24 = vor.u32 %v7318_v33, %v6929_v37  ;;  %v7312_v8 = vld [vmem:[%s10256_s23 + $0xe8] sm:$0xf0]  ;;  %v7337_v39 = vld [vmem:[%s10256_s23 + $0x1b4] sm:$0xf] }
 0x6cc   : > { %v9481_v11 = vpack.c.bf16 %v4358_v61, %v4355_v27  ;;  %v4360_v19 = vmax.f32 %v4336_v56, 0.0  ;;  %v6911_v56 = vld [vmem:[%s10256_s23 + $0xfc] sm:$0xf0]  ;;  %v7309_v33 = vld [vmem:[%s10256_s23 + $0xd0] sm:$0xf0] }
 0x6cd   : > { %v9490_v7 = vpack.c.bf16 %v4359_v55, %v4356_v63  ;;  %v4246_v53 = vpop.f32.mrf.mxu2  ;;  %v6858_v55 = vor.u32 %v7300_v48, %v6857_v28  ;;  %5253 = vmatpush.bf16.msra.mxu1 %v7046_v31  ;;  %5226 = vmatpush.bf16.msra.mxu0 %v6926_v59  ;;  %v6914_v47 = vor.u32 %v7313_v1, %v6911_v56  ;;  %v7007_v28 = vld [vmem:[%s10256_s23 + $0x1bc] sm:$0xf0]  ;;  %v7291_v31 = vld [vmem:[%s10256_s23 + $0x40] sm:$0xf0]  ;;  %v6893_v59 = vld [vmem:[%s10256_s23 + $0xc8] sm:$0xf] }
 0x6ce   : > { %v4275_v6 = vpop.f32.mrf.mxu3  ;;  %5143 = vmatmul.bf16.vlgmr.msrb.gmra.mxu1 %v9481_v11  ;;  %v4305_v60 = vmul.f32 %v9440_v41, %v4246_v53 }
 0x6cf   : > { %5172 = vmatmul.bf16.vlgmr.msrb.gmra.mxu2 %v9490_v7  ;;  %v4219_v17 = vpop.f32.mrf.mxu1  ;;  %v4306_v40 = vmul.f32 %v9442_v20, %v4275_v6  ;;  %5313 = vmatpush.bf16.msra.mxu3 %v6930_v24  ;;  %v6894_v24 = vor.u32 %v7309_v33, %v6893_v59 }
 0x6d0   : > { %v4307_v52 = vmul.f32 %v9432_v54, %v4219_v17  ;;  %v4337_v13 = vadd.f32 %v9447_v35, %v4305_v60  ;;  %5282 = vmatpush.bf16.msra.mxu2 %v6858_v55  ;;  %v7297_v17 = vld [vmem:[%s10256_s23 + $0x70] sm:$0xf0]  ;;  %v6918_v60 = vor.u32 %v7315_v0, %v6917_v32  ;;  %v7307_v55 = vld [vmem:[%s10256_s23 + $0xc4] sm:$0xf]  ;;  %v6983_v0 = vld [vmem:[%s10256_s23 + $0x18c] sm:$0xf0] }
 0x6d1   : > { %v4338_v27 = vadd.f32 %v9451_v15, %v4306_v40  ;;  %v6846_v49 = vor.u32 %v7297_v17, %v6845_v10  ;;  %5254 = vmatpush.bf16.msra.mxu1 %v7034_v25  ;;  %5227 = vmatpush.bf16.msra.mxu0 %v6914_v47  ;;  %v6809_v10 = vld [vmem:[%s10256_s23 + $0x20] sm:$0xf]  ;;  %v7331_v32 = vld [vmem:[%s10256_s23 + $0x184] sm:$0xf] }
 0x6d2   : > { %v4339_v29 = vadd.f32 %v9438_v23, %v4307_v52  ;;  %v4361_v6 = vmax.f32 %v4337_v13, 0.0  ;;  %v6906_v13 = vor.u32 %v7312_v8, %v6905_v45 }
 0x6d3   : > { %v4362_v5 = vmax.f32 %v4338_v27, 0.0  ;;  %5314 = vmatpush.bf16.msra.mxu3 %v6918_v60 }
 0x6d4   : > { %v4363_v2 = vmax.f32 %v4339_v29, 0.0  ;;  %5283 = vmatpush.bf16.msra.mxu2 %v6846_v49  ;;  %v7340_v29 = vld [vmem:[%s10256_s23 + $0x1cc] sm:$0xf] }
 0x6d5   : > { %v4248_v51 = vpop.f32.mrf.mxu2  ;;  %v7022_v62 = vor.u32 %v7340_v29, %v7019_v9  ;;  %v6986_v29 = vor.u32 %v7331_v32, %v6983_v0  ;;  %v7285_v9 = vld [vmem:[%s10256_s23 + $0x10] sm:$0xf0]  ;;  %v7025_v32 = vld [vmem:[%s10256_s23 + $0x1d0] sm:$0xf]  ;;  %v7342_v0 = vld [vmem:[%s10256_s23 + $0x1d8] sm:$0xf0] }
 0x6d6   : > { %v4308_v38 = vmul.f32 %v9440_v41, %v4248_v51  ;;  %v4277_v44 = vpop.f32.mrf.mxu3  ;;  %v9558_v14 = vpack.c.bf16 %v4363_v2, %v4360_v19  ;;  %v6834_v19 = vor.u32 %v7294_v43, %v6833_v16  ;;  %v7310_v2 = vld [vmem:[%s10256_s23 + $0xdc] sm:$0xf] }
 0x6d7   : > { %v4309_v61 = vmul.f32 %v9442_v20, %v4277_v44  ;;  %v4222_v63 = vpop.f32.mrf.mxu1  ;;  %v6902_v30 = vor.u32 %v7310_v2, %v6899_v22  ;;  %5255 = vmatpush.bf16.msra.mxu1 %v7022_v62  ;;  %v6821_v44 = vld [vmem:[%s10256_s23 + $0x38] sm:$0xf]  ;;  %5315 = vmatpush.bf16.msra.mxu3 %v6906_v13 }
 0x6d8   : > { %v4340_v18 = vadd.f32 %v9447_v35, %v4308_v38  ;;  %5119 = vmatmul.bf16.gmra.mxu0 %v9558_v14  ;;  %5206 = vmatmul.bf16.gmra.mxu3 %v9558_v14  ;;  %v4310_v52 = vmul.f32 %v9432_v54, %v4222_v63  ;;  %v7010_v38 = vor.u32 %v7337_v39, %v7007_v28 }
 0x6d9   : > { %v4341_v53 = vadd.f32 %v9451_v15, %v4309_v61  ;;  %5284 = vmatpush.bf16.msra.mxu2 %v6834_v19  ;;  %5228 = vmatpush.bf16.msra.mxu0 %v6902_v30  ;;  %v6822_v61 = vor.u32 %v7291_v31, %v6821_v44 }
 0x6da   : > { %v4364_v26 = vmax.f32 %v4340_v18, 0.0  ;;  %v4342_v3 = vadd.f32 %v9438_v23, %v4310_v52  ;;  %v6890_v18 = vor.u32 %v7307_v55, %v6887_v4 }
 0x6db   : > { %v4365_v12 = vmax.f32 %v4341_v53, 0.0  ;;  %5256 = vmatpush.bf16.msra.mxu1 %v7010_v38  ;;  %5316 = vmatpush.bf16.msra.mxu3 %v6894_v24 }
 0x6dc   : > { %v9600_v50 = vpack.c.bf16 %v4364_v26, %v4361_v6  ;;  %v4366_v46 = vmax.f32 %v4342_v3, 0.0 }
 0x6dd   : > { %v4251_v57 = vpop.f32.mrf.mxu2  ;;  %v9608_v21 = vpack.c.bf16 %v4365_v12, %v4362_v5  ;;  %5285 = vmatpush.bf16.msra.mxu2 %v6822_v61  ;;  %5229 = vmatpush.bf16.msra.mxu0 %v6890_v18  ;;  %v6998_v5 = vor.u32 %v7334_v36, %v6995_v42  ;;  %v7288_v12 = vld [vmem:[%s10256_s23 + $0x28] sm:$0xf0]  ;;  %v7073_v36 = vld [vmem:[%s10256_s23 + $0x230] sm:$0xf]  ;;  %v7354_v42 = vld [vmem:[%s10256_s23 + $0x238] sm:$0xf0] }
 0x6de   : > { %v4280_v40 = vpop.f32.mrf.mxu3  ;;  %5148 = vmatmul.bf16.gmra.mxu1 %v9600_v50  ;;  %v4311_v48 = vmul.f32 %v9440_v41, %v4251_v57  ;;  %v6810_v52 = vor.u32 %v7288_v12, %v6809_v10  ;;  %v6797_v57 = vld [vmem:[%s10256_s23 + $0x8] sm:$0xf]  ;;  %v7074_v10 = vor.u32 %v7354_v42, %v7073_v36  ;;  %v7348_v12 = vld [vmem:[%s10256_s23 + $0x208] sm:$0xf0] }
 0x6df   : > { %5177 = vmatmul.bf16.gmra.mxu2 %v9608_v21  ;;  %v4224_v58 = vpop.f32.mrf.mxu1  ;;  %v4312_v63 = vmul.f32 %v9442_v20, %v4280_v40  ;;  %5257 = vmatpush.bf16.msra.mxu1 %v6998_v5  ;;  %v6798_v62 = vor.u32 %v7285_v9, %v6797_v57  ;;  %v7339_v9 = vld [vmem:[%s10256_s23 + $0x1c0] sm:$0xf0] }
 0x6e0   : > { %v4313_v51 = vmul.f32 %v9432_v54, %v4224_v58  ;;  %v4343_v6 = vadd.f32 %v9447_v35, %v4311_v48 }
 0x6e1   : > { %v4344_v49 = vadd.f32 %v9451_v15, %v4312_v63  ;;  %5286 = vmatpush.bf16.msra.mxu2 %v6810_v52  ;;  %5338 = vmatpush.bf16.msrb.mxu0 %v7074_v10  ;;  %v7037_v52 = vld [vmem:[%s10256_s23 + $0x1e8] sm:$0xf] }
 0x6e2   : > { %v4345_v27 = vadd.f32 %v9438_v23, %v4313_v51  ;;  %v4367_v16 = vmax.f32 %v4343_v6, 0.0  ;;  %v7061_v6 = vld [vmem:[%s10256_s23 + $0x218] sm:$0xf]  ;;  %v10487_v10 = vld [vmem:[#allocation45_spill] sm:$0xff] }
 0x6e3   : > { %v4368_v43 = vmax.f32 %v4344_v49, 0.0  ;;  %5258 = vmatpush.bf16.msra.mxu1 %v6986_v29  ;;  %v7013_v29 = vld [vmem:[%s10256_s23 + $0x1b8] sm:$0xf] }
 0x6e4   : > { %v4369_v37 = vmax.f32 %v4345_v27, 0.0 }
 0x6e5   : > { %v4253_v53 = vpop.f32.mrf.mxu2  ;;  %5287 = vmatpush.bf16.msra.mxu2 %v6798_v62 }
 0x6e6   : > { %v4314_v26 = vmul.f32 %v9440_v41, %v4253_v53  ;;  %v4282_v25 = vpop.f32.mrf.mxu3  ;;  %v9676_v17 = vpack.c.bf16 %v4369_v37, %v4366_v46 }
 0x6e7   : > { %v4315_v1 = vmul.f32 %v9442_v20, %v4282_v25  ;;  %v4227_v56 = vpop.f32.mrf.mxu1 }
 0x6e8   : > { %v4346_v47 = vadd.f32 %v9447_v35, %v4314_v26  ;;  %5124 = vmatmul.bf16.gmra.mxu0 %v9676_v17  ;;  %5211 = vmatmul.bf16.gmra.mxu3 %v9676_v17  ;;  %v4316_v19 = vmul.f32 %v9432_v54, %v4227_v56  ;;  %v7351_v26 = vld [vmem:[%s10256_s23 + $0x220] sm:$0xf0] }
 0x6e9   : > { %v4347_v60 = vadd.f32 %v9451_v15, %v4315_v1  ;;  %v7062_v25 = vor.u32 %v7351_v26, %v7061_v6  ;;  %v10488_v6 = vld [vmem:[#allocation46_spill] sm:$0xff] }
 0x6ea   : > { %v4370_v40 = vmax.f32 %v4346_v47, 0.0  ;;  %v4348_v30 = vadd.f32 %v9438_v23, %v4316_v19  ;;  %v1766_v26 = vadd.f32 %v10488_v6, %v10487_v10 }
 0x6eb   : > { %v4371_v58 = vmax.f32 %v4347_v60, 0.0  ;;  %5339 = vmatpush.bf16.msrb.mxu0 %v7062_v25  ;;  %v7026_v60 = vor.u32 %v7342_v0, %v7025_v32  ;;  %v9862_v25 = vld [vmem:[%s10489_s6] ss:$0 sm:$0xff]  ;;  %s7369_s6 = smul.u32 192, %s7657_s3  ;;  %s7445_s3 = scalar_lea.hbm %s10261_s28, 384 }
 0x6ec   : > { %v9700_v2 = vpack.c.bf16 %v4370_v40, %v4367_v16  ;;  %v4372_v38 = vmax.f32 %v4348_v30, 0.0  ;;  %v7014_v16 = vor.u32 %v7339_v9, %v7013_v29  ;;  %v9878_v32 = vld [vmem:[%s10492_s7] ss:$0 sm:$0xff] }
 0x6ed   : > { %v4256_v22 = vpop.f32.mrf.mxu2  ;;  %v9702_v45 = vpack.c.bf16 %v4371_v58, %v4368_v43  ;;  %v7091_v43 = vld [vmem:[%s10258_s25 + $0x24] sm:$0xf0]  ;;  %v7097_v58 = vld [vmem:[%s10258_s25 + $0x20] sm:$0xf]  ;;  %s5707_s2 = scalar_lea.hbm %s10261_s28, %s7369_s6 }
 0x6ee   : > { %v4285_v3 = vpop.f32.mrf.mxu3  ;;  %5153 = vmatmul.bf16.gmra.mxu1 %v9700_v2  ;;  %v4317_v39 = vmul.f32 %v9440_v41, %v4256_v22  ;;  %v7366_v22 = vld [vmem:[%s10258_s25 + $0x28] sm:$0xf0]  ;;  %s5710_s9 = sshll.u32 %s5707_s2, 4  ;;  %s5711_s9 = int_to_ptr.hbm [resolvable:$true] %s5710_s9 }
 0x6ef   : > { %5182 = vmatmul.bf16.gmra.mxu2 %v9702_v45  ;;  %v4229_v51 = vpop.f32.mrf.mxu1  ;;  %v4318_v13 = vmul.f32 %v9442_v20, %v4285_v3  ;;  %v7336_v3 = vld [vmem:[%s10256_s23 + $0x1a8] sm:$0xf0]  ;;  %s7439_s30 = sshra.s32 %s5711_s9, 4  ;;  %s7440_s30 = int_to_ptr.hbm [resolvable:$true] %s7439_s30 }
 0x6f0   : > { %v4319_v8 = vmul.f32 %v9432_v54, %v4229_v51  ;;  %v4349_v48 = vadd.f32 %v9447_v35, %v4317_v39  ;;  %v7098_v51 = vor.u32 %v7366_v22, %v7097_v58  ;;  %v6989_v39 = vld [vmem:[%s10256_s23 + $0x188] sm:$0xf]  ;;  %s7441_s11 = scalar_lea.hbm %s7440_s30, 192  ;;  %p7446_p0 = scmp.lt.s32.totalorder %s7440_s30, %s10261_s28 }
 0x6f1   : > { %v4350_v55 = vadd.f32 %v9451_v15, %v4318_v13  ;;  %v7085_v13 = vld [vmem:[%s10258_s25 + $0x8] sm:$0xf]  ;;  %p7442_p11 = scmp.ne.s32.totalorder %s7440_s30, %s7441_s11  ;;  %p7447_p1 = scmp.lt.s32.totalorder %s7445_s3, %s7441_s11 }
 0x6f2   : > { %v4351_v28 = vadd.f32 %v9438_v23, %v4319_v8  ;;  %v4373_v46 = vmax.f32 %v4349_v48, 0.0  ;;  %5487 = vmatpush.bf16.msrb.mxu3 %v7098_v51  ;;  %v10495_v51 = vld [vmem:[#allocation56_spill] sm:$0xff] }
 0x6f3   : > { %v4374_v18 = vmax.f32 %v4350_v55, 0.0  ;;  %p7443_p12 = pnand %p7442_p11, %p7674_p5  ;;  %p7448_p2 = por %p7447_p1, %p7446_p0 }
 0x6f4   : > { %v4375_v44 = vmax.f32 %v4351_v28, 0.0  ;;  %v7333_v28 = vld [vmem:[%s10256_s23 + $0x190] sm:$0xf0] }
 0x6f5   : > { %v4258_v31 = vpop.f32.mrf.mxu2  ;;  %p7444_p13 = pneg %p7443_p12 }
 0x6f6   : > { %v4320_v27 = vmul.f32 %v9440_v41, %v4258_v31  ;;  %v4287_v61 = vpop.f32.mrf.mxu3  ;;  %v9713_v63 = vpack.c.bf16 %v4375_v44, %v4372_v38  ;;  %v6990_v38 = vor.u32 %v7333_v28, %v6989_v39  ;;  %v7363_v44 = vld [vmem:[%s10258_s25 + $0x10] sm:$0xf0] }
 0x6f7   : > { %v4321_v54 = vmul.f32 %v9442_v20, %v4287_v61  ;;  %v9723_v33 = vpop.f32.mrf.mxu1  ;;  %v7365_v61 = vld [vmem:[%s10258_s25 + $0x20] sm:$0xf0]  ;;  %v7086_v55 = vor.u32 %v7363_v44, %v7085_v13  ;;  %p7449_p3 = pnand %p7448_p2, %p7444_p13 }
 0x6f8   : > { %v4352_v4 = vadd.f32 %v9447_v35, %v4320_v27  ;;  %5129 = vmatmul.bf16.gmra.mxu0 %v9713_v63  ;;  %5216 = vmatmul.bf16.gmra.mxu3 %v9713_v63  ;;  %v7089_v27 = vld [vmem:[%s10258_s25 + $0x18] sm:$0xf] }
 0x6f9   : > { %v4353_v23 = vadd.f32 %v9451_v15, %v4321_v54  ;;  %v7090_v54 = vor.u32 %v7365_v61, %v7089_v27  ;;  %5488 = vmatpush.bf16.msrb.mxu3 %v7086_v55 }
 0x6fa   : > { %v4376_v37 = vmax.f32 %v4352_v4, 0.0  ;;  %v7077_v4 = vld [vmem:[%s10258_s25] sm:$0xf] }
 0x6fb   : > { %v4377_v59 = vmax.f32 %v4353_v23, 0.0  ;;  %5429 = vmatpush.bf16.msrb.mxu1 %v7090_v54  ;;  %v7362_v23 = vld [vmem:[%s10258_s25 + $0x8] sm:$0xf0] }
 0x6fc   : > { %v9721_v41 = vpack.c.bf16 %v4376_v37, %v4373_v46  ;;  %v7361_v46 = vld [vmem:[%s10258_s25 + $0x4] sm:$0xf]  ;;  %v7078_v37 = vor.u32 %v7362_v23, %v7077_v4 }
 0x6fd   : > { %v9725_v53 = vpack.c.bf16 %v4377_v59, %v4374_v18  ;;  %v9731_v20 = vpop.f32.mrf.mxu2  ;;  %v7079_v18 = vld [vmem:[%s10258_s25 + $0xc] sm:$0xf0] }
 0x6fe   : > { %v9727_v24 = vpop.f32.mrf.mxu3  ;;  %5158 = vmatmul.bf16.gmra.mxu1 %v9721_v41  ;;  %v7082_v59 = vor.u32 %v7361_v46, %v7079_v18  ;;  %v10497_v46 = vld [vmem:[#allocation57_spill] sm:$0xff] }
 0x6ff   : > { %5187 = vmatmul.bf16.gmra.mxu2 %v9725_v53  ;;  %v9733_v35 = vpop.f32.mrf.mxu1  ;;  %5430 = vmatpush.bf16.msrb.mxu1 %v7078_v37  ;;  %v10498_v37 = vld [vmem:[#allocation58_spill] sm:$0xff] }
 0x700   : > { %v1776_v18 = vadd.f32 %v10498_v37, %v10497_v46 }
 0x705   : > { %v9751_v5 = vpop.f32.mrf.mxu2 }
 0x706   : > { %v9735_v15 = vpop.f32.mrf.mxu3 }
 0x707   : > { %v9761_v1 = vpop.f32.mrf.mxu1 }
 0x708   : > { %5230 = vmatmul.bf16.vlgmr.msra.gmra.mxu0 %v9481_v11  ;;  %5317 = vmatmul.bf16.vlgmr.msra.gmra.mxu3 %v9481_v11  ;;  %v7049_v11 = vld [vmem:[%s10256_s23 + $0x200] sm:$0xf] }
 0x709   : > { %v7050_v49 = vor.u32 %v7348_v12, %v7049_v11  ;;  %v10490_v11 = vld [vmem:[#allocation50_spill] sm:$0xff] }
 0x70a   : > { %v1795_v12 = vadd.f32 %v10490_v11, %v1766_v26 }
 0x70b   : > { %5340 = vmatpush.bf16.msrb.mxu0 %v7050_v49 }
 0x70c   : > { %v1817_v0 = vmul.f32 %v9862_v25, %v1795_v12 }
 0x70d   : > { %v9777_v57 = vpop.f32.mrf.mxu2 }
 0x70e   : > { %5259 = vmatmul.bf16.vlgmr.msra.gmra.mxu1 %v9490_v7  ;;  %v9763_v56 = vpop.f32.mrf.mxu3  ;;  %v1829_v29 = vadd.f32 %v9878_v32, %v1817_v0 }
 0x70f   : > { %5288 = vmatmul.bf16.vlgmr.msra.gmra.mxu2 %v9454_v34  ;;  %v7345_v34 = vld [vmem:[%s10256_s23 + $0x1f0] sm:$0xf0]  ;;  %v9787_v40 = vpop.f32.mrf.mxu1 }
 0x710   : > { %v7038_v47 = vor.u32 %v7345_v34, %v7037_v52 }
 0x712   : > { %5341 = vmatpush.bf16.msrb.mxu0 %v7038_v47 }
 0x715   : > { %v9811_v8 = vpop.f32.mrf.mxu2 }
 0x716   : > { %5342 = vmatpush.bf16.msrb.mxu0 %v7026_v60  ;;  %v9789_v62 = vpop.f32.mrf.mxu3 }
 0x717   : > { %v9825_v31 = vpop.f32.mrf.mxu1 }
 0x718   : > { %5235 = vmatmul.bf16.gmra.mxu0 %v9600_v50  ;;  %5322 = vmatmul.bf16.gmra.mxu3 %v9600_v50  ;;  %v7364_v50 = vld [vmem:[%s10258_s25 + $0x1c] sm:$0xf] }
 0x719   : > { %v7094_v19 = vor.u32 %v7364_v50, %v7091_v43  ;;  %v10493_v50 = vld [vmem:[#allocation51_spill] sm:$0xff]  ;;  %v10494_v43 = vld [vmem:[#allocation52_spill] sm:$0xff] }
 0x71a   : > { %5343 = vmatpush.bf16.msrb.mxu0 %v7014_v16  ;;  %v1837_v16 = vmax.f32 %v1829_v29, 0.0  ;;  %v1771_v58 = vadd.f32 %v10494_v43, %v10493_v50 }
 0x71b   : > { %5458 = vmatpush.bf16.msrb.mxu2 %v7094_v19 }
 0x71e   : > { %5264 = vmatmul.bf16.gmra.mxu1 %v9608_v21  ;;  %v9827_v48 = vpop.f32.mrf.mxu3 }
 0x71f   : > { %5293 = vmatmul.bf16.gmra.mxu2 %v9558_v14  ;;  %v7001_v14 = vld [vmem:[%s10256_s23 + $0x1a0] sm:$0xf]  ;;  %v9852_v36 = vpop.f32.mrf.mxu1 }
 0x720   : > { %v7002_v30 = vor.u32 %v7336_v3, %v7001_v14  ;;  %5459 = vmatpush.bf16.msrb.mxu2 %v7082_v59 }
 0x722   : > { %5344 = vmatpush.bf16.msrb.mxu0 %v7002_v30  ;;  %v1800_v30 = vadd.f32 %v10495_v51, %v1771_v58 }
 0x724   : > { %v1819_v28 = vmul.f32 %v9862_v25, %v1800_v30 }
 0x726   : > { %5345 = vmatpush.bf16.msrb.mxu0 %v6990_v38  ;;  %v9854_v42 = vpop.f32.mrf.mxu3 }
 0x727   : > { %v9869_v52 = vpop.f32.mrf.mxu1 }
 0x728   : > { %5240 = vmatmul.bf16.gmra.mxu0 %v9700_v2  ;;  %5327 = vmatmul.bf16.gmra.mxu3 %v9700_v2  ;;  %v9849_v2 = vpop.f32.mrf.mxu2 }
 0x72e   : > { %5269 = vmatmul.bf16.gmra.mxu1 %v9702_v45  ;;  %v9871_v34 = vpop.f32.mrf.mxu3 }
 0x72f   : > { %5298 = vmatmul.bf16.gmra.mxu2 %v9676_v17  ;;  %v10491_v17 = vld [vmem:[#allocation48_spill] sm:$0xff]  ;;  %v9889_v19 = vpop.f32.mrf.mxu1 }
 0x730   : > { %v9865_v49 = vpop.f32.mrf.mxu2  ;;  %v1816_v47 = vmul.f32 %v9862_v25, %v10491_v17  ;;  %v10499_v17 = vld [vmem:[#allocation62_spill] sm:$0xff] }
 0x732   : > { %v1828_v60 = vadd.f32 %v9878_v32, %v1816_v47  ;;  %v1805_v47 = vadd.f32 %v10499_v17, %v1776_v18  ;;  %v10504_v18 = vld [vmem:[#allocation63_spill] sm:$0xff] }
 0x734   : > { %v1836_v9 = vmax.f32 %v1828_v60, 0.0  ;;  %v10500_v60 = vld [vmem:[#allocation60_spill] sm:$0xff] }
 0x735   : > { %v1820_v29 = vmul.f32 %v9862_v25, %v10500_v60 }
 0x736   : > { %v9891_v22 = vpop.f32.mrf.mxu3  ;;  %v5367_v3 = vpack.c.bf16 %v1837_v16, %v1836_v9 }
 0x737   : > { %v1832_v51 = vadd.f32 %v9878_v32, %v1820_v29 }
 0x738   : > { %5245 = vmatmul.bf16.gmra.mxu0 %v9721_v41  ;;  %5332 = vmatmul.bf16.gmra.mxu3 %v9721_v41  ;;  %v9885_v41 = vpop.f32.mrf.mxu2 }
 0x739   : > { %v1840_v30 = vmax.f32 %v1832_v51, 0.0 }
 0x73e   : > { %5274 = vmatmul.bf16.gmra.mxu1 %v9725_v53 }
 0x73f   : > { %5303 = vmatmul.bf16.gmra.mxu2 %v9713_v63  ;;  %v10496_v63 = vld [vmem:[#allocation54_spill] sm:$0xff] }
 0x740   : > { %v1818_v39 = vmul.f32 %v9862_v25, %v10496_v63  ;;  %v9899_v13 = vpop.f32.mrf.mxu2 }
 0x742   : > { %v1830_v54 = vadd.f32 %v9878_v32, %v1818_v39  ;;  %v10501_v39 = vld [vmem:[#allocation65_spill] sm:$0xff] }
 0x744   : > { %v1838_v4 = vmax.f32 %v1830_v54, 0.0 }
 0x745   : > { %v5115_v14 = vpop.f32.mrf.mxu0 }
 0x746   : > { %v5116_v38 = vadd.f32 %v5115_v14, %v9723_v33 }
 0x748   : > { %5346 = vmatmul.bf16.vlgmr.msrb.gmra.mxu0 %v9490_v7  ;;  %7107 = vmatmul.msk.bf16.vlgmr.msrb.gmra.mxu3 %vm2017_vm1, %v5367_v3  ;;  %v1831_v7 = vadd.f32 %v9878_v32, %v1819_v28 }
 0x74a   : > { %v1839_v23 = vmax.f32 %v1831_v7, 0.0 }
 0x74b   : > { %v5144_v44 = vpop.f32.mrf.mxu1  ;;  %v9902_v27 = vpop.f32.mrf.mxu3 }
 0x74c   : > { %v5145_v61 = vadd.f32 %v5144_v44, %v5116_v38  ;;  %v5368_v0 = vpack.c.bf16 %v1839_v23, %v1838_v4  ;;  %v10503_v23 = vld [vmem:[#allocation68_spill] sm:$0xff] }
 0x74d   : > { %v5117_v55 = vpop.f32.mrf.mxu0 }
 0x74e   : > { %7099 = vmatmul.msk.bf16.vlgmr.msrb.gmra.mxu1 %vm2017_vm1, %v5367_v3  ;;  %v5118_v33 = vadd.f32 %v5117_v55, %v9733_v35  ;;  %v1821_v35 = vmul.f32 %v9862_v25, %v1805_v47 }
 0x74f   : > { %7103 = vmatmul.msk.bf16.vlgmr.msrb.gmra.mxu2 %vm2017_vm1, %v5367_v3 }
 0x752   : > { %v5173_v59 = vpop.f32.mrf.mxu2 }
 0x753   : > { %v9911_v10 = vadd.f32 %v5173_v59, %v5145_v61  ;;  %v5146_v6 = vpop.f32.mrf.mxu1  ;;  %v9913_v26 = vpop.f32.mrf.mxu3 }
 0x754   : > { %v5147_v11 = vadd.f32 %v5146_v6, %v5118_v33  ;;  %v1822_v33 = vmul.f32 %v9862_v25, %v10504_v18 }
 0x755   : > { %v5120_v12 = vpop.f32.mrf.mxu0 }
 0x756   : > { %v5121_v9 = vadd.f32 %v5120_v12, %v9761_v1  ;;  %v10502_v1 = vld [vmem:[#allocation70_spill] sm:$0xff]  ;;  %v1834_v60 = vadd.f32 %v9878_v32, %v1822_v33 }
 0x757   : > { %v1781_v28 = vadd.f32 %v10502_v1, %v10501_v39 }
 0x758   : > { %5351 = vmatmul.bf16.gmra.mxu0 %v9608_v21  ;;  %7108 = vmatmul.msk.bf16.gmra.mxu3 %vm2017_vm1, %v5368_v0  ;;  %v1833_v21 = vadd.f32 %v9878_v32, %v1821_v35  ;;  %v1842_v29 = vmax.f32 %v1834_v60, 0.0 }
 0x759   : > { %v1810_v46 = vadd.f32 %v10503_v23, %v1781_v28 }
 0x75a   : > { %v5175_v16 = vpop.f32.mrf.mxu2  ;;  %v1841_v63 = vmax.f32 %v1833_v21, 0.0 }
 0x75b   : > { %v9922_v50 = vadd.f32 %v5175_v16, %v5147_v11  ;;  %v5149_v43 = vpop.f32.mrf.mxu1  ;;  %v9924_v58 = vpop.f32.mrf.mxu3 }
 0x75c   : > { %v5150_v14 = vadd.f32 %v5149_v43, %v5121_v9  ;;  %v5369_v37 = vpack.c.bf16 %v1841_v63, %v1840_v30 }
 0x75d   : > { %v5122_v3 = vpop.f32.mrf.mxu0 }
 0x75e   : > { %7100 = vmatmul.msk.bf16.gmra.mxu1 %vm2017_vm1, %v5368_v0  ;;  %v5123_v38 = vadd.f32 %v5122_v3, %v9787_v40  ;;  %v1823_v40 = vmul.f32 %v9862_v25, %v1810_v46 }
 0x75f   : > { %7104 = vmatmul.msk.bf16.gmra.mxu2 %vm2017_vm1, %v5368_v0 }
 0x762   : > { %v5178_v44 = vpop.f32.mrf.mxu2 }
 0x763   : > { %v9933_v61 = vadd.f32 %v5178_v44, %v5150_v14  ;;  %v5151_v55 = vpop.f32.mrf.mxu1  ;;  %v9935_v54 = vpop.f32.mrf.mxu3 }
 0x764   : > { %v5152_v7 = vadd.f32 %v5151_v55, %v5123_v38 }
 0x765   : > { %v5125_v4 = vpop.f32.mrf.mxu0 }
 0x766   : > { %v5126_v59 = vadd.f32 %v5125_v4, %v9825_v31 }
 0x768   : > { %5356 = vmatmul.bf16.gmra.mxu0 %v9702_v45  ;;  %7109 = vmatmul.msk.bf16.gmra.mxu3 %vm2017_vm1, %v5369_v37  ;;  %v1835_v45 = vadd.f32 %v9878_v32, %v1823_v40  ;;  %v5205_v40 = vadd.f32 %v9913_v26, %v9751_v5  ;;  %v5210_v5 = vadd.f32 %v9935_v54, %v9811_v8 }
 0x76a   : > { %v5180_v6 = vpop.f32.mrf.mxu2  ;;  %v1843_v25 = vmax.f32 %v1835_v45, 0.0 }
 0x76b   : > { %v9944_v11 = vadd.f32 %v5180_v6, %v5152_v7  ;;  %v5154_v12 = vpop.f32.mrf.mxu1  ;;  %v9946_v17 = vpop.f32.mrf.mxu3 }
 0x76c   : > { %v5155_v47 = vadd.f32 %v5154_v12, %v5126_v59  ;;  %v5370_v51 = vpack.c.bf16 %v1843_v25, %v1842_v29 }
 0x76d   : > { %v5127_v0 = vpop.f32.mrf.mxu0 }
 0x76e   : > { %7101 = vmatmul.msk.bf16.gmra.mxu1 %vm2017_vm1, %v5369_v37  ;;  %v5128_v31 = vadd.f32 %v5127_v0, %v9852_v36 }
 0x76f   : > { %7105 = vmatmul.msk.bf16.gmra.mxu2 %vm2017_vm1, %v5369_v37 }
 0x772   : > { %v5183_v35 = vpop.f32.mrf.mxu2 }
 0x773   : > { %v9953_v9 = vadd.f32 %v5183_v35, %v5155_v47  ;;  %v5156_v16 = vpop.f32.mrf.mxu1  ;;  %v5214_v43 = vpop.f32.mrf.mxu3 }
 0x774   : > { %v5157_v14 = vadd.f32 %v5156_v16, %v5128_v31  ;;  %v5215_v8 = vadd.f32 %v5214_v43, %v9865_v49 }
 0x775   : > { %v5130_v3 = vpop.f32.mrf.mxu0 }
 0x776   : > { %v5131_v32 = vadd.f32 %v5130_v3, %v9869_v52  ;;  %v5203_v52 = vadd.f32 %v9902_v27, %v9731_v20 }
 0x778   : > { %5361 = vmatmul.bf16.gmra.mxu0 %v9725_v53  ;;  %7110 = vmatmul.msk.bf16.gmra.mxu3 %vm2017_vm1, %v5370_v51 }
 0x77a   : > { %v5185_v21 = vpop.f32.mrf.mxu2 }
 0x77b   : > { %v9958_v30 = vadd.f32 %v5185_v21, %v5157_v14  ;;  %v5159_v63 = vpop.f32.mrf.mxu1  ;;  %v5217_v39 = vpop.f32.mrf.mxu3 }
 0x77c   : > { %v5160_v36 = vadd.f32 %v5159_v63, %v5131_v32 }
 0x77d   : > { %v5132_v1 = vpop.f32.mrf.mxu0 }
 0x77e   : > { %v5133_v28 = vadd.f32 %v5132_v1, %v9889_v19  ;;  %7102 = vmatmul.msk.bf16.gmra.mxu1 %vm2017_vm1, %v5370_v51 }
 0x77f   : > { %7106 = vmatmul.msk.bf16.gmra.mxu2 %vm2017_vm1, %v5370_v51 }
 0x782   : > { %v5188_v38 = vpop.f32.mrf.mxu2 }
 0x783   : > { %v9963_v44 = vadd.f32 %v5188_v38, %v5160_v36  ;;  %v5161_v53 = vpop.f32.mrf.mxu1  ;;  %v5219_v55 = vpop.f32.mrf.mxu3 }
 0x784   : > { %v5162_v7 = vadd.f32 %v5161_v53, %v5133_v28  ;;  %v5220_v4 = vadd.f32 %v5219_v55, %v9899_v13  ;;  %v5208_v13 = vadd.f32 %v9924_v58, %v9777_v57  ;;  %v5213_v57 = vadd.f32 %v9946_v17, %v9849_v2 }
 0x785   : > { %v5231_v23 = vpop.f32.mrf.mxu0  ;;  %v5218_v2 = vadd.f32 %v5217_v39, %v9885_v41 }
 0x786   : > { %v5232_v46 = vadd.f32 %v5231_v23, %v5203_v52 }
 0x78a   : > { %v5190_v37 = vpop.f32.mrf.mxu2 }
 0x78b   : > { %v9968_v18 = vadd.f32 %v5190_v37, %v5162_v7  ;;  %v5260_v19 = vpop.f32.mrf.mxu1  ;;  %v5318_v33 = vpop.f32.mrf.mxu3 }
 0x78c   : > { %v9972_v59 = vadd.f32 %v5260_v19, %v5232_v46 }
 0x78d   : > { %v5233_v6 = vpop.f32.mrf.mxu0 }
 0x78e   : > { %v5234_v12 = vadd.f32 %v5233_v6, %v5205_v40 }
 0x792   : > { %v5289_v47 = vpop.f32.mrf.mxu2 }
 0x793   : > { %v5262_v0 = vpop.f32.mrf.mxu1  ;;  %v9974_v20 = vpop.f32.mrf.mxu3  ;;  %v5290_v41 = vadd.f32 %v5289_v47, %v9727_v24 }
 0x794   : > { %v9978_v27 = vadd.f32 %v5262_v0, %v5234_v12 }
 0x795   : > { %v5236_v60 = vpop.f32.mrf.mxu0 }
 0x796   : > { %v5237_v45 = vadd.f32 %v5236_v60, %v5208_v13  ;;  %v5534_v60 = vld [vmem:[%s10259_s26] sm:$0x7] }
 0x797   : > { %v10029_v24 = vperm.slane %v5534_v60, 2 }
 0x79a   : > { %v5291_v29 = vpop.f32.mrf.mxu2 }
 0x79b   : > { %v5265_v25 = vpop.f32.mrf.mxu1  ;;  %v9980_v31 = vpop.f32.mrf.mxu3  ;;  %v5292_v47 = vadd.f32 %v5291_v29, %v9735_v15 }
 0x79c   : > { %v9984_v26 = vadd.f32 %v5265_v25, %v5237_v45  ;;  %v5319_v45 = vadd.f32 %v5318_v33, %v5290_v41 }
 0x79d   : > { %v5238_v35 = vpop.f32.mrf.mxu0  ;;  %v5321_v15 = vadd.f32 %v9974_v20, %v5292_v47  ;;  %v10507_v20 = vld [vmem:[#allocation16_spill] sm:$0xff] }
 0x79e   : > { %v5239_v16 = vadd.f32 %v5238_v35, %v5210_v5  ;;  %v10027_v35 = vperm.slane %v5534_v60, 0  ;;  %v10508_v47 = vmax.f32 %v10507_v20, 0.0  ;;  %v10513_v20 = vld [vmem:[#allocation17_spill] sm:$0xff] }
 0x7a2   : > { %v5294_v14 = vpop.f32.mrf.mxu2 }
 0x7a3   : > { %v5267_v3 = vpop.f32.mrf.mxu1  ;;  %v9986_v51 = vpop.f32.mrf.mxu3 }
 0x7a4   : > { %v9990_v58 = vadd.f32 %v5267_v3, %v5239_v16 }
 0x7a5   : > { %v5241_v32 = vpop.f32.mrf.mxu0 }
 0x7a6   : > { %v5242_v21 = vadd.f32 %v5241_v32, %v5213_v57 }
 0x7aa   : > { %v9992_v63 = vpop.f32.mrf.mxu2 }
 0x7ab   : > { %v5270_v36 = vpop.f32.mrf.mxu1  ;;  %v9994_v1 = vpop.f32.mrf.mxu3 }
 0x7ac   : > { %v9997_v54 = vadd.f32 %v5270_v36, %v5242_v21 }
 0x7ad   : > { %v5243_v28 = vpop.f32.mrf.mxu0 }
 0x7ae   : > { %v5244_v38 = vadd.f32 %v5243_v28, %v5215_v8 }
 0x7b2   : > { %v9999_v53 = vpop.f32.mrf.mxu2 }
 0x7b3   : > { %v5272_v55 = vpop.f32.mrf.mxu1  ;;  %v10001_v52 = vpop.f32.mrf.mxu3 }
 0x7b4   : > { %v10004_v17 = vadd.f32 %v5272_v55, %v5244_v38 }
 0x7b5   : > { %v5246_v7 = vpop.f32.mrf.mxu0 }
 0x7b6   : > { %v5247_v23 = vadd.f32 %v5246_v7, %v5218_v2 }
 0x7ba   : > { %v10006_v46 = vpop.f32.mrf.mxu2 }
 0x7bb   : > { %v5275_v37 = vpop.f32.mrf.mxu1  ;;  %v10008_v19 = vpop.f32.mrf.mxu3 }
 0x7bc   : > { %v10010_v49 = vadd.f32 %v5275_v37, %v5247_v23  ;;  %v5295_v37 = vadd.f32 %v5294_v14, %v9763_v56 }
 0x7bd   : > { %v5248_v43 = vpop.f32.mrf.mxu0 }
 0x7be   : > { %v5249_v40 = vadd.f32 %v5248_v43, %v5220_v4  ;;  %v5566_v4 = vld [vmem:[%s10260_s27] sm:$0x7] }
 0x7bf   : > { %v10033_v32 = vperm.slane %v5566_v4, 0  ;;  %v10035_v21 = vperm.slane %v5566_v4, 2 }
 0x7c2   : > { %v10012_v6 = vpop.f32.mrf.mxu2 }
 0x7c3   : > { %v5277_v12 = vpop.f32.mrf.mxu1  ;;  %v10014_v0 = vpop.f32.mrf.mxu3 }
 0x7c4   : > { %v10017_v39 = vadd.f32 %v5277_v12, %v5249_v40  ;;  %v10049_v40 = vperm.slane %v5566_v4, 1 }
 0x7c5   : > { %v5347_v13 = vpop.f32.mrf.mxu0 }
 0x7c6   : > { %v5348_v25 = vadd.f32 %v5347_v13, %v5319_v45  ;;  %v10505_v13 = vld [vmem:[#allocation12_spill] sm:$0xff] }
 0x7c7   : > { %v10506_v45 = vmax.f32 %v10505_v13, 0.0 }
 0x7ca   : > { %v10025_v5 = vpop.f32.mrf.mxu2 }
 0x7cb   : > { %v5432_v16 = vpop.f32.mrf.mxu1  ;;  %v5490_v3 = vpop.f32.mrf.mxu3 }
 0x7cc   : > { %v5510_v57 = vadd.f32 %v5432_v16, %v9911_v10  ;;  %v5512_v33 = vadd.f32 %v5490_v3, %v5348_v25  ;;  %v10045_v10 = vperm.slane %v5534_v60, 1 }
 0x7cd   : > { %v5349_v36 = vpop.f32.mrf.mxu0 }
 0x7ce   : > { %v5542_v8 = vmul.f32 %v10027_v35, %v5510_v57  ;;  %v5544_v28 = vmul.f32 %v10029_v24, %v5512_v33  ;;  %v5350_v7 = vadd.f32 %v5349_v36, %v5321_v15 }
 0x7d0   : > { %v5574_v38 = vadd.f32 %v10033_v32, %v5542_v8  ;;  %v5576_v55 = vadd.f32 %v10035_v21, %v5544_v28  ;;  %v5324_v28 = vadd.f32 %v9980_v31, %v5295_v37 }
 0x7d2   : > { %v5598_v29 = vmax.f32 %v5574_v38, 0.0  ;;  %v5600_v2 = vmax.f32 %v5576_v55, 0.0  ;;  %v5461_v23 = vpop.f32.mrf.mxu2 }
 0x7d3   : > { %v5511_v43 = vadd.f32 %v5461_v23, %v9972_v59  ;;  %v5434_v12 = vpop.f32.mrf.mxu1  ;;  %v5492_v41 = vpop.f32.mrf.mxu3  ;;  %v10509_v23 = vld [vmem:[#allocation14_spill] sm:$0xff] }
 0x7d4   : > { %v5622_v25 = vadd.f32 %v5598_v29, %v10506_v45  ;;  %v5624_v16 = vadd.f32 %v5600_v2, %v10508_v47  ;;  %v5513_v60 = vadd.f32 %v5434_v12, %v9922_v50  ;;  %v5515_v3 = vadd.f32 %v5492_v41, %v5350_v7 }
 0x7d5   : > { %v5543_v57 = vmul.f32 %v10045_v10, %v5511_v43  ;;  %v5352_v33 = vpop.f32.mrf.mxu0  ;;  %v5297_v7 = vadd.f32 %v9992_v63, %v9789_v62  ;;  %v10510_v43 = vmax.f32 %v10509_v23, 0.0  ;;  %v10514_v47 = vmax.f32 %v10513_v20, 0.0 }
 0x7d6   : > { %v5646_v36 = vmax.f32 %v5622_v25, 0.0  ;;  %v5648_v56 = vmax.f32 %v5624_v16, 0.0  ;;  %v5545_v59 = vmul.f32 %v10027_v35, %v5513_v60  ;;  %v5547_v14 = vmul.f32 %v10029_v24, %v5515_v3  ;;  %v10511_v25 = vld [vmem:[#allocation13_spill] sm:$0xff] }
 0x7d7   : > { %v5575_v4 = vadd.f32 %v10049_v40, %v5543_v57  ;;  %v5353_v29 = vadd.f32 %v5352_v33, %v5324_v28  ;;  %v10512_v31 = vmax.f32 %v10511_v25, 0.0 }
 0x7d8   : > { %5670 = vst [vmem:[%s10060_s8] sm:$0xff] %v5646_v36  ;;  %v5577_v8 = vadd.f32 %v10033_v32, %v5545_v59  ;;  %v5579_v50 = vadd.f32 %v10035_v21, %v5547_v14 }
 0x7d9   : > { %5672 = vst [vmem:[%s10060_s8 + $0x10] sm:$0xff] %v5648_v56  ;;  %v5599_v38 = vmax.f32 %v5575_v4, 0.0 }
 0x7da   : > { %v5601_v55 = vmax.f32 %v5577_v8, 0.0  ;;  %v5603_v15 = vmax.f32 %v5579_v50, 0.0  ;;  %v5463_v2 = vpop.f32.mrf.mxu2 }
 0x7db   : > { %v5623_v12 = vadd.f32 %v5599_v38, %v10510_v43  ;;  %v5514_v41 = vadd.f32 %v5463_v2, %v9978_v27  ;;  %v5437_v13 = vpop.f32.mrf.mxu1  ;;  %v5495_v45 = vpop.f32.mrf.mxu3 }
 0x7dc   : > { %v5625_v37 = vadd.f32 %v5601_v55, %v10512_v31  ;;  %v5627_v16 = vadd.f32 %v5603_v15, %v10514_v47  ;;  %v5516_v60 = vadd.f32 %v5437_v13, %v9933_v61  ;;  %v5518_v3 = vadd.f32 %v5495_v45, %v5353_v29  ;;  %v10515_v29 = vld [vmem:[#allocation15_spill] sm:$0xff]  ;;  %v10517_v13 = vld [vmem:[#allocation18_spill] sm:$0xff] }
 0x7dd   : > { %v5647_v62 = vmax.f32 %v5623_v12, 0.0  ;;  %v5546_v63 = vmul.f32 %v10045_v10, %v5514_v41  ;;  %v5354_v57 = vpop.f32.mrf.mxu0  ;;  %v5326_v61 = vadd.f32 %v9986_v51, %v5297_v7  ;;  %v5300_v15 = vadd.f32 %v9999_v53, %v9827_v48  ;;  %v10519_v45 = vld [vmem:[#allocation22_spill] sm:$0xff] }
 0x7de   : > { %v5649_v33 = vmax.f32 %v5625_v37, 0.0  ;;  %v5651_v36 = vmax.f32 %v5627_v16, 0.0  ;;  %v5548_v27 = vmul.f32 %v10027_v35, %v5516_v60  ;;  %v5550_v56 = vmul.f32 %v10029_v24, %v5518_v3 }
 0x7df   : > { %5671 = vst [vmem:[%s10060_s8 + $0x8] sm:$0xff] %v5647_v62  ;;  %v5578_v59 = vadd.f32 %v10049_v40, %v5546_v63  ;;  %v5355_v38 = vadd.f32 %v5354_v57, %v5326_v61  ;;  %v10516_v2 = vmax.f32 %v10515_v29, 0.0  ;;  %v10518_v51 = vmax.f32 %v10517_v13, 0.0  ;;  %v10525_v29 = vld [vmem:[#allocation23_spill] sm:$0xff] }
 0x7e0   : > { %5673 = vst [vmem:[%s10060_s8 + $0x18] sm:$0xff] %v5649_v33  ;;  %v5580_v14 = vadd.f32 %v10033_v32, %v5548_v27  ;;  %v5582_v4 = vadd.f32 %v10035_v21, %v5550_v56  ;;  %v10520_v25 = vmax.f32 %v10519_v45, 0.0 }
 0x7e1   : > { %5675 = vst [vmem:[%s10060_s8 + $0x28] sm:$0xff] %v5651_v36  ;;  %v5602_v8 = vmax.f32 %v5578_v59, 0.0 }
 0x7e2   : > { %v5604_v50 = vmax.f32 %v5580_v14, 0.0  ;;  %v5606_v28 = vmax.f32 %v5582_v4, 0.0  ;;  %v5466_v55 = vpop.f32.mrf.mxu2  ;;  %v5302_v14 = vadd.f32 %v10006_v46, %v9854_v42  ;;  %v10521_v4 = vld [vmem:[#allocation20_spill] sm:$0xff] }
 0x7e3   : > { %v5626_v23 = vadd.f32 %v5602_v8, %v10516_v2  ;;  %v5517_v43 = vadd.f32 %v5466_v55, %v9984_v26  ;;  %v5439_v12 = vpop.f32.mrf.mxu1  ;;  %v5497_v41 = vpop.f32.mrf.mxu3  ;;  %v10522_v61 = vmax.f32 %v10521_v4, 0.0  ;;  %v10523_v55 = vld [vmem:[#allocation19_spill] sm:$0xff]  ;;  %v10526_v2 = vmax.f32 %v10525_v29, 0.0 }
 0x7e4   : > { %v5628_v7 = vadd.f32 %v5604_v50, %v10518_v51  ;;  %v5630_v31 = vadd.f32 %v5606_v28, %v10520_v25  ;;  %v5519_v37 = vadd.f32 %v5439_v12, %v9944_v11  ;;  %v5521_v20 = vadd.f32 %v5497_v41, %v5355_v38 }
 0x7e5   : > { %v5650_v48 = vmax.f32 %v5626_v23, 0.0  ;;  %v5549_v53 = vmul.f32 %v10045_v10, %v5517_v43  ;;  %v5357_v47 = vpop.f32.mrf.mxu0  ;;  %v5329_v11 = vadd.f32 %v9994_v1, %v5300_v15  ;;  %v10524_v1 = vmax.f32 %v10523_v55, 0.0 }
 0x7e6   : > { %v5652_v16 = vmax.f32 %v5628_v7, 0.0  ;;  %v5654_v60 = vmax.f32 %v5630_v31, 0.0  ;;  %v5551_v26 = vmul.f32 %v10027_v35, %v5519_v37  ;;  %v5553_v3 = vmul.f32 %v10029_v24, %v5521_v20 }
 0x7e7   : > { %5674 = vst [vmem:[%s10060_s8 + $0x20] sm:$0xff] %v5650_v48  ;;  %v5581_v62 = vadd.f32 %v10049_v40, %v5549_v53  ;;  %v5358_v56 = vadd.f32 %v5357_v47, %v5329_v11  ;;  %v10529_v11 = vld [vmem:[#allocation24_spill] sm:$0xff] }
 0x7e8   : > { %5676 = vst [vmem:[%s10060_s8 + $0x30] sm:$0xff] %v5652_v16  ;;  %v5583_v63 = vadd.f32 %v10033_v32, %v5551_v26  ;;  %v5585_v57 = vadd.f32 %v10035_v21, %v5553_v3  ;;  %v5305_v16 = vadd.f32 %v10012_v6, %v9871_v34 }
 0x7e9   : > { %5678 = vst [vmem:[%s10060_s8 + $0x40] sm:$0xff] %v5654_v60  ;;  %v5605_v33 = vmax.f32 %v5581_v62, 0.0  ;;  %v10527_v60 = vld [vmem:[#allocation21_spill] sm:$0xff] }
 0x7ea   : > { %v5607_v36 = vmax.f32 %v5583_v63, 0.0  ;;  %v5609_v27 = vmax.f32 %v5585_v57, 0.0  ;;  %v5468_v59 = vpop.f32.mrf.mxu2  ;;  %v10528_v26 = vmax.f32 %v10527_v60, 0.0 }
 0x7eb   : > { %v5629_v8 = vadd.f32 %v5605_v33, %v10522_v61  ;;  %v5520_v50 = vadd.f32 %v5468_v59, %v9990_v58  ;;  %v5442_v28 = vpop.f32.mrf.mxu1  ;;  %v5500_v38 = vpop.f32.mrf.mxu3 }
 0x7ec   : > { %v5631_v15 = vadd.f32 %v5607_v36, %v10524_v1  ;;  %v5633_v23 = vadd.f32 %v5609_v27, %v10526_v2  ;;  %v5522_v43 = vadd.f32 %v5442_v28, %v9953_v9  ;;  %v5524_v12 = vadd.f32 %v5500_v38, %v5358_v56  ;;  %v10531_v36 = vld [vmem:[#allocation28_spill] sm:$0xff] }
 0x7ed   : > { %v5653_v42 = vmax.f32 %v5629_v8, 0.0  ;;  %v5552_v46 = vmul.f32 %v10045_v10, %v5520_v50  ;;  %v5359_v41 = vpop.f32.mrf.mxu0  ;;  %v5331_v9 = vadd.f32 %v10001_v52, %v5302_v14  ;;  %v10530_v52 = vmax.f32 %v10529_v11, 0.0 }
 0x7ee   : > { %v5655_v13 = vmax.f32 %v5631_v15, 0.0  ;;  %v5657_v51 = vmax.f32 %v5633_v23, 0.0  ;;  %v5554_v58 = vmul.f32 %v10027_v35, %v5522_v43  ;;  %v5556_v7 = vmul.f32 %v10029_v24, %v5524_v12  ;;  %v10533_v12 = vld [vmem:[#allocation26_spill] sm:$0xff] }
 0x7ef   : > { %5677 = vst [vmem:[%s10060_s8 + $0x38] sm:$0xff] %v5653_v42  ;;  %v5584_v45 = vadd.f32 %v10049_v40, %v5552_v46  ;;  %v5360_v53 = vadd.f32 %v5359_v41, %v5331_v9  ;;  %v10532_v27 = vmax.f32 %v10531_v36, 0.0  ;;  %v5307_v43 = vadd.f32 %v10025_v5, %v9891_v22 }
 0x7f0   : > { %5679 = vst [vmem:[%s10060_s8 + $0x48] sm:$0xff] %v5655_v13  ;;  %v5586_v25 = vadd.f32 %v10033_v32, %v5554_v58  ;;  %v5588_v31 = vadd.f32 %v10035_v21, %v5556_v7  ;;  %v10534_v42 = vmax.f32 %v10533_v12, 0.0  ;;  %v10535_v58 = vld [vmem:[#allocation25_spill] sm:$0xff] }
 0x7f1   : > { %5681 = vst [vmem:[%s10060_s8 + $0x58] sm:$0xff] %v5657_v51  ;;  %v5608_v37 = vmax.f32 %v5584_v45, 0.0  ;;  %v10537_v45 = vld [vmem:[#allocation29_spill] sm:$0xff] }
 0x7f2   : > { %v5610_v20 = vmax.f32 %v5586_v25, 0.0  ;;  %v5612_v48 = vmax.f32 %v5588_v31, 0.0  ;;  %v5471_v47 = vpop.f32.mrf.mxu2  ;;  %v10538_v25 = vmax.f32 %v10537_v45, 0.0 }
 0x7f3   : > { %v5632_v3 = vadd.f32 %v5608_v37, %v10528_v26  ;;  %v5523_v62 = vadd.f32 %v5471_v47, %v9997_v54  ;;  %v5444_v63 = vpop.f32.mrf.mxu1  ;;  %v5502_v57 = vpop.f32.mrf.mxu3 }
 0x7f4   : > { %v5634_v33 = vadd.f32 %v5610_v20, %v10530_v52  ;;  %v5636_v56 = vadd.f32 %v5612_v48, %v10532_v27  ;;  %v5525_v59 = vadd.f32 %v5444_v63, %v9958_v30  ;;  %v5527_v14 = vadd.f32 %v5502_v57, %v5360_v53  ;;  %v10539_v52 = vld [vmem:[#allocation27_spill] sm:$0xff] }
 0x7f5   : > { %v5656_v34 = vmax.f32 %v5632_v3, 0.0  ;;  %v5555_v6 = vmul.f32 %v10045_v10, %v5523_v62  ;;  %v5362_v4 = vpop.f32.mrf.mxu0  ;;  %v5334_v30 = vadd.f32 %v10008_v19, %v5305_v16  ;;  %v10536_v19 = vmax.f32 %v10535_v58, 0.0 }
 0x7f6   : > { %v5658_v61 = vmax.f32 %v5634_v33, 0.0  ;;  %v5660_v8 = vmax.f32 %v5636_v56, 0.0  ;;  %v5557_v54 = vmul.f32 %v10027_v35, %v5525_v59  ;;  %v5559_v50 = vmul.f32 %v10029_v24, %v5527_v14  ;;  %v10541_v14 = vld [vmem:[#allocation30_spill] sm:$0xff] }
 0x7f7   : > { %5680 = vst [vmem:[%s10060_s8 + $0x50] sm:$0xff] %v5656_v34  ;;  %v5587_v28 = vadd.f32 %v10049_v40, %v5555_v6  ;;  %v5363_v2 = vadd.f32 %v5362_v4, %v5334_v30  ;;  %v10540_v33 = vmax.f32 %v10539_v52, 0.0  ;;  %v10542_v34 = vmax.f32 %v10541_v14, 0.0 }
 0x7f8   : > { %5682 = vst [vmem:[%s10060_s8 + $0x60] sm:$0xff] %v5658_v61  ;;  %v5589_v38 = vadd.f32 %v10033_v32, %v5557_v54  ;;  %v5591_v55 = vadd.f32 %v10035_v21, %v5559_v50 }
 0x7f9   : > { %5684 = vst [vmem:[%s10060_s8 + $0x70] sm:$0xff] %v5660_v8  ;;  %v5611_v1 = vmax.f32 %v5587_v28, 0.0 }
 0x7fa   : > { %v5613_v15 = vmax.f32 %v5589_v38, 0.0  ;;  %v5615_v29 = vmax.f32 %v5591_v55, 0.0  ;;  %v5473_v23 = vpop.f32.mrf.mxu2 }
 0x7fb   : > { %v5635_v46 = vadd.f32 %v5611_v1, %v10534_v42  ;;  %v5526_v41 = vadd.f32 %v5473_v23, %v10004_v17  ;;  %v5447_v13 = vpop.f32.mrf.mxu1  ;;  %v5505_v51 = vpop.f32.mrf.mxu3 }
 0x7fc   : > { %v5637_v7 = vadd.f32 %v5613_v15, %v10536_v19  ;;  %v5639_v31 = vadd.f32 %v5615_v29, %v10538_v25  ;;  %v5528_v9 = vadd.f32 %v5447_v13, %v9963_v44  ;;  %v5530_v37 = vadd.f32 %v5505_v51, %v5363_v2  ;;  %v10549_v13 = vld [vmem:[#allocation35_spill] sm:$0xff] }
 0x7fd   : > { %v5659_v20 = vmax.f32 %v5635_v46, 0.0  ;;  %v5558_v22 = vmul.f32 %v10045_v10, %v5526_v41  ;;  %v5364_v16 = vpop.f32.mrf.mxu0  ;;  %v5336_v44 = vadd.f32 %v10014_v0, %v5307_v43  ;;  %v10543_v0 = vld [vmem:[#allocation34_spill] sm:$0xff]  ;;  %v10547_v46 = vld [vmem:[#allocation31_spill] sm:$0xff] }
 0x7fe   : > { %v5661_v5 = vmax.f32 %v5637_v7, 0.0  ;;  %v5663_v48 = vmax.f32 %v5639_v31, 0.0  ;;  %v5560_v17 = vmul.f32 %v10027_v35, %v5528_v9  ;;  %v5562_v53 = vmul.f32 %v10029_v24, %v5530_v37  ;;  %v10552_v31 = vld [vmem:[#allocation33_spill] sm:$0xff] }
 0x7ff   : > { %5683 = vst [vmem:[%s10060_s8 + $0x68] sm:$0xff] %v5659_v20  ;;  %v5590_v47 = vadd.f32 %v10049_v40, %v5558_v22  ;;  %v5365_v57 = vadd.f32 %v5364_v16, %v5336_v44  ;;  %v10544_v4 = vmax.f32 %v10543_v0, 0.0  ;;  %v10548_v41 = vmax.f32 %v10547_v46, 0.0 }
 0x800   : > { %5685 = vst [vmem:[%s10060_s8 + $0x78] sm:$0xff] %v5661_v5  ;;  %v5592_v60 = vadd.f32 %v10033_v32, %v5560_v17  ;;  %v5594_v26 = vadd.f32 %v10035_v21, %v5562_v53  ;;  %v10553_v9 = vmax.f32 %v10552_v31, 0.0 }
 0x801   : > { %5687 = vst [vmem:[%s10060_s8 + $0x88] sm:$0xff] %v5663_v48  ;;  %v5614_v3 = vmax.f32 %v5590_v47, 0.0 }
 0x802   : > { %v5616_v62 = vmax.f32 %v5592_v60, 0.0  ;;  %v5618_v63 = vmax.f32 %v5594_v26, 0.0  ;;  %v5476_v11 = vpop.f32.mrf.mxu2 }
 0x803   : > { %v5638_v36 = vadd.f32 %v5614_v3, %v10540_v33  ;;  %v5529_v27 = vadd.f32 %v5476_v11, %v10010_v49  ;;  %v5449_v56 = vpop.f32.mrf.mxu1  ;;  %v5507_v59 = vpop.f32.mrf.mxu3 }
 0x804   : > { %v5640_v6 = vadd.f32 %v5616_v62, %v10542_v34  ;;  %v5642_v61 = vadd.f32 %v5618_v63, %v10544_v4  ;;  %v5531_v8 = vadd.f32 %v5449_v56, %v9968_v18  ;;  %v5533_v54 = vadd.f32 %v5507_v59, %v5365_v57 }
 0x805   : > { %v5662_v50 = vmax.f32 %v5638_v36, 0.0  ;;  %v5561_v28 = vmul.f32 %v10045_v10, %v5529_v27 }
 0x806   : > { %v5664_v38 = vmax.f32 %v5640_v6, 0.0  ;;  %v5666_v55 = vmax.f32 %v5642_v61, 0.0  ;;  %v5563_v49 = vmul.f32 %v10027_v35, %v5531_v8  ;;  %v5565_v30 = vmul.f32 %v10029_v24, %v5533_v54  ;;  %v10545_v35 = vld [vmem:[#allocation32_spill] sm:$0xff] }
 0x807   : > { %5686 = vst [vmem:[%s10060_s8 + $0x80] sm:$0xff] %v5662_v50  ;;  %v5593_v1 = vadd.f32 %v10049_v40, %v5561_v28  ;;  %v10546_v24 = vmax.f32 %v10545_v35, 0.0 }
 0x808   : > { %5688 = vst [vmem:[%s10060_s8 + $0x90] sm:$0xff] %v5664_v38  ;;  %v5595_v15 = vadd.f32 %v10033_v32, %v5563_v49  ;;  %v5597_v29 = vadd.f32 %v10035_v21, %v5565_v30  ;;  %v10550_v21 = vmax.f32 %v10549_v13, 0.0 }
 0x809   : > { %5690 = vst [vmem:[%s10060_s8 + $0xa0] sm:$0xff] %v5666_v55  ;;  %v5617_v18 = vmax.f32 %v5593_v1, 0.0 }
 0x80a   : > { %v5619_v2 = vmax.f32 %v5595_v15, 0.0  ;;  %v5621_v23 = vmax.f32 %v5597_v29, 0.0  ;;  %v5478_v43 = vpop.f32.mrf.mxu2 }
 0x80b   : > { %v5641_v12 = vadd.f32 %v5617_v18, %v10546_v24  ;;  %v5532_v42 = vadd.f32 %v5478_v43, %v10017_v39 }
 0x80c   : > { %v5643_v32 = vadd.f32 %v5619_v2, %v10548_v41  ;;  %v5645_v51 = vadd.f32 %v5621_v23, %v10550_v21 }
 0x80d   : > { %v5665_v58 = vmax.f32 %v5641_v12, 0.0  ;;  %v5564_v19 = vmul.f32 %v10045_v10, %v5532_v42 }
 0x80e   : > { %v5667_v7 = vmax.f32 %v5643_v32, 0.0  ;;  %v5669_v45 = vmax.f32 %v5645_v51, 0.0 }
 0x80f   : > { %5689 = vst [vmem:[%s10060_s8 + $0x98] sm:$0xff] %v5665_v58  ;;  %v5596_v39 = vadd.f32 %v10049_v40, %v5564_v19 }
 0x810   : > { %5691 = vst [vmem:[%s10060_s8 + $0xa8] sm:$0xff] %v5667_v7 }
 0x811   : > { %5693 = vst [vmem:[%s10060_s8 + $0xb8] sm:$0xff] %v5669_v45  ;;  %v5620_v25 = vmax.f32 %v5596_v39, 0.0 }
 0x813   : > { %v5644_v37 = vadd.f32 %v5620_v25, %v10553_v9 }
 0x815   : > { %v5668_v10 = vmax.f32 %v5644_v37, 0.0 }
 0x817   : > { %5692 = vst [vmem:[%s10060_s8 + $0xb0] sm:$0xff] %v5668_v10 }
 0x818   : > { %7452 = shalt.err (!%p7449_p3)
}
 0x819   : > { %s7489_s29 = smov 384   ;;  %s7490_s8 = smov 24  }
 0x81a   : > { %7370 = dma.vmem_to_hbm [thread:$0]  (%p7674_p5), %s5709_s1, 3072, %s5711_s9, %s5695_s4, %s7489_s29, %s7489_s29, %s7490_s8  }
 0x81b PF: > { %s10554_s12 = sld [smem:[#allocation7_spill]] }
 0x81c   : > { %s10555_s13 = sld [smem:[#allocation5_spill]] }
 0x821   : > { %p7376_p4 = scmp.ge.s32.totalorder %s10554_s12, 2 }
 0x822   : > { %s5725_s6 = sand.u32 1, %s10555_s13  }
 0x823   : > { %p7373_p7 = pnand %p7376_p4, %p7678_p6  ;;  %s5726_s10 = scalar_lea.sflag [#allocation3], %s5725_s6 }
 0x825   : > { %p7374_p8 = pneg %p7373_p7 }
 0x827   : > { %7470 = dma.done.wait (%p7374_p8), %s5726_s10, 3072  }
 0x828   : > { %7472 = vsyncadd (%p7374_p8), %s5726_s10, 4294964224  ;;  %s10557_s30 = sld [smem:[#allocation8_spill]]  ;;  %s10560_s8 = smov %s7479_s5 }
 0x829   : > { %s10558_s11 = sld [smem:[#allocation6_spill]] }
 0x82a   : > { %s10559_s9 = sld [smem:[#allocation9_spill]] }
 0x82e   : > { %p38_p9 = scmp.ge.s32.totalorder %s10557_s30, 4  }
 0x82f   : > { %s10561_s5 = smov %s10558_s11 }
 0x830   :  { %40 = sbr.rel (!%p38_p9) target bundleno = 19 (0x13), region = 191 }
 0x835   :  { %5732 = vsyncpa [#allocation3], 1 }
 0x836   :  { %5734 = vsyncpa [#allocation3 + $0x1], 1 }

</bundles_post_ra>
